<compile_context>
chip_gen: v6e
topology: v6e:2x2x1
jax: 0.10.0
libtpu: 0.0.40
codegen_flags: <defaults>
</compile_context>

<pallas_src>
import functools

import numpy as np
import jax
import jax.numpy as jnp
from jax import lax
from jax.experimental import pallas as pl
from jax.experimental.pallas import tpu as pltpu


# ---------------------------------------------------------------------------
# Fused Pallas kernel: whole forward pass for one tile of Nb samples
# ---------------------------------------------------------------------------
def _lenet_kernel(x_ref,
                  w1_ref, b1_ref, w2_ref, b2_ref,
                  wf1_ref, bf1_ref, wf2_ref, bf2_ref, wf3_ref, bf3_ref,
                  out_ref,
                  p1_ref, p2_ref,
                  *, nb):
    f32 = jnp.float32
    bf16 = jnp.bfloat16

    def conv_relu_widthpool(load_slab, w_ref, b_ref, K, half):
        """5x5 valid conv (banded matmul, batched in M) + bias + ReLU + width pool.

        load_slab(kh) -> (OH*nb, C*W) rows (oh, n) h-major.
        w_ref         -> (K, C*W, 2*half) bf16, columns = [even | odd] pooled cols.
        Returns (OH*nb, half) f32, ReLU'd and width-pooled.
        """
        acc = None
        for kh in range(K):
            slab = load_slab(kh).astype(bf16)
            part = jnp.dot(slab, w_ref[kh], preferred_element_type=f32)
            acc = part if acc is None else acc + part
        # width half of the 2x2 max-pool (even vs odd output column), then
        # bias once and ReLU.
        return jnp.maximum(jnp.maximum(acc[:, :half], acc[:, half:])
                           + b_ref[...], 0.0)

    # ---- conv1 + ReLU + 2x2 pool : x (32*nb, 96) -> p1 (14*nb, 84) ---------
    OH1, PH1 = 28, 14
    y1 = conv_relu_widthpool(
        lambda kh: x_ref[pl.ds(kh * nb, OH1 * nb), :], w1_ref, b1_ref, 5, 84)
    # height half of the pool: rows are (oh, n) h-major, so pairs are Nb-row blocks
    for ph in range(PH1):
        a = y1[(2 * ph) * nb:(2 * ph + 1) * nb, :]
        b = y1[(2 * ph + 1) * nb:(2 * ph + 2) * nb, :]
        p1_ref[pl.ds(ph * nb, nb), :] = jnp.maximum(a, b)

    # ---- conv2 + ReLU + 2x2 pool : p1 -> p2 (nb, 400), n-major, (h,c,w) lanes
    OH2, PH2 = 10, 5
    y2 = conv_relu_widthpool(
        lambda kh: p1_ref[pl.ds(kh * nb, OH2 * nb), :], w2_ref, b2_ref, 5, 80)
    for ph in range(PH2):
        a = y2[(2 * ph) * nb:(2 * ph + 1) * nb, :]
        b = y2[(2 * ph + 1) * nb:(2 * ph + 2) * nb, :]
        p2_ref[:, ph * 80:(ph + 1) * 80] = jnp.maximum(a, b)

    # ---- FC head: one K=400 matmul, then 128-lane-padded fc2 / fc3 ---------
    p2 = p2_ref[...].astype(bf16)                                  # (nb, 400)
    h1 = jnp.maximum(
        jnp.dot(p2, wf1_ref[...], preferred_element_type=f32) + bf1_ref[...], 0.0)
    h2 = jnp.maximum(
        jnp.dot(h1.astype(bf16), wf2_ref[...], preferred_element_type=f32)
        + bf2_ref[...], 0.0)
    out_ref[...] = (
        jnp.dot(h2.astype(bf16), wf3_ref[...], preferred_element_type=f32)
        + bf3_ref[...])


# ---------------------------------------------------------------------------
# One-time host-side repack of PyTorch-layout weights into matmul operands
# ---------------------------------------------------------------------------
def _conv_banded_weights(weight, bias, W):
    """Banded conv-as-matmul operands, shaped (K, C*W, 2*OC*PW).

    For an input slab rows=(oh, n), lanes=(c, w), conv output at (oh, n, oc, ow)
    equals sum_kh slab(h=oh+kh) @ M_kh with
        M_kh[c*W + w, oc*OW + ow] = weight[oc, c, kh, w - ow]   (0 <= w-ow < K).
    The OC*OW output columns are split into even / odd `ow` halves and
    concatenated on the column axis so one matmul per kh feeds the width pool.
    """
    w = np.asarray(weight, np.float32)                  # (OC, C, K, K)
    b = np.asarray(bias, np.float32)                    # (OC,)
    OC, C, K, _ = w.shape
    OW = W - K + 1
    PW = OW // 2
    M = np.zeros((K, C, W, OC, OW), np.float32)
    for kh in range(K):
        for kw in range(K):
            for ow in range(OW):
                M[kh, :, ow + kw, :, ow] = w[:, :, kh, kw].T    # (C, OC)
    M = M.reshape(K, C * W, OC, OW)
    w_cat = np.concatenate(
        [M[..., 0::2].reshape(K, C * W, OC * PW),       # even output columns
         M[..., 1::2].reshape(K, C * W, OC * PW)],      # odd output columns
        axis=-1)                                        # (K, C*W, 2*OC*PW)
    b_row = np.repeat(b, PW).reshape(1, OC * PW)
    return jnp.asarray(w_cat, jnp.bfloat16), jnp.asarray(b_row, jnp.float32)


def prepare_operands(params):
    w1, b1 = _conv_banded_weights(params["conv1_w"], params["conv1_b"], W=32)
    w2, b2 = _conv_banded_weights(params["conv2_w"], params["conv2_b"], W=14)

    # fc1: PyTorch flatten order is (c, h, w); the kernel's pool2 lanes are
    # (h, c, w), so permute weight rows.  Pad N: 120 -> 128 lanes.
    wf1 = np.asarray(params["fc1_w"], np.float32).reshape(120, 16, 5, 5)
    wf1 = wf1.transpose(0, 2, 1, 3).reshape(120, 400).T          # (400, 120)
    wf1p = np.zeros((400, 128), np.float32); wf1p[:, :120] = wf1
    bf1p = np.zeros((1, 128), np.float32)
    bf1p[0, :120] = np.asarray(params["fc1_b"], np.float32)

    wf2 = np.asarray(params["fc2_w"], np.float32).T              # (120, 84)
    wf2p = np.zeros((128, 128), np.float32); wf2p[:120, :84] = wf2
    bf2p = np.zeros((1, 128), np.float32)
    bf2p[0, :84] = np.asarray(params["fc2_b"], np.float32)

    wf3 = np.asarray(params["fc3_w"], np.float32).T              # (84, 5)
    wf3p = np.zeros((128, 128), np.float32); wf3p[:84, :5] = wf3
    bf3p = np.zeros((1, 128), np.float32)
    bf3p[0, :5] = np.asarray(params["fc3_b"], np.float32)

    return dict(
        w1=w1, b1=b1, w2=w2, b2=b2,
        wf1=jnp.asarray(wf1p, jnp.bfloat16), bf1=jnp.asarray(bf1p),
        wf2=jnp.asarray(wf2p, jnp.bfloat16), bf2=jnp.asarray(bf2p),
        wf3=jnp.asarray(wf3p, jnp.bfloat16), bf3=jnp.asarray(bf3p),
    )


# ---------------------------------------------------------------------------
# Forward pass: single pallas_call with a parallel batch grid
# ---------------------------------------------------------------------------
@functools.partial(jax.jit, static_argnames=("nb",))
def network_forward(ops, x_nchw, nb=8):
    # nb = per-grid-step batch tile; multiple of 8 for sublane alignment.
    # Generation note: raise nb on v5e/v6e (128 MiB VMEM); keep modest on v7x.
    assert nb % 8 == 0
    n = x_nchw.shape[0]
    g = pl.cdiv(n, nb)
    n_pad = g * nb
    x = x_nchw.astype(jnp.float32)
    if n_pad != n:
        x = jnp.pad(x, ((0, n_pad - n), (0, 0), (0, 0), (0, 0)))
    # NCHW -> per-tile rows (h, n) h-major / n-minor, lanes (c, w).
    x2d = (x.reshape(g, nb, 3, 32, 32)
             .transpose(0, 3, 1, 2, 4)          # (g, H, nb, C, W)
             .reshape(g * 32 * nb, 3 * 32))

    out = pl.pallas_call(
        functools.partial(_lenet_kernel, nb=nb),
        out_shape=jax.ShapeDtypeStruct((n_pad, 128), jnp.float32),
        grid=(g,),
        in_specs=[
            pl.BlockSpec((32 * nb, 96), lambda i: (i, 0)),       # input tile
            pl.BlockSpec((5, 96, 168), lambda i: (0, 0, 0)),     # conv1 banded W
            pl.BlockSpec((1, 84), lambda i: (0, 0)),             # conv1 bias
            pl.BlockSpec((5, 84, 160), lambda i: (0, 0, 0)),     # conv2 banded W
            pl.BlockSpec((1, 80), lambda i: (0, 0)),             # conv2 bias
            pl.BlockSpec((400, 128), lambda i: (0, 0)),          # fc1 W (padded)
            pl.BlockSpec((1, 128), lambda i: (0, 0)),            # fc1 b
            pl.BlockSpec((128, 128), lambda i: (0, 0)),          # fc2 W (padded)
            pl.BlockSpec((1, 128), lambda i: (0, 0)),            # fc2 b
            pl.BlockSpec((128, 128), lambda i: (0, 0)),          # fc3 W (padded)
            pl.BlockSpec((1, 128), lambda i: (0, 0)),            # fc3 b
        ],
        out_specs=pl.BlockSpec((nb, 128), lambda i: (i, 0)),
        scratch_shapes=[
            pltpu.VMEM((14 * nb, 84), jnp.float32),   # pool1, rows (ph, n)
            pltpu.VMEM((nb, 400), jnp.float32),       # pool2, n-major, 400 lanes
        ],
        compiler_params=pltpu.CompilerParams(
            dimension_semantics=("parallel",),
            vmem_limit_bytes=32 * 1024 * 1024),
    )(x2d, ops["w1"], ops["b1"], ops["w2"], ops["b2"],
      ops["wf1"], ops["bf1"], ops["wf2"], ops["bf2"], ops["wf3"], ops["bf3"])
    return out[:n, :5]


# ---------------------------------------------------------------------------
# Parameter init (PyTorch default-style) and a pure-JAX reference
# ---------------------------------------------------------------------------
def init_params(key):
    ks = jax.random.split(key, 10)

    def u(k, shape, fan_in):
        bound = 1.0 / jnp.sqrt(fan_in)
        return jax.random.uniform(k, shape, jnp.float32, -bound, bound)

    return {
        "conv1_w": u(ks[0], (6, 3, 5, 5), 3 * 5 * 5),
        "conv1_b": u(ks[1], (6,), 3 * 5 * 5),
        "conv2_w": u(ks[2], (16, 6, 5, 5), 6 * 5 * 5),
        "conv2_b": u(ks[3], (16,), 6 * 5 * 5),
        "fc1_w": u(ks[4], (120, 16 * 5 * 5), 16 * 5 * 5),
        "fc1_b": u(ks[5], (120,), 16 * 5 * 5),
        "fc2_w": u(ks[6], (84, 120), 120),
        "fc2_b": u(ks[7], (84,), 120),
        "fc3_w": u(ks[8], (5, 84), 84),
        "fc3_b": u(ks[9], (5,), 84),
    }


def _reference_forward(params, x):
    dn1 = lax.conv_dimension_numbers(x.shape, params["conv1_w"].shape,
                                     ("NCHW", "OIHW", "NCHW"))
    y = lax.conv_general_dilated(x, params["conv1_w"], (1, 1), "VALID",
                                 dimension_numbers=dn1,
                                 precision=lax.Precision.HIGHEST)
    y = jnp.maximum(y + params["conv1_b"][None, :, None, None], 0.0)
    y = lax.reduce_window(y, -jnp.inf, lax.max, (1, 1, 2, 2), (1, 1, 2, 2), "VALID")
    dn2 = lax.conv_dimension_numbers(y.shape, params["conv2_w"].shape,
                                     ("NCHW", "OIHW", "NCHW"))
    y = lax.conv_general_dilated(y, params["conv2_w"], (1, 1), "VALID",
                                 dimension_numbers=dn2,
                                 precision=lax.Precision.HIGHEST)
    y = jnp.maximum(y + params["conv2_b"][None, :, None, None], 0.0)
    y = lax.reduce_window(y, -jnp.inf, lax.max, (1, 1, 2, 2), (1, 1, 2, 2), "VALID")
    y = y.reshape(y.shape[0], -1)
    y = jnp.maximum(jnp.dot(y, params["fc1_w"].T, precision=lax.Precision.HIGHEST)
                    + params["fc1_b"], 0.0)
    y = jnp.maximum(jnp.dot(y, params["fc2_w"].T, precision=lax.Precision.HIGHEST)
                    + params["fc2_b"], 0.0)
    return jnp.dot(y, params["fc3_w"].T, precision=lax.Precision.HIGHEST) + params["fc3_b"]


if __name__ == "__main__":
    key = jax.random.PRNGKey(0)
    k_params, k_x = jax.random.split(key)
    params = init_params(k_params)
    ops = prepare_operands(params)
    # Input shape implied by fc1 = 16*5*5 : (N, 3, 32, 32)
    x = jax.random.normal(k_x, (2, 3, 32, 32), jnp.float32)

    out = jax.block_until_ready(network_forward(ops, x, nb=8))
    assert out.shape == (2, 5), out.shape

    ref = jax.block_until_ready(_reference_forward(params, x))
    np.testing.assert_allclose(np.asarray(out), np.asarray(ref), rtol=5e-2, atol=5e-2)

    print("KERNEL_OK")
</pallas_src>

<mosaic_0001>
module attributes {stable_mosaic.version = 11 : i64} {
  func.func @_lenet_kernel(%arg0: i32, %arg1: memref<256x96xf32, #tpu.memory_space<vmem>>, %arg2: memref<5x96x168xbf16, #tpu.memory_space<vmem>>, %arg3: memref<1x84xf32, #tpu.memory_space<vmem>>, %arg4: memref<5x84x160xbf16, #tpu.memory_space<vmem>>, %arg5: memref<1x80xf32, #tpu.memory_space<vmem>>, %arg6: memref<400x128xbf16, #tpu.memory_space<vmem>>, %arg7: memref<1x128xf32, #tpu.memory_space<vmem>>, %arg8: memref<128x128xbf16, #tpu.memory_space<vmem>>, %arg9: memref<1x128xf32, #tpu.memory_space<vmem>>, %arg10: memref<128x128xbf16, #tpu.memory_space<vmem>>, %arg11: memref<1x128xf32, #tpu.memory_space<vmem>>, %arg12: memref<8x128xf32, #tpu.memory_space<vmem>>, %arg13: memref<112x84xf32, #tpu.memory_space<vmem>>, %arg14: memref<8x400xf32, #tpu.memory_space<vmem>>) attributes {dimension_semantics = [#tpu.dimension_semantics<parallel>], iteration_bounds = array<i64: 1>, scalar_prefetch = 0 : i64, scratch_operands = 2 : i64, tpu.core_type = #tpu.core_type<tc>, window_params = [{transform_indices = @transform_0, window_bounds = array<i64: 256, 96>}, {pipeline_mode = #tpu.pipeline_mode<synchronous>, transform_indices = @transform_1, window_bounds = array<i64: 5, 96, 168>}, {pipeline_mode = #tpu.pipeline_mode<synchronous>, transform_indices = @transform_2, window_bounds = array<i64: 1, 84>}, {pipeline_mode = #tpu.pipeline_mode<synchronous>, transform_indices = @transform_3, window_bounds = array<i64: 5, 84, 160>}, {pipeline_mode = #tpu.pipeline_mode<synchronous>, transform_indices = @transform_4, window_bounds = array<i64: 1, 80>}, {pipeline_mode = #tpu.pipeline_mode<synchronous>, transform_indices = @transform_5, window_bounds = array<i64: 400, 128>}, {pipeline_mode = #tpu.pipeline_mode<synchronous>, transform_indices = @transform_6, window_bounds = array<i64: 1, 128>}, {pipeline_mode = #tpu.pipeline_mode<synchronous>, transform_indices = @transform_7, window_bounds = array<i64: 128, 128>}, {pipeline_mode = #tpu.pipeline_mode<synchronous>, transform_indices = @transform_8, window_bounds = array<i64: 1, 128>}, {pipeline_mode = #tpu.pipeline_mode<synchronous>, transform_indices = @transform_9, window_bounds = array<i64: 128, 128>}, {pipeline_mode = #tpu.pipeline_mode<synchronous>, transform_indices = @transform_10, window_bounds = array<i64: 1, 128>}, {transform_indices = @transform_11, window_bounds = array<i64: 8, 128>}]} {
    %c0 = arith.constant 0 : index
    %c0_0 = arith.constant 0 : index
    %0 = vector.load %arg1[%c0, %c0_0] : memref<256x96xf32, #tpu.memory_space<vmem>>, vector<224x96xf32>
    %1 = arith.truncf %0 : vector<224x96xf32> to vector<224x96xbf16>
    %c0_1 = arith.constant 0 : index
    %c0_2 = arith.constant 0 : index
    %c0_3 = arith.constant 0 : index
    %2 = vector.load %arg2[%c0_1, %c0_2, %c0_3] : memref<5x96x168xbf16, #tpu.memory_space<vmem>>, vector<1x96x168xbf16>
    %3 = vector.shape_cast %2 : vector<1x96x168xbf16> to vector<96x168xbf16>
    %cst = arith.constant dense<0.000000e+00> : vector<224x168xf32>
    %4 = tpu.matmul %1, %3, %cst {dimension_numbers = #tpu.dot_dimension_numbers<[1], [0], [0], [1], [0, 0, 1, 1], [], []>} : vector<224x96xbf16>, vector<96x168xbf16>, vector<224x168xf32> -> vector<224x168xf32>
    %c8 = arith.constant 8 : index
    %c0_4 = arith.constant 0 : index
    %5 = vector.load %arg1[%c8, %c0_4] : memref<256x96xf32, #tpu.memory_space<vmem>>, vector<224x96xf32>
    %6 = arith.truncf %5 : vector<224x96xf32> to vector<224x96xbf16>
    %c1 = arith.constant 1 : index
    %c0_5 = arith.constant 0 : index
    %c0_6 = arith.constant 0 : index
    %7 = vector.load %arg2[%c1, %c0_5, %c0_6] : memref<5x96x168xbf16, #tpu.memory_space<vmem>>, vector<1x96x168xbf16>
    %8 = vector.shape_cast %7 : vector<1x96x168xbf16> to vector<96x168xbf16>
    %cst_7 = arith.constant dense<0.000000e+00> : vector<224x168xf32>
    %9 = tpu.matmul %6, %8, %cst_7 {dimension_numbers = #tpu.dot_dimension_numbers<[1], [0], [0], [1], [0, 0, 1, 1], [], []>} : vector<224x96xbf16>, vector<96x168xbf16>, vector<224x168xf32> -> vector<224x168xf32>
    %10 = arith.addf %4, %9 : vector<224x168xf32>
    %c16 = arith.constant 16 : index
    %c0_8 = arith.constant 0 : index
    %11 = vector.load %arg1[%c16, %c0_8] : memref<256x96xf32, #tpu.memory_space<vmem>>, vector<224x96xf32>
    %12 = arith.truncf %11 : vector<224x96xf32> to vector<224x96xbf16>
    %c2 = arith.constant 2 : index
    %c0_9 = arith.constant 0 : index
    %c0_10 = arith.constant 0 : index
    %13 = vector.load %arg2[%c2, %c0_9, %c0_10] : memref<5x96x168xbf16, #tpu.memory_space<vmem>>, vector<1x96x168xbf16>
    %14 = vector.shape_cast %13 : vector<1x96x168xbf16> to vector<96x168xbf16>
    %cst_11 = arith.constant dense<0.000000e+00> : vector<224x168xf32>
    %15 = tpu.matmul %12, %14, %cst_11 {dimension_numbers = #tpu.dot_dimension_numbers<[1], [0], [0], [1], [0, 0, 1, 1], [], []>} : vector<224x96xbf16>, vector<96x168xbf16>, vector<224x168xf32> -> vector<224x168xf32>
    %16 = arith.addf %10, %15 : vector<224x168xf32>
    %c24 = arith.constant 24 : index
    %c0_12 = arith.constant 0 : index
    %17 = vector.load %arg1[%c24, %c0_12] : memref<256x96xf32, #tpu.memory_space<vmem>>, vector<224x96xf32>
    %18 = arith.truncf %17 : vector<224x96xf32> to vector<224x96xbf16>
    %c3 = arith.constant 3 : index
    %c0_13 = arith.constant 0 : index
    %c0_14 = arith.constant 0 : index
    %19 = vector.load %arg2[%c3, %c0_13, %c0_14] : memref<5x96x168xbf16, #tpu.memory_space<vmem>>, vector<1x96x168xbf16>
    %20 = vector.shape_cast %19 : vector<1x96x168xbf16> to vector<96x168xbf16>
    %cst_15 = arith.constant dense<0.000000e+00> : vector<224x168xf32>
    %21 = tpu.matmul %18, %20, %cst_15 {dimension_numbers = #tpu.dot_dimension_numbers<[1], [0], [0], [1], [0, 0, 1, 1], [], []>} : vector<224x96xbf16>, vector<96x168xbf16>, vector<224x168xf32> -> vector<224x168xf32>
    %22 = arith.addf %16, %21 : vector<224x168xf32>
    %c32 = arith.constant 32 : index
    %c0_16 = arith.constant 0 : index
    %23 = vector.load %arg1[%c32, %c0_16] : memref<256x96xf32, #tpu.memory_space<vmem>>, vector<224x96xf32>
    %24 = arith.truncf %23 : vector<224x96xf32> to vector<224x96xbf16>
    %c4 = arith.constant 4 : index
    %c0_17 = arith.constant 0 : index
    %c0_18 = arith.constant 0 : index
    %25 = vector.load %arg2[%c4, %c0_17, %c0_18] : memref<5x96x168xbf16, #tpu.memory_space<vmem>>, vector<1x96x168xbf16>
    %26 = vector.shape_cast %25 : vector<1x96x168xbf16> to vector<96x168xbf16>
    %cst_19 = arith.constant dense<0.000000e+00> : vector<224x168xf32>
    %27 = tpu.matmul %24, %26, %cst_19 {dimension_numbers = #tpu.dot_dimension_numbers<[1], [0], [0], [1], [0, 0, 1, 1], [], []>} : vector<224x96xbf16>, vector<96x168xbf16>, vector<224x168xf32> -> vector<224x168xf32>
    %28 = arith.addf %22, %27 : vector<224x168xf32>
    %29 = vector.extract_strided_slice %28 {offsets = [0, 0], sizes = [224, 84], strides = [1, 1]} : vector<224x168xf32> to vector<224x84xf32>
    %30 = vector.extract_strided_slice %28 {offsets = [0, 84], sizes = [224, 84], strides = [1, 1]} : vector<224x168xf32> to vector<224x84xf32>
    %31 = arith.maximumf %29, %30 : vector<224x84xf32>
    %c0_20 = arith.constant 0 : index
    %c0_21 = arith.constant 0 : index
    %32 = vector.load %arg3[%c0_20, %c0_21] : memref<1x84xf32, #tpu.memory_space<vmem>>, vector<1x84xf32>
    %33 = vector.broadcast %32 : vector<1x84xf32> to vector<224x84xf32>
    %34 = arith.addf %31, %33 : vector<224x84xf32>
    %cst_22 = arith.constant 0.000000e+00 : f32
    %35 = vector.broadcast %cst_22 : f32 to vector<224x84xf32>
    %36 = arith.maximumf %34, %35 : vector<224x84xf32>
    %37 = vector.extract_strided_slice %36 {offsets = [0, 0], sizes = [8, 84], strides = [1, 1]} : vector<224x84xf32> to vector<8x84xf32>
    %38 = vector.extract_strided_slice %36 {offsets = [8, 0], sizes = [8, 84], strides = [1, 1]} : vector<224x84xf32> to vector<8x84xf32>
    %39 = arith.maximumf %37, %38 : vector<8x84xf32>
    %c0_23 = arith.constant 0 : index
    %c0_24 = arith.constant 0 : index
    %40 = vector.load %arg13[%c0_23, %c0_24] : memref<112x84xf32, #tpu.memory_space<vmem>>, vector<8x84xf32>
    tpu.vector_store %arg13[%c0_23, %c0_24], %39 {strides = array<i32>} : memref<112x84xf32, #tpu.memory_space<vmem>>, vector<8x84xf32>,
    %41 = vector.extract_strided_slice %36 {offsets = [16, 0], sizes = [8, 84], strides = [1, 1]} : vector<224x84xf32> to vector<8x84xf32>
    %42 = vector.extract_strided_slice %36 {offsets = [24, 0], sizes = [8, 84], strides = [1, 1]} : vector<224x84xf32> to vector<8x84xf32>
    %43 = arith.maximumf %41, %42 : vector<8x84xf32>
    %c8_25 = arith.constant 8 : index
    %c0_26 = arith.constant 0 : index
    %44 = vector.load %arg13[%c8_25, %c0_26] : memref<112x84xf32, #tpu.memory_space<vmem>>, vector<8x84xf32>
    tpu.vector_store %arg13[%c8_25, %c0_26], %43 {strides = array<i32>} : memref<112x84xf32, #tpu.memory_space<vmem>>, vector<8x84xf32>,
    %45 = vector.extract_strided_slice %36 {offsets = [32, 0], sizes = [8, 84], strides = [1, 1]} : vector<224x84xf32> to vector<8x84xf32>
    %46 = vector.extract_strided_slice %36 {offsets = [40, 0], sizes = [8, 84], strides = [1, 1]} : vector<224x84xf32> to vector<8x84xf32>
    %47 = arith.maximumf %45, %46 : vector<8x84xf32>
    %c16_27 = arith.constant 16 : index
    %c0_28 = arith.constant 0 : index
    %48 = vector.load %arg13[%c16_27, %c0_28] : memref<112x84xf32, #tpu.memory_space<vmem>>, vector<8x84xf32>
    tpu.vector_store %arg13[%c16_27, %c0_28], %47 {strides = array<i32>} : memref<112x84xf32, #tpu.memory_space<vmem>>, vector<8x84xf32>,
    %49 = vector.extract_strided_slice %36 {offsets = [48, 0], sizes = [8, 84], strides = [1, 1]} : vector<224x84xf32> to vector<8x84xf32>
    %50 = vector.extract_strided_slice %36 {offsets = [56, 0], sizes = [8, 84], strides = [1, 1]} : vector<224x84xf32> to vector<8x84xf32>
    %51 = arith.maximumf %49, %50 : vector<8x84xf32>
    %c24_29 = arith.constant 24 : index
    %c0_30 = arith.constant 0 : index
    %52 = vector.load %arg13[%c24_29, %c0_30] : memref<112x84xf32, #tpu.memory_space<vmem>>, vector<8x84xf32>
    tpu.vector_store %arg13[%c24_29, %c0_30], %51 {strides = array<i32>} : memref<112x84xf32, #tpu.memory_space<vmem>>, vector<8x84xf32>,
    %53 = vector.extract_strided_slice %36 {offsets = [64, 0], sizes = [8, 84], strides = [1, 1]} : vector<224x84xf32> to vector<8x84xf32>
    %54 = vector.extract_strided_slice %36 {offsets = [72, 0], sizes = [8, 84], strides = [1, 1]} : vector<224x84xf32> to vector<8x84xf32>
    %55 = arith.maximumf %53, %54 : vector<8x84xf32>
    %c32_31 = arith.constant 32 : index
    %c0_32 = arith.constant 0 : index
    %56 = vector.load %arg13[%c32_31, %c0_32] : memref<112x84xf32, #tpu.memory_space<vmem>>, vector<8x84xf32>
    tpu.vector_store %arg13[%c32_31, %c0_32], %55 {strides = array<i32>} : memref<112x84xf32, #tpu.memory_space<vmem>>, vector<8x84xf32>,
    %57 = vector.extract_strided_slice %36 {offsets = [80, 0], sizes = [8, 84], strides = [1, 1]} : vector<224x84xf32> to vector<8x84xf32>
    %58 = vector.extract_strided_slice %36 {offsets = [88, 0], sizes = [8, 84], strides = [1, 1]} : vector<224x84xf32> to vector<8x84xf32>
    %59 = arith.maximumf %57, %58 : vector<8x84xf32>
    %c40 = arith.constant 40 : index
    %c0_33 = arith.constant 0 : index
    %60 = vector.load %arg13[%c40, %c0_33] : memref<112x84xf32, #tpu.memory_space<vmem>>, vector<8x84xf32>
    tpu.vector_store %arg13[%c40, %c0_33], %59 {strides = array<i32>} : memref<112x84xf32, #tpu.memory_space<vmem>>, vector<8x84xf32>,
    %61 = vector.extract_strided_slice %36 {offsets = [96, 0], sizes = [8, 84], strides = [1, 1]} : vector<224x84xf32> to vector<8x84xf32>
    %62 = vector.extract_strided_slice %36 {offsets = [104, 0], sizes = [8, 84], strides = [1, 1]} : vector<224x84xf32> to vector<8x84xf32>
    %63 = arith.maximumf %61, %62 : vector<8x84xf32>
    %c48 = arith.constant 48 : index
    %c0_34 = arith.constant 0 : index
    %64 = vector.load %arg13[%c48, %c0_34] : memref<112x84xf32, #tpu.memory_space<vmem>>, vector<8x84xf32>
    tpu.vector_store %arg13[%c48, %c0_34], %63 {strides = array<i32>} : memref<112x84xf32, #tpu.memory_space<vmem>>, vector<8x84xf32>,
    %65 = vector.extract_strided_slice %36 {offsets = [112, 0], sizes = [8, 84], strides = [1, 1]} : vector<224x84xf32> to vector<8x84xf32>
    %66 = vector.extract_strided_slice %36 {offsets = [120, 0], sizes = [8, 84], strides = [1, 1]} : vector<224x84xf32> to vector<8x84xf32>
    %67 = arith.maximumf %65, %66 : vector<8x84xf32>
    %c56 = arith.constant 56 : index
    %c0_35 = arith.constant 0 : index
    %68 = vector.load %arg13[%c56, %c0_35] : memref<112x84xf32, #tpu.memory_space<vmem>>, vector<8x84xf32>
    tpu.vector_store %arg13[%c56, %c0_35], %67 {strides = array<i32>} : memref<112x84xf32, #tpu.memory_space<vmem>>, vector<8x84xf32>,
    %69 = vector.extract_strided_slice %36 {offsets = [128, 0], sizes = [8, 84], strides = [1, 1]} : vector<224x84xf32> to vector<8x84xf32>
    %70 = vector.extract_strided_slice %36 {offsets = [136, 0], sizes = [8, 84], strides = [1, 1]} : vector<224x84xf32> to vector<8x84xf32>
    %71 = arith.maximumf %69, %70 : vector<8x84xf32>
    %c64 = arith.constant 64 : index
    %c0_36 = arith.constant 0 : index
    %72 = vector.load %arg13[%c64, %c0_36] : memref<112x84xf32, #tpu.memory_space<vmem>>, vector<8x84xf32>
    tpu.vector_store %arg13[%c64, %c0_36], %71 {strides = array<i32>} : memref<112x84xf32, #tpu.memory_space<vmem>>, vector<8x84xf32>,
    %73 = vector.extract_strided_slice %36 {offsets = [144, 0], sizes = [8, 84], strides = [1, 1]} : vector<224x84xf32> to vector<8x84xf32>
    %74 = vector.extract_strided_slice %36 {offsets = [152, 0], sizes = [8, 84], strides = [1, 1]} : vector<224x84xf32> to vector<8x84xf32>
    %75 = arith.maximumf %73, %74 : vector<8x84xf32>
    %c72 = arith.constant 72 : index
    %c0_37 = arith.constant 0 : index
    %76 = vector.load %arg13[%c72, %c0_37] : memref<112x84xf32, #tpu.memory_space<vmem>>, vector<8x84xf32>
    tpu.vector_store %arg13[%c72, %c0_37], %75 {strides = array<i32>} : memref<112x84xf32, #tpu.memory_space<vmem>>, vector<8x84xf32>,
    %77 = vector.extract_strided_slice %36 {offsets = [160, 0], sizes = [8, 84], strides = [1, 1]} : vector<224x84xf32> to vector<8x84xf32>
    %78 = vector.extract_strided_slice %36 {offsets = [168, 0], sizes = [8, 84], strides = [1, 1]} : vector<224x84xf32> to vector<8x84xf32>
    %79 = arith.maximumf %77, %78 : vector<8x84xf32>
    %c80 = arith.constant 80 : index
    %c0_38 = arith.constant 0 : index
    %80 = vector.load %arg13[%c80, %c0_38] : memref<112x84xf32, #tpu.memory_space<vmem>>, vector<8x84xf32>
    tpu.vector_store %arg13[%c80, %c0_38], %79 {strides = array<i32>} : memref<112x84xf32, #tpu.memory_space<vmem>>, vector<8x84xf32>,
    %81 = vector.extract_strided_slice %36 {offsets = [176, 0], sizes = [8, 84], strides = [1, 1]} : vector<224x84xf32> to vector<8x84xf32>
    %82 = vector.extract_strided_slice %36 {offsets = [184, 0], sizes = [8, 84], strides = [1, 1]} : vector<224x84xf32> to vector<8x84xf32>
    %83 = arith.maximumf %81, %82 : vector<8x84xf32>
    %c88 = arith.constant 88 : index
    %c0_39 = arith.constant 0 : index
    %84 = vector.load %arg13[%c88, %c0_39] : memref<112x84xf32, #tpu.memory_space<vmem>>, vector<8x84xf32>
    tpu.vector_store %arg13[%c88, %c0_39], %83 {strides = array<i32>} : memref<112x84xf32, #tpu.memory_space<vmem>>, vector<8x84xf32>,
    %85 = vector.extract_strided_slice %36 {offsets = [192, 0], sizes = [8, 84], strides = [1, 1]} : vector<224x84xf32> to vector<8x84xf32>
    %86 = vector.extract_strided_slice %36 {offsets = [200, 0], sizes = [8, 84], strides = [1, 1]} : vector<224x84xf32> to vector<8x84xf32>
    %87 = arith.maximumf %85, %86 : vector<8x84xf32>
    %c96 = arith.constant 96 : index
    %c0_40 = arith.constant 0 : index
    %88 = vector.load %arg13[%c96, %c0_40] : memref<112x84xf32, #tpu.memory_space<vmem>>, vector<8x84xf32>
    tpu.vector_store %arg13[%c96, %c0_40], %87 {strides = array<i32>} : memref<112x84xf32, #tpu.memory_space<vmem>>, vector<8x84xf32>,
    %89 = vector.extract_strided_slice %36 {offsets = [208, 0], sizes = [8, 84], strides = [1, 1]} : vector<224x84xf32> to vector<8x84xf32>
    %90 = vector.extract_strided_slice %36 {offsets = [216, 0], sizes = [8, 84], strides = [1, 1]} : vector<224x84xf32> to vector<8x84xf32>
    %91 = arith.maximumf %89, %90 : vector<8x84xf32>
    %c104 = arith.constant 104 : index
    %c0_41 = arith.constant 0 : index
    %92 = vector.load %arg13[%c104, %c0_41] : memref<112x84xf32, #tpu.memory_space<vmem>>, vector<8x84xf32>
    tpu.vector_store %arg13[%c104, %c0_41], %91 {strides = array<i32>} : memref<112x84xf32, #tpu.memory_space<vmem>>, vector<8x84xf32>,
    %c0_42 = arith.constant 0 : index
    %c0_43 = arith.constant 0 : index
    %93 = vector.load %arg13[%c0_42, %c0_43] : memref<112x84xf32, #tpu.memory_space<vmem>>, vector<80x84xf32>
    %94 = arith.truncf %93 : vector<80x84xf32> to vector<80x84xbf16>
    %c0_44 = arith.constant 0 : index
    %c0_45 = arith.constant 0 : index
    %c0_46 = arith.constant 0 : index
    %95 = vector.load %arg4[%c0_44, %c0_45, %c0_46] : memref<5x84x160xbf16, #tpu.memory_space<vmem>>, vector<1x84x160xbf16>
    %96 = vector.shape_cast %95 : vector<1x84x160xbf16> to vector<84x160xbf16>
    %cst_47 = arith.constant dense<0.000000e+00> : vector<80x160xf32>
    %97 = tpu.matmul %94, %96, %cst_47 {dimension_numbers = #tpu.dot_dimension_numbers<[1], [0], [0], [1], [0, 0, 1, 1], [], []>} : vector<80x84xbf16>, vector<84x160xbf16>, vector<80x160xf32> -> vector<80x160xf32>
    %c8_48 = arith.constant 8 : index
    %c0_49 = arith.constant 0 : index
    %98 = vector.load %arg13[%c8_48, %c0_49] : memref<112x84xf32, #tpu.memory_space<vmem>>, vector<80x84xf32>
    %99 = arith.truncf %98 : vector<80x84xf32> to vector<80x84xbf16>
    %c1_50 = arith.constant 1 : index
    %c0_51 = arith.constant 0 : index
    %c0_52 = arith.constant 0 : index
    %100 = vector.load %arg4[%c1_50, %c0_51, %c0_52] : memref<5x84x160xbf16, #tpu.memory_space<vmem>>, vector<1x84x160xbf16>
    %101 = vector.shape_cast %100 : vector<1x84x160xbf16> to vector<84x160xbf16>
    %cst_53 = arith.constant dense<0.000000e+00> : vector<80x160xf32>
    %102 = tpu.matmul %99, %101, %cst_53 {dimension_numbers = #tpu.dot_dimension_numbers<[1], [0], [0], [1], [0, 0, 1, 1], [], []>} : vector<80x84xbf16>, vector<84x160xbf16>, vector<80x160xf32> -> vector<80x160xf32>
    %103 = arith.addf %97, %102 : vector<80x160xf32>
    %c16_54 = arith.constant 16 : index
    %c0_55 = arith.constant 0 : index
    %104 = vector.load %arg13[%c16_54, %c0_55] : memref<112x84xf32, #tpu.memory_space<vmem>>, vector<80x84xf32>
    %105 = arith.truncf %104 : vector<80x84xf32> to vector<80x84xbf16>
    %c2_56 = arith.constant 2 : index
    %c0_57 = arith.constant 0 : index
    %c0_58 = arith.constant 0 : index
    %106 = vector.load %arg4[%c2_56, %c0_57, %c0_58] : memref<5x84x160xbf16, #tpu.memory_space<vmem>>, vector<1x84x160xbf16>
    %107 = vector.shape_cast %106 : vector<1x84x160xbf16> to vector<84x160xbf16>
    %cst_59 = arith.constant dense<0.000000e+00> : vector<80x160xf32>
    %108 = tpu.matmul %105, %107, %cst_59 {dimension_numbers = #tpu.dot_dimension_numbers<[1], [0], [0], [1], [0, 0, 1, 1], [], []>} : vector<80x84xbf16>, vector<84x160xbf16>, vector<80x160xf32> -> vector<80x160xf32>
    %109 = arith.addf %103, %108 : vector<80x160xf32>
    %c24_60 = arith.constant 24 : index
    %c0_61 = arith.constant 0 : index
    %110 = vector.load %arg13[%c24_60, %c0_61] : memref<112x84xf32, #tpu.memory_space<vmem>>, vector<80x84xf32>
    %111 = arith.truncf %110 : vector<80x84xf32> to vector<80x84xbf16>
    %c3_62 = arith.constant 3 : index
    %c0_63 = arith.constant 0 : index
    %c0_64 = arith.constant 0 : index
    %112 = vector.load %arg4[%c3_62, %c0_63, %c0_64] : memref<5x84x160xbf16, #tpu.memory_space<vmem>>, vector<1x84x160xbf16>
    %113 = vector.shape_cast %112 : vector<1x84x160xbf16> to vector<84x160xbf16>
    %cst_65 = arith.constant dense<0.000000e+00> : vector<80x160xf32>
    %114 = tpu.matmul %111, %113, %cst_65 {dimension_numbers = #tpu.dot_dimension_numbers<[1], [0], [0], [1], [0, 0, 1, 1], [], []>} : vector<80x84xbf16>, vector<84x160xbf16>, vector<80x160xf32> -> vector<80x160xf32>
    %115 = arith.addf %109, %114 : vector<80x160xf32>
    %c32_66 = arith.constant 32 : index
    %c0_67 = arith.constant 0 : index
    %116 = vector.load %arg13[%c32_66, %c0_67] : memref<112x84xf32, #tpu.memory_space<vmem>>, vector<80x84xf32>
    %117 = arith.truncf %116 : vector<80x84xf32> to vector<80x84xbf16>
    %c4_68 = arith.constant 4 : index
    %c0_69 = arith.constant 0 : index
    %c0_70 = arith.constant 0 : index
    %118 = vector.load %arg4[%c4_68, %c0_69, %c0_70] : memref<5x84x160xbf16, #tpu.memory_space<vmem>>, vector<1x84x160xbf16>
    %119 = vector.shape_cast %118 : vector<1x84x160xbf16> to vector<84x160xbf16>
    %cst_71 = arith.constant dense<0.000000e+00> : vector<80x160xf32>
    %120 = tpu.matmul %117, %119, %cst_71 {dimension_numbers = #tpu.dot_dimension_numbers<[1], [0], [0], [1], [0, 0, 1, 1], [], []>} : vector<80x84xbf16>, vector<84x160xbf16>, vector<80x160xf32> -> vector<80x160xf32>
    %121 = arith.addf %115, %120 : vector<80x160xf32>
    %122 = vector.extract_strided_slice %121 {offsets = [0, 0], sizes = [80, 80], strides = [1, 1]} : vector<80x160xf32> to vector<80x80xf32>
    %123 = vector.extract_strided_slice %121 {offsets = [0, 80], sizes = [80, 80], strides = [1, 1]} : vector<80x160xf32> to vector<80x80xf32>
    %124 = arith.maximumf %122, %123 : vector<80x80xf32>
    %c0_72 = arith.constant 0 : index
    %c0_73 = arith.constant 0 : index
    %125 = vector.load %arg5[%c0_72, %c0_73] : memref<1x80xf32, #tpu.memory_space<vmem>>, vector<1x80xf32>
    %126 = vector.broadcast %125 : vector<1x80xf32> to vector<80x80xf32>
    %127 = arith.addf %124, %126 : vector<80x80xf32>
    %cst_74 = arith.constant 0.000000e+00 : f32
    %128 = vector.broadcast %cst_74 : f32 to vector<80x80xf32>
    %129 = arith.maximumf %127, %128 : vector<80x80xf32>
    %130 = vector.extract_strided_slice %129 {offsets = [0, 0], sizes = [8, 80], strides = [1, 1]} : vector<80x80xf32> to vector<8x80xf32>
    %131 = vector.extract_strided_slice %129 {offsets = [8, 0], sizes = [8, 80], strides = [1, 1]} : vector<80x80xf32> to vector<8x80xf32>
    %132 = arith.maximumf %130, %131 : vector<8x80xf32>
    %c0_75 = arith.constant 0 : index
    %c0_76 = arith.constant 0 : index
    %133 = vector.load %arg14[%c0_75, %c0_76] : memref<8x400xf32, #tpu.memory_space<vmem>>, vector<8x80xf32>
    tpu.vector_store %arg14[%c0_75, %c0_76], %132 {strides = array<i32>} : memref<8x400xf32, #tpu.memory_space<vmem>>, vector<8x80xf32>,
    %134 = vector.extract_strided_slice %129 {offsets = [16, 0], sizes = [8, 80], strides = [1, 1]} : vector<80x80xf32> to vector<8x80xf32>
    %135 = vector.extract_strided_slice %129 {offsets = [24, 0], sizes = [8, 80], strides = [1, 1]} : vector<80x80xf32> to vector<8x80xf32>
    %136 = arith.maximumf %134, %135 : vector<8x80xf32>
    %c0_77 = arith.constant 0 : index
    %c80_78 = arith.constant 80 : index
    %137 = vector.load %arg14[%c0_77, %c80_78] : memref<8x400xf32, #tpu.memory_space<vmem>>, vector<8x80xf32>
    tpu.vector_store %arg14[%c0_77, %c80_78], %136 {strides = array<i32>} : memref<8x400xf32, #tpu.memory_space<vmem>>, vector<8x80xf32>,
    %138 = vector.extract_strided_slice %129 {offsets = [32, 0], sizes = [8, 80], strides = [1, 1]} : vector<80x80xf32> to vector<8x80xf32>
    %139 = vector.extract_strided_slice %129 {offsets = [40, 0], sizes = [8, 80], strides = [1, 1]} : vector<80x80xf32> to vector<8x80xf32>
    %140 = arith.maximumf %138, %139 : vector<8x80xf32>
    %c0_79 = arith.constant 0 : index
    %c160 = arith.constant 160 : index
    %141 = vector.load %arg14[%c0_79, %c160] : memref<8x400xf32, #tpu.memory_space<vmem>>, vector<8x80xf32>
    tpu.vector_store %arg14[%c0_79, %c160], %140 {strides = array<i32>} : memref<8x400xf32, #tpu.memory_space<vmem>>, vector<8x80xf32>,
    %142 = vector.extract_strided_slice %129 {offsets = [48, 0], sizes = [8, 80], strides = [1, 1]} : vector<80x80xf32> to vector<8x80xf32>
    %143 = vector.extract_strided_slice %129 {offsets = [56, 0], sizes = [8, 80], strides = [1, 1]} : vector<80x80xf32> to vector<8x80xf32>
    %144 = arith.maximumf %142, %143 : vector<8x80xf32>
    %c0_80 = arith.constant 0 : index
    %c240 = arith.constant 240 : index
    %145 = vector.load %arg14[%c0_80, %c240] : memref<8x400xf32, #tpu.memory_space<vmem>>, vector<8x80xf32>
    tpu.vector_store %arg14[%c0_80, %c240], %144 {strides = array<i32>} : memref<8x400xf32, #tpu.memory_space<vmem>>, vector<8x80xf32>,
    %146 = vector.extract_strided_slice %129 {offsets = [64, 0], sizes = [8, 80], strides = [1, 1]} : vector<80x80xf32> to vector<8x80xf32>
    %147 = vector.extract_strided_slice %129 {offsets = [72, 0], sizes = [8, 80], strides = [1, 1]} : vector<80x80xf32> to vector<8x80xf32>
    %148 = arith.maximumf %146, %147 : vector<8x80xf32>
    %c0_81 = arith.constant 0 : index
    %c320 = arith.constant 320 : index
    %149 = vector.load %arg14[%c0_81, %c320] : memref<8x400xf32, #tpu.memory_space<vmem>>, vector<8x80xf32>
    tpu.vector_store %arg14[%c0_81, %c320], %148 {strides = array<i32>} : memref<8x400xf32, #tpu.memory_space<vmem>>, vector<8x80xf32>,
    %c0_82 = arith.constant 0 : index
    %c0_83 = arith.constant 0 : index
    %150 = vector.load %arg14[%c0_82, %c0_83] : memref<8x400xf32, #tpu.memory_space<vmem>>, vector<8x400xf32>
    %151 = arith.truncf %150 : vector<8x400xf32> to vector<8x400xbf16>
    %c0_84 = arith.constant 0 : index
    %c0_85 = arith.constant 0 : index
    %152 = vector.load %arg6[%c0_84, %c0_85] : memref<400x128xbf16, #tpu.memory_space<vmem>>, vector<400x128xbf16>
    %cst_86 = arith.constant dense<0.000000e+00> : vector<8x128xf32>
    %153 = tpu.matmul %151, %152, %cst_86 {dimension_numbers = #tpu.dot_dimension_numbers<[1], [0], [0], [1], [0, 0, 1, 1], [], []>} : vector<8x400xbf16>, vector<400x128xbf16>, vector<8x128xf32> -> vector<8x128xf32>
    %c0_87 = arith.constant 0 : index
    %c0_88 = arith.constant 0 : index
    %154 = vector.load %arg7[%c0_87, %c0_88] : memref<1x128xf32, #tpu.memory_space<vmem>>, vector<1x128xf32>
    %155 = vector.broadcast %154 : vector<1x128xf32> to vector<8x128xf32>
    %156 = arith.addf %153, %155 : vector<8x128xf32>
    %cst_89 = arith.constant 0.000000e+00 : f32
    %157 = vector.broadcast %cst_89 : f32 to vector<8x128xf32>
    %158 = arith.maximumf %156, %157 : vector<8x128xf32>
    %159 = arith.truncf %158 : vector<8x128xf32> to vector<8x128xbf16>
    %c0_90 = arith.constant 0 : index
    %c0_91 = arith.constant 0 : index
    %160 = vector.load %arg8[%c0_90, %c0_91] : memref<128x128xbf16, #tpu.memory_space<vmem>>, vector<128x128xbf16>
    %cst_92 = arith.constant dense<0.000000e+00> : vector<8x128xf32>
    %161 = tpu.matmul %159, %160, %cst_92 {dimension_numbers = #tpu.dot_dimension_numbers<[1], [0], [0], [1], [0, 0, 1, 1], [], []>} : vector<8x128xbf16>, vector<128x128xbf16>, vector<8x128xf32> -> vector<8x128xf32>
    %c0_93 = arith.constant 0 : index
    %c0_94 = arith.constant 0 : index
    %162 = vector.load %arg9[%c0_93, %c0_94] : memref<1x128xf32, #tpu.memory_space<vmem>>, vector<1x128xf32>
    %163 = vector.broadcast %162 : vector<1x128xf32> to vector<8x128xf32>
    %164 = arith.addf %161, %163 : vector<8x128xf32>
    %cst_95 = arith.constant 0.000000e+00 : f32
    %165 = vector.broadcast %cst_95 : f32 to vector<8x128xf32>
    %166 = arith.maximumf %164, %165 : vector<8x128xf32>
    %167 = arith.truncf %166 : vector<8x128xf32> to vector<8x128xbf16>
    %c0_96 = arith.constant 0 : index
    %c0_97 = arith.constant 0 : index
    %168 = vector.load %arg10[%c0_96, %c0_97] : memref<128x128xbf16, #tpu.memory_space<vmem>>, vector<128x128xbf16>
    %cst_98 = arith.constant dense<0.000000e+00> : vector<8x128xf32>
    %169 = tpu.matmul %167, %168, %cst_98 {dimension_numbers = #tpu.dot_dimension_numbers<[1], [0], [0], [1], [0, 0, 1, 1], [], []>} : vector<8x128xbf16>, vector<128x128xbf16>, vector<8x128xf32> -> vector<8x128xf32>
    %c0_99 = arith.constant 0 : index
    %c0_100 = arith.constant 0 : index
    %170 = vector.load %arg11[%c0_99, %c0_100] : memref<1x128xf32, #tpu.memory_space<vmem>>, vector<1x128xf32>
    %171 = vector.broadcast %170 : vector<1x128xf32> to vector<8x128xf32>
    %172 = arith.addf %169, %171 : vector<8x128xf32>
    %c0_101 = arith.constant 0 : index
    %c0_102 = arith.constant 0 : index
    %173 = vector.load %arg12[%c0_101, %c0_102] : memref<8x128xf32, #tpu.memory_space<vmem>>, vector<8x128xf32>
    tpu.vector_store %arg12[%c0_101, %c0_102], %172 {strides = array<i32>} : memref<8x128xf32, #tpu.memory_space<vmem>>, vector<8x128xf32>,
    return
  }
  func.func @transform_0(%arg0: i32) -> (i32, i32) {
    %c0_i32 = arith.constant 0 : i32
    %c0_i32_0 = arith.constant 0 : i32
    return %arg0, %c0_i32 : i32, i32
  }
  func.func @transform_1(%arg0: i32) -> (i32, i32, i32) {
    %c0_i32 = arith.constant 0 : i32
    %c0_i32_0 = arith.constant 0 : i32
    %c0_i32_1 = arith.constant 0 : i32
    %c0_i32_2 = arith.constant 0 : i32
    return %c0_i32, %c0_i32_0, %c0_i32_1 : i32, i32, i32
  }
  func.func @transform_2(%arg0: i32) -> (i32, i32) {
    %c0_i32 = arith.constant 0 : i32
    %c0_i32_0 = arith.constant 0 : i32
    %c0_i32_1 = arith.constant 0 : i32
    return %c0_i32, %c0_i32_0 : i32, i32
  }
  func.func @transform_3(%arg0: i32) -> (i32, i32, i32) {
    %c0_i32 = arith.constant 0 : i32
    %c0_i32_0 = arith.constant 0 : i32
    %c0_i32_1 = arith.constant 0 : i32
    %c0_i32_2 = arith.constant 0 : i32
    return %c0_i32, %c0_i32_0, %c0_i32_1 : i32, i32, i32
  }
  func.func @transform_4(%arg0: i32) -> (i32, i32) {
    %c0_i32 = arith.constant 0 : i32
    %c0_i32_0 = arith.constant 0 : i32
    %c0_i32_1 = arith.constant 0 : i32
    return %c0_i32, %c0_i32_0 : i32, i32
  }
  func.func @transform_5(%arg0: i32) -> (i32, i32) {
    %c0_i32 = arith.constant 0 : i32
    %c0_i32_0 = arith.constant 0 : i32
    %c0_i32_1 = arith.constant 0 : i32
    return %c0_i32, %c0_i32_0 : i32, i32
  }
  func.func @transform_6(%arg0: i32) -> (i32, i32) {
    %c0_i32 = arith.constant 0 : i32
    %c0_i32_0 = arith.constant 0 : i32
    %c0_i32_1 = arith.constant 0 : i32
    return %c0_i32, %c0_i32_0 : i32, i32
  }
  func.func @transform_7(%arg0: i32) -> (i32, i32) {
    %c0_i32 = arith.constant 0 : i32
    %c0_i32_0 = arith.constant 0 : i32
    %c0_i32_1 = arith.constant 0 : i32
    return %c0_i32, %c0_i32_0 : i32, i32
  }
  func.func @transform_8(%arg0: i32) -> (i32, i32) {
    %c0_i32 = arith.constant 0 : i32
    %c0_i32_0 = arith.constant 0 : i32
    %c0_i32_1 = arith.constant 0 : i32
    return %c0_i32, %c0_i32_0 : i32, i32
  }
  func.func @transform_9(%arg0: i32) -> (i32, i32) {
    %c0_i32 = arith.constant 0 : i32
    %c0_i32_0 = arith.constant 0 : i32
    %c0_i32_1 = arith.constant 0 : i32
    return %c0_i32, %c0_i32_0 : i32, i32
  }
  func.func @transform_10(%arg0: i32) -> (i32, i32) {
    %c0_i32 = arith.constant 0 : i32
    %c0_i32_0 = arith.constant 0 : i32
    %c0_i32_1 = arith.constant 0 : i32
    return %c0_i32, %c0_i32_0 : i32, i32
  }
  func.func @transform_11(%arg0: i32) -> (i32, i32) {
    %c0_i32 = arith.constant 0 : i32
    %c0_i32_0 = arith.constant 0 : i32
    return %arg0, %c0_i32 : i32, i32
  }
}

</mosaic_0001>

<bundles_post_ra>
// kernel: network_forward.1
= control target key start
LH: loop header
LB: loop body
LE: loop exit
PB: predicated region body
PF: predicated region fallthrough
CT: control target
= control target key end

     0   :  { %v6489_v1 = vmov 0   ;;  %vm181_vm0 = vcmask 785408   ;;  %vm2289_vm1 = vcmask 1041408   ;;  %s4505_s19 = smov 44   ;;  %vm1998_vm2 = vcmask 359424   ;;  %s4507_s25 = smov 80   ;;  %s6477_s1 = inlined_call_operand.vmem [shape: bf16[5,96,168], index: 1, kind: input, shape index: {}]   ;;  %s6478_s0 = inlined_call_operand.vmem [shape: f32[256,96], index: 0, kind: input, shape index: {}]   ;;  %s6479_s3 = inlined_call_operand.vmem [shape: bf16[5,84,160], index: 3, kind: input, shape index: {}]   ;;  %s6480_s2 = inlined_call_operand.vmem [shape: f32[1,84], index: 2, kind: input, shape index: {}]   ;;  %s6481_s5 = inlined_call_operand.vmem [shape: bf16[400,128], index: 5, kind: input, shape index: {}]   ;;  %s6482_s4 = inlined_call_operand.vmem [shape: f32[1,80], index: 4, kind: input, shape index: {}]   ;;  %s6483_s7 = inlined_call_operand.vmem [shape: bf16[128,128], index: 7, kind: input, shape index: {}]   ;;  %s6484_s9 = inlined_call_operand.vmem [shape: bf16[128,128], index: 9, kind: input, shape index: {}]   ;;  %s6485_s6 = inlined_call_operand.vmem [shape: f32[1,128], index: 6, kind: input, shape index: {}]   ;;  %s6486_s8 = inlined_call_operand.vmem [shape: f32[1,128], index: 8, kind: input, shape index: {}]   ;;  %s6487_s10 = inlined_call_operand.vmem [shape: f32[1,128], index: 10, kind: input, shape index: {}]   ;;  %s6488_s11 = inlined_call_operand.vmem [shape: f32[8,128], index: 11, kind: output, shape index: {}]  }
   0x1   :  { %v4288_v0 = vld [vmem:[%s6477_s1 + $0xb4] ss:$8 sps:$4 sm:$0xff]   ;;  %256 = vmatprep.mubr.bf16.mxu0 %v6489_v1  ;;  %531 = vmatprep.mubr.bf16.mxu1 %v6489_v1  ;;  %v4292_v3 = vld [vmem:[%s6477_s1 + $0xb0] ss:$8 sps:$4 sm:$0xff]   ;;  %v4294_v5 = vld [vmem:[%s6477_s1 + $0xa4] ss:$8 sps:$4 sm:$0xff]  }
   0x2   :  { %v4290_v2 = vld [vmem:[%s6477_s1 + $0x54] ss:$8 sps:$4 sm:$0xff]   ;;  %228 = vmatprep.subr.bf16.mxu0 %v4288_v0  ;;  %v4293_v4 = vld [vmem:[%s6477_s1 + $0x50] ss:$8 sps:$4 sm:$0xff]   ;;  %v4296_v6 = vld [vmem:[%s6477_s1 + $0x44] ss:$8 sps:$4 sm:$0xff]  }
   0x3   :  { %503 = vmatprep.subr.bf16.mxu1 %v4290_v2  ;;  %229 = vmatpush1.bf16.msra.mxu0 %v4292_v3  ;;  %v4298_v7 = vld [vmem:[%s6477_s1 + $0xa0] ss:$8 sps:$4 sm:$0xff]   ;;  %v4300_v9 = vld [vmem:[%s6477_s1 + $0x94] ss:$8 sps:$4 sm:$0xff]   ;;  %v4304_v11 = vld [vmem:[%s6477_s1 + $0x90] ss:$8 sps:$4 sm:$0xff]  }
   0x4   :  { %504 = vmatpush1.bf16.msra.mxu1 %v4293_v4  ;;  %230 = vmatprep.subr.bf16.mxu0 %v4294_v5  ;;  %v4299_v8 = vld [vmem:[%s6477_s1 + $0x40] ss:$8 sps:$4 sm:$0xff]   ;;  %v4302_v10 = vld [vmem:[%s6477_s1 + $0x34] ss:$8 sps:$4 sm:$0xff]   ;;  %v4305_v12 = vld [vmem:[%s6477_s1 + $0x30] ss:$8 sps:$4 sm:$0xff]  }
   0x5   :  { %505 = vmatprep.subr.bf16.mxu1 %v4296_v6  ;;  %v4306_v13 = vld [vmem:[%s6477_s1 + $0x84] ss:$8 sps:$4 sm:$0xff]   ;;  %v4310_v15 = vld [vmem:[%s6477_s1 + $0x80] ss:$8 sps:$4 sm:$0xff]   ;;  %v4312_v17 = vld [vmem:[%s6477_s1 + $0x74] ss:$8 sps:$4 sm:$0xff]  }
   0x6   :  { %v4308_v14 = vld [vmem:[%s6477_s1 + $0x24] ss:$8 sps:$4 sm:$0xff]   ;;  %v4311_v16 = vld [vmem:[%s6477_s1 + $0x20] ss:$8 sps:$4 sm:$0xff]   ;;  %v4314_v18 = vld [vmem:[%s6477_s1 + $0x14] ss:$8 sps:$4 sm:$0xff]  }
   0x7   :  { %231 = vmatpush1.bf16.msra.mxu0 %v4298_v7  ;;  %v4316_v19 = vld [vmem:[%s6477_s1 + $0x70] ss:$8 sps:$4 sm:$0xff]   ;;  %v4318_v21 = vld [vmem:[%s6477_s1 + $0x64] ss:$8 sps:$4 sm:$0xff]   ;;  %v4322_v23 = vld [vmem:[%s6477_s1 + $0x60] ss:$8 sps:$4 sm:$0xff]  }
   0x8   :  { %506 = vmatpush1.bf16.msra.mxu1 %v4299_v8  ;;  %232 = vmatprep.subr.bf16.mxu0 %v4300_v9  ;;  %v4317_v20 = vld [vmem:[%s6477_s1 + $0x10] ss:$8 sps:$4 sm:$0xff]   ;;  %v4320_v22 = vld [vmem:[%s6477_s1 + $0x4] ss:$8 sps:$4 sm:$0xff]   ;;  %v4323_v24 = vld [vmem:[%s6477_s1] ss:$8 sps:$4 sm:$0xff]  }
   0x9   :  { %507 = vmatprep.subr.bf16.mxu1 %v4302_v10  ;;  %v40_v25 = vld [vmem:[%s6478_s0 + $0x8] sm:$0xff]  ;;  %v41_v26 = vld [vmem:[%s6478_s0 + $0x10] sm:$0xff]  ;;  %v39_v27 = vld [vmem:[%s6478_s0] sm:$0xff]  ;;  %vm2147_vm3 = vcmask 687104   ;;  %vm3216_vm4 = vcmask 392192   ;;  %s4508_s15 = smov 32  }
   0xa   :  { %v4326_v28 = vld [vmem:[%s6477_s1 + $0x114] ss:$8 sps:$4 sm:$0xff]   ;;  %v94_v29 = vpack.c.bf16 %v41_v26, %v40_v25  ;;  %v67_v30 = vpack.c.bf16 %v40_v25, %v39_v27  ;;  %v4324_v31 = vld [vmem:[%s6477_s1 + $0x110] ss:$8 sps:$4 sm:$0xff]   ;;  %v4329_v32 = vld [vmem:[%s6477_s1 + $0x104] ss:$8 sps:$4 sm:$0xff]  }
   0xb   :  { %233 = vmatpush1.bf16.msra.mxu0 %v4304_v11  ;;  %v42_v33 = vld [vmem:[%s6478_s0 + $0x18] sm:$0xff]  ;;  %v43_v34 = vld [vmem:[%s6478_s0 + $0x20] sm:$0xff]  ;;  %v44_v44 = vld [vmem:[%s6478_s0 + $0x28] sm:$0xff]  ;;  %s4509_s20 = smov 112   ;;  %vm3275_vm5 = vcmask 654336   ;;  %vm3282_vm6 = vcmask 1048192  }
   0xc   :  { %508 = vmatpush1.bf16.msra.mxu1 %v4305_v12  ;;  %234 = vmatprep.subr.bf16.mxu0 %v4306_v13  ;;  %v4327_v35 = vld [vmem:[%s6477_s1 + $0x100] ss:$8 sps:$4 sm:$0xff]   ;;  %v4332_v36 = vld [vmem:[%s6477_s1 + $0xf4] ss:$8 sps:$4 sm:$0xff]   ;;  %v4681_v37 = vpack.c.bf16 %v43_v34, %v42_v33  ;;  %v4683_v38 = vpack.c.bf16 %v42_v33, %v41_v26  ;;  %v4330_v40 = vld [vmem:[%s6477_s1 + $0xf0] ss:$8 sps:$4 sm:$0xff]   ;;  %v4726_v51 = vpack.c.bf16 %v44_v44, %v43_v34 }
   0xd   :  { %509 = vmatprep.subr.bf16.mxu1 %v4308_v14  ;;  %v4341_v39 = vld [vmem:[%s6477_s1 + $0x174] ss:$8 sps:$4 sm:$0xff]   ;;  %v4339_v41 = vld [vmem:[%s6477_s1 + $0x170] ss:$8 sps:$4 sm:$0xff]   ;;  %v4335_v42 = vld [vmem:[%s6477_s1 + $0xe4] ss:$8 sps:$4 sm:$0xff]  }
   0xe   :  { %v4347_v43 = vld [vmem:[%s6477_s1 + $0x164] ss:$8 sps:$4 sm:$0xff]   ;;  %v45_v45 = vld [vmem:[%s6478_s0 + $0x30] sm:$0xff]  ;;  %v4333_v46 = vld [vmem:[%s6477_s1 + $0xe0] ss:$8 sps:$4 sm:$0xff]   ;;  %vm3284_vm7 = vcmask 261120  }
   0xf   :  { %235 = vmatpush1.bf16.msra.mxu0 %v4310_v15  ;;  %v4345_v47 = vld [vmem:[%s6477_s1 + $0x160] ss:$8 sps:$4 sm:$0xff]   ;;  %v4338_v48 = vld [vmem:[%s6477_s1 + $0xd4] ss:$8 sps:$4 sm:$0xff]   ;;  %v4724_v50 = vpack.c.bf16 %v45_v45, %v44_v44  ;;  %v4336_v52 = vld [vmem:[%s6477_s1 + $0xd0] ss:$8 sps:$4 sm:$0xff]  }
  0x10   :  { %510 = vmatpush1.bf16.msra.mxu1 %v4311_v16  ;;  %236 = vmatprep.subr.bf16.mxu0 %v4312_v17  ;;  %v4350_v49 = vld [vmem:[%s6477_s1 + $0x154] ss:$8 sps:$4 sm:$0xff]   ;;  %v4348_v53 = vld [vmem:[%s6477_s1 + $0x150] ss:$8 sps:$4 sm:$0xff]   ;;  %v47_v55 = vld [vmem:[%s6478_s0 + $0x40] sm:$0xff]  ;;  %vm3291_vm8 = vcmask 916736  }
  0x11   :  { %511 = vmatprep.subr.bf16.mxu1 %v4314_v18  ;;  %v46_v54 = vld [vmem:[%s6478_s0 + $0x38] sm:$0xff]  ;;  %v4344_v56 = vld [vmem:[%s6477_s1 + $0xc4] ss:$8 sps:$4 sm:$0xff]   ;;  %v4342_v58 = vld [vmem:[%s6477_s1 + $0xc0] ss:$8 sps:$4 sm:$0xff]   ;;  %vm3298_vm9 = vcmask 1048448  }
  0x12   :  { %v4353_v57 = vld [vmem:[%s6477_s1 + $0x144] ss:$8 sps:$4 sm:$0xff]   ;;  %v4351_v59 = vld [vmem:[%s6477_s1 + $0x140] ss:$8 sps:$4 sm:$0xff]   ;;  %v4356_v60 = vld [vmem:[%s6477_s1 + $0x134] ss:$8 sps:$4 sm:$0xff]   ;;  %v4764_v62 = vpack.c.bf16 %v47_v55, %v46_v54  ;;  %v4766_v63 = vpack.c.bf16 %v46_v54, %v45_v45 }
  0x13   :  { %237 = vmatpush1.bf16.msra.mxu0 %v4316_v19  ;;  %v4362_v61 = vld [vmem:[%s6477_s1 + $0x1d4] ss:$8 sps:$4 sm:$0xff]   ;;  %v4354_v0 = vld [vmem:[%s6477_s1 + $0x130] ss:$8 sps:$4 sm:$0xff]   ;;  %v4359_v2 = vld [vmem:[%s6477_s1 + $0x124] ss:$8 sps:$4 sm:$0xff]  }
  0x14   :  { %512 = vmatpush1.bf16.msra.mxu1 %v4317_v20  ;;  %238 = vmatprep.subr.bf16.mxu0 %v4318_v21  ;;  %v48_v3 = vld [vmem:[%s6478_s0 + $0x48] sm:$0xff]  ;;  %v49_v4 = vld [vmem:[%s6478_s0 + $0x50] sm:$0xff]  ;;  %v50_v8 = vld [vmem:[%s6478_s0 + $0x58] sm:$0xff]  ;;  %vm3300_vm10 = vcmask 523264   ;;  %vm3307_vm11 = vcmask 1048064   ;;  %vm3309_vm12 = vcmask 130048  }
  0x15   :  { %513 = vmatprep.subr.bf16.mxu1 %v4320_v22  ;;  %v4357_v5 = vld [vmem:[%s6477_s1 + $0x120] ss:$8 sps:$4 sm:$0xff]   ;;  %v4789_v6 = vpack.c.bf16 %v49_v4, %v48_v3  ;;  %v4791_v7 = vpack.c.bf16 %v48_v3, %v47_v55  ;;  %v4807_v11 = vpack.c.bf16 %v50_v8, %v49_v4  ;;  %v53_v13 = vld [vmem:[%s6478_s0 + $0x70] sm:$0xff]  ;;  %v54_v16 = vld [vmem:[%s6478_s0 + $0x78] sm:$0xff]  ;;  %vm4512_vm13 = vmmov 0  }
  0x16   :  { %v51_v9 = vld [vmem:[%s6478_s0 + $0x60] sm:$0xff]  ;;  %v52_v12 = vld [vmem:[%s6478_s0 + $0x68] sm:$0xff]  ;;  %v4839_v19 = vpack.c.bf16 %v54_v16, %v53_v13  ;;  %v57_v21 = vld [vmem:[%s6478_s0 + $0x90] sm:$0xff] }
  0x17   :  { %239 = vmatpush1.bf16.msra.mxu0 %v4322_v23  ;;  %v4805_v10 = vpack.c.bf16 %v51_v9, %v50_v8  ;;  %v4821_v14 = vpack.c.bf16 %v53_v13, %v52_v12  ;;  %v4823_v15 = vpack.c.bf16 %v52_v12, %v51_v9  ;;  %v55_v17 = vld [vmem:[%s6478_s0 + $0x80] sm:$0xff]  ;;  %v56_v20 = vld [vmem:[%s6478_s0 + $0x88] sm:$0xff]  ;;  %v4372_v54 = vld [vmem:[%s6477_s1 + $0x190] ss:$8 sps:$4 sm:$0xff]  }
  0x18   :  { %514 = vmatpush1.bf16.msra.mxu1 %v4323_v24  ;;  %833 = vmatprep.subr.bf16.mxu0 %v4326_v28  ;;  %v4837_v18 = vpack.c.bf16 %v55_v17, %v54_v16  ;;  %v4853_v22 = vpack.c.bf16 %v57_v21, %v56_v20  ;;  %v4855_v23 = vpack.c.bf16 %v56_v20, %v55_v17  ;;  %v58_v24 = vld [vmem:[%s6478_s0 + $0x98] sm:$0xff]  ;;  %v59_v25 = vld [vmem:[%s6478_s0 + $0xa0] sm:$0xff]  ;;  %v60_v28 = vld [vmem:[%s6478_s0 + $0xa8] sm:$0xff] }
  0x19   :  { %1219 = vmatprep.subr.bf16.mxu1 %v4341_v39  ;;  %v4869_v26 = vpack.c.bf16 %v59_v25, %v58_v24  ;;  %v4871_v27 = vpack.c.bf16 %v58_v24, %v57_v21  ;;  %v63_v33 = vld [vmem:[%s6478_s0 + $0xc0] sm:$0xff]  ;;  %v65_v39 = vld [vmem:[%s6478_s0 + $0xd0] sm:$0xff]  ;;  %v699_v24 = vld [vmem:[%s6478_s0 + $0xe8] sm:$0xff] }
  0x1a   :  { %3864 = vmatmul.mubr.msk.bf16.vlgmr.msra.gmra.mxu0 %vm181_vm0, %v94_v29  ;;  %v61_v29 = vld [vmem:[%s6478_s0 + $0xb0] sm:$0xff]  ;;  %v4375_v55 = vld [vmem:[%s6477_s1 + $0x180] ss:$8 sps:$4 sm:$0xff]  }
  0x1b   :  { %3890 = vmatmul.mubr.msk.bf16.vlgmr.msra.gmra.mxu1 %vm181_vm0, %v67_v30  ;;  %834 = vmatpush1.bf16.msra.mxu0 %v4324_v31  ;;  %v4885_v30 = vpack.c.bf16 %v61_v29, %v60_v28  ;;  %v4887_v31 = vpack.c.bf16 %v60_v28, %v59_v25  ;;  %v5085_v25 = vld [vmem:[%s6478_s0 + $0xf0] sm:$0xff] }
  0x1c   :  { %266 = vmatprep.mubr.bf16.mxu0 %v6489_v1  ;;  %541 = vmatprep.mubr.bf16.mxu1 %v6489_v1 }
  0x1d   :  { %835 = vmatprep.subr.bf16.mxu0 %v4329_v32  ;;  %1220 = vmatpush1.bf16.msra.mxu1 %v4339_v41  ;;  %v62_v32 = vld [vmem:[%s6478_s0 + $0xb8] sm:$0xff] }
  0x1e   :  { %1221 = vmatprep.subr.bf16.mxu1 %v4347_v43  ;;  %v4901_v34 = vpack.c.bf16 %v63_v33, %v62_v32  ;;  %v4933_v43 = vld [vmem:[%s6478_s0 + $0xe0] sm:$0xff] }
  0x1f   :  { %836 = vmatpush1.bf16.msra.mxu0 %v4327_v35  ;;  %v4903_v35 = vpack.c.bf16 %v62_v32, %v61_v29 }
  0x20   :  { %837 = vmatprep.subr.bf16.mxu0 %v4332_v36  ;;  %v64_v36 = vld [vmem:[%s6478_s0 + $0xc8] sm:$0xff] }
  0x21   :  { %1222 = vmatpush1.bf16.msra.mxu1 %v4345_v47  ;;  %v4919_v41 = vpack.c.bf16 %v64_v36, %v63_v33  ;;  %v4365_v47 = vld [vmem:[%s6477_s1 + $0x1c4] ss:$8 sps:$4 sm:$0xff]   ;;  %v5090_v33 = vpack.c.bf16 %v699_v24, %v4933_v43 }
  0x22   :  { %3865 = vmatmul.mubr.msk.bf16.gmra.mxu0 %vm181_vm0, %v4681_v37  ;;  %1223 = vmatprep.subr.bf16.mxu1 %v4350_v49  ;;  %v4368_v49 = vld [vmem:[%s6477_s1 + $0x1b4] ss:$8 sps:$4 sm:$0xff]  }
  0x23   :  { %3891 = vmatmul.mubr.msk.bf16.gmra.mxu1 %vm181_vm0, %v4683_v38  ;;  %276 = vmatprep.mubr.bf16.mxu0 %v6489_v1 }
  0x24   :  { %551 = vmatprep.mubr.bf16.mxu1 %v6489_v1  ;;  %838 = vmatpush1.bf16.msra.mxu0 %v4330_v40  ;;  %v4917_v40 = vpack.c.bf16 %v65_v39, %v64_v36 }
  0x25   :  { %839 = vmatprep.subr.bf16.mxu0 %v4335_v42  ;;  %1224 = vmatpush1.bf16.msra.mxu1 %v4348_v53  ;;  %v66_v42 = vld [vmem:[%s6478_s0 + $0xd8] sm:$0xff] }
  0x26   :  { %1225 = vmatprep.subr.bf16.mxu1 %v4353_v57  ;;  %v4936_v44 = vpack.c.bf16 %v4933_v43, %v66_v42  ;;  %v4938_v45 = vpack.c.bf16 %v66_v42, %v65_v39  ;;  %v4374_v53 = vld [vmem:[%s6477_s1 + $0x194] ss:$8 sps:$4 sm:$0xff]  }
  0x28   :  { %840 = vmatpush1.bf16.msra.mxu0 %v4333_v46  ;;  %v4360_v46 = vld [vmem:[%s6477_s1 + $0x1d0] ss:$8 sps:$4 sm:$0xff]  }
  0x29   :  { %841 = vmatprep.subr.bf16.mxu0 %v4338_v48  ;;  %1226 = vmatpush1.bf16.msra.mxu1 %v4351_v59  ;;  %v4363_v48 = vld [vmem:[%s6477_s1 + $0x1c0] ss:$8 sps:$4 sm:$0xff]  }
  0x2a   :  { %3866 = vmatmul.mubr.msk.bf16.gmra.mxu0 %vm181_vm0, %v4724_v50  ;;  %1227 = vmatprep.subr.bf16.mxu1 %v4356_v60 }
  0x2b   :  { %3892 = vmatmul.mubr.msk.bf16.gmra.mxu1 %vm181_vm0, %v4726_v51  ;;  %286 = vmatprep.mubr.bf16.mxu0 %v6489_v1 }
  0x2c   :  { %561 = vmatprep.mubr.bf16.mxu1 %v6489_v1  ;;  %842 = vmatpush1.bf16.msra.mxu0 %v4336_v52  ;;  %v4369_v52 = vld [vmem:[%s6477_s1 + $0x1a0] ss:$8 sps:$4 sm:$0xff]  }
  0x2d   :  { %843 = vmatprep.subr.bf16.mxu0 %v4344_v56  ;;  %1228 = vmatpush1.bf16.msra.mxu1 %v4354_v0 }
  0x2e   :  { %1229 = vmatprep.subr.bf16.mxu1 %v4359_v2 }
  0x30   :  { %844 = vmatpush1.bf16.msra.mxu0 %v4342_v58 }
  0x31   :  { %1605 = vmatprep.subr.bf16.mxu0 %v4362_v61  ;;  %1230 = vmatpush1.bf16.msra.mxu1 %v4357_v5 }
  0x32   :  { %3867 = vmatmul.mubr.msk.bf16.gmra.mxu0 %vm181_vm0, %v4764_v62 }
  0x33   :  { %3893 = vmatmul.mubr.msk.bf16.gmra.mxu1 %vm181_vm0, %v4766_v63  ;;  %296 = vmatprep.mubr.bf16.mxu0 %v6489_v1 }
  0x34   :  { %571 = vmatprep.mubr.bf16.mxu1 %v6489_v1 }
  0x3a   :  { %3868 = vmatmul.mubr.msk.bf16.gmra.mxu0 %vm181_vm0, %v4789_v6 }
  0x3b   :  { %3894 = vmatmul.mubr.msk.bf16.gmra.mxu1 %vm181_vm0, %v4791_v7  ;;  %306 = vmatprep.mubr.bf16.mxu0 %v6489_v1 }
  0x3c   :  { %581 = vmatprep.mubr.bf16.mxu1 %v6489_v1 }
  0x42   :  { %3869 = vmatmul.mubr.msk.bf16.gmra.mxu0 %vm181_vm0, %v4805_v10 }
  0x43   :  { %3895 = vmatmul.mubr.msk.bf16.gmra.mxu1 %vm181_vm0, %v4807_v11  ;;  %316 = vmatprep.mubr.bf16.mxu0 %v6489_v1 }
  0x44   :  { %591 = vmatprep.mubr.bf16.mxu1 %v6489_v1 }
  0x4a   :  { %3870 = vmatmul.mubr.msk.bf16.gmra.mxu0 %vm181_vm0, %v4821_v14 }
  0x4b   :  { %3896 = vmatmul.mubr.msk.bf16.gmra.mxu1 %vm181_vm0, %v4823_v15  ;;  %326 = vmatprep.mubr.bf16.mxu0 %v6489_v1 }
  0x4c   :  { %601 = vmatprep.mubr.bf16.mxu1 %v6489_v1 }
  0x52   :  { %3871 = vmatmul.mubr.msk.bf16.gmra.mxu0 %vm181_vm0, %v4837_v18 }
  0x53   :  { %3897 = vmatmul.mubr.msk.bf16.gmra.mxu1 %vm181_vm0, %v4839_v19  ;;  %336 = vmatprep.mubr.bf16.mxu0 %v6489_v1 }
  0x54   :  { %611 = vmatprep.mubr.bf16.mxu1 %v6489_v1 }
  0x5a   :  { %3872 = vmatmul.mubr.msk.bf16.gmra.mxu0 %vm181_vm0, %v4853_v22 }
  0x5b   :  { %3898 = vmatmul.mubr.msk.bf16.gmra.mxu1 %vm181_vm0, %v4855_v23  ;;  %346 = vmatprep.mubr.bf16.mxu0 %v6489_v1 }
  0x5c   :  { %621 = vmatprep.mubr.bf16.mxu1 %v6489_v1 }
  0x62   :  { %3873 = vmatmul.mubr.msk.bf16.gmra.mxu0 %vm181_vm0, %v4869_v26 }
  0x63   :  { %3899 = vmatmul.mubr.msk.bf16.gmra.mxu1 %vm181_vm0, %v4871_v27  ;;  %356 = vmatprep.mubr.bf16.mxu0 %v6489_v1 }
  0x64   :  { %631 = vmatprep.mubr.bf16.mxu1 %v6489_v1 }
  0x6a   :  { %3874 = vmatmul.mubr.msk.bf16.gmra.mxu0 %vm181_vm0, %v4885_v30 }
  0x6b   :  { %3900 = vmatmul.mubr.msk.bf16.gmra.mxu1 %vm181_vm0, %v4887_v31  ;;  %366 = vmatprep.mubr.bf16.mxu0 %v6489_v1 }
  0x6c   :  { %641 = vmatprep.mubr.bf16.mxu1 %v6489_v1 }
  0x72   :  { %3875 = vmatmul.mubr.msk.bf16.gmra.mxu0 %vm181_vm0, %v4901_v34 }
  0x73   :  { %3901 = vmatmul.mubr.msk.bf16.gmra.mxu1 %vm181_vm0, %v4903_v35  ;;  %376 = vmatprep.mubr.bf16.mxu0 %v6489_v1 }
  0x74   :  { %651 = vmatprep.mubr.bf16.mxu1 %v6489_v1 }
  0x7a   :  { %3876 = vmatmul.mubr.msk.bf16.gmra.mxu0 %vm181_vm0, %v4917_v40 }
  0x7b   :  { %3902 = vmatmul.mubr.msk.bf16.gmra.mxu1 %vm181_vm0, %v4919_v41  ;;  %386 = vmatprep.mubr.bf16.mxu0 %v6489_v1 }
  0x7c   :  { %661 = vmatprep.mubr.bf16.mxu1 %v6489_v1 }
  0x82   :  { %3877 = vmatmul.mubr.msk.bf16.gmra.mxu0 %vm181_vm0, %v4936_v44 }
  0x83   :  { %3903 = vmatmul.mubr.msk.bf16.gmra.mxu1 %vm181_vm0, %v4938_v45  ;;  %861 = vmatprep.mubr.bf16.mxu0 %v6489_v1 }
  0x84   :  { %1247 = vmatprep.mubr.bf16.mxu1 %v6489_v1 }
  0x8a   :  { %3928 = vmatmul.mubr.msk.bf16.vlgmr.msra.gmra.mxu0 %vm181_vm0, %v4683_v38  ;;  %v4366_v38 = vld [vmem:[%s6477_s1 + $0x1b0] ss:$8 sps:$4 sm:$0xff]  }
  0x8b   :  { %3966 = vmatmul.mubr.msk.bf16.vlgmr.msra.gmra.mxu1 %vm181_vm0, %v4681_v37  ;;  %1606 = vmatpush1.bf16.msra.mxu0 %v4360_v46  ;;  %v4371_v37 = vld [vmem:[%s6477_s1 + $0x1a4] ss:$8 sps:$4 sm:$0xff]  }
  0x8c   :  { %871 = vmatprep.mubr.bf16.mxu0 %v6489_v1  ;;  %1257 = vmatprep.mubr.bf16.mxu1 %v6489_v1 }
  0x8d   :  { %1607 = vmatprep.subr.bf16.mxu0 %v4365_v47 }
  0x8f   :  { %1608 = vmatpush1.bf16.msra.mxu0 %v4363_v48 }
  0x90   :  { %1609 = vmatprep.subr.bf16.mxu0 %v4368_v49 }
  0x92   :  { %3929 = vmatmul.mubr.msk.bf16.gmra.mxu0 %vm181_vm0, %v4726_v51 }
  0x93   :  { %3967 = vmatmul.mubr.msk.bf16.gmra.mxu1 %vm181_vm0, %v4724_v50  ;;  %881 = vmatprep.mubr.bf16.mxu0 %v6489_v1  ;;  %v4377_v50 = vld [vmem:[%s6477_s1 + $0x184] ss:$8 sps:$4 sm:$0xff]  }
  0x94   :  { %1267 = vmatprep.mubr.bf16.mxu1 %v6489_v1  ;;  %1610 = vmatpush1.bf16.msra.mxu0 %v4366_v38 }
  0x95   :  { %1611 = vmatprep.subr.bf16.mxu0 %v4371_v37 }
  0x98   :  { %1612 = vmatpush1.bf16.msra.mxu0 %v4369_v52 }
  0x99   :  { %1613 = vmatprep.subr.bf16.mxu0 %v4374_v53 }
  0x9a   :  { %3930 = vmatmul.mubr.msk.bf16.gmra.mxu0 %vm181_vm0, %v4766_v63 }
  0x9b   :  { %3968 = vmatmul.mubr.msk.bf16.gmra.mxu1 %vm181_vm0, %v4764_v62  ;;  %891 = vmatprep.mubr.bf16.mxu0 %v6489_v1 }
  0x9c   :  { %1277 = vmatprep.mubr.bf16.mxu1 %v6489_v1  ;;  %1614 = vmatpush1.bf16.msra.mxu0 %v4372_v54 }
  0x9d   :  { %1615 = vmatprep.subr.bf16.mxu0 %v4377_v50 }
  0xa0   :  { %1616 = vmatpush1.bf16.msra.mxu0 %v4375_v55 }
  0xa2   :  { %3931 = vmatmul.mubr.msk.bf16.gmra.mxu0 %vm181_vm0, %v4791_v7 }
  0xa3   :  { %3969 = vmatmul.mubr.msk.bf16.gmra.mxu1 %vm181_vm0, %v4789_v6  ;;  %901 = vmatprep.mubr.bf16.mxu0 %v6489_v1 }
  0xa4   :  { %1287 = vmatprep.mubr.bf16.mxu1 %v6489_v1 }
  0xaa   :  { %3932 = vmatmul.mubr.msk.bf16.gmra.mxu0 %vm181_vm0, %v4807_v11 }
  0xab   :  { %3970 = vmatmul.mubr.msk.bf16.gmra.mxu1 %vm181_vm0, %v4805_v10  ;;  %911 = vmatprep.mubr.bf16.mxu0 %v6489_v1 }
  0xac   :  { %1297 = vmatprep.mubr.bf16.mxu1 %v6489_v1 }
  0xb2   :  { %3933 = vmatmul.mubr.msk.bf16.gmra.mxu0 %vm181_vm0, %v4823_v15 }
  0xb3   :  { %3971 = vmatmul.mubr.msk.bf16.gmra.mxu1 %vm181_vm0, %v4821_v14  ;;  %921 = vmatprep.mubr.bf16.mxu0 %v6489_v1 }
  0xb4   :  { %1307 = vmatprep.mubr.bf16.mxu1 %v6489_v1 }
  0xba   :  { %3934 = vmatmul.mubr.msk.bf16.gmra.mxu0 %vm181_vm0, %v4839_v19 }
  0xbb   :  { %3972 = vmatmul.mubr.msk.bf16.gmra.mxu1 %vm181_vm0, %v4837_v18  ;;  %931 = vmatprep.mubr.bf16.mxu0 %v6489_v1 }
  0xbc   :  { %1317 = vmatprep.mubr.bf16.mxu1 %v6489_v1 }
  0xc2   :  { %3935 = vmatmul.mubr.msk.bf16.gmra.mxu0 %vm181_vm0, %v4855_v23 }
  0xc3   :  { %3973 = vmatmul.mubr.msk.bf16.gmra.mxu1 %vm181_vm0, %v4853_v22  ;;  %941 = vmatprep.mubr.bf16.mxu0 %v6489_v1 }
  0xc4   :  { %1327 = vmatprep.mubr.bf16.mxu1 %v6489_v1 }
  0xca   :  { %3936 = vmatmul.mubr.msk.bf16.gmra.mxu0 %vm181_vm0, %v4871_v27 }
  0xcb   :  { %3974 = vmatmul.mubr.msk.bf16.gmra.mxu1 %vm181_vm0, %v4869_v26  ;;  %951 = vmatprep.mubr.bf16.mxu0 %v6489_v1 }
  0xcc   :  { %1337 = vmatprep.mubr.bf16.mxu1 %v6489_v1 }
  0xd2   :  { %3937 = vmatmul.mubr.msk.bf16.gmra.mxu0 %vm181_vm0, %v4887_v31 }
  0xd3   :  { %3975 = vmatmul.mubr.msk.bf16.gmra.mxu1 %vm181_vm0, %v4885_v30  ;;  %961 = vmatprep.mubr.bf16.mxu0 %v6489_v1 }
  0xd4   :  { %1347 = vmatprep.mubr.bf16.mxu1 %v6489_v1 }
  0xda   :  { %v258_v56 = vpop.f32.mrf.mxu0  ;;  %3938 = vmatmul.mubr.msk.bf16.gmra.mxu0 %vm181_vm0, %v4903_v35 }
  0xdb   :  { %v533_v57 = vpop.f32.mrf.mxu1  ;;  %3976 = vmatmul.mubr.msk.bf16.gmra.mxu1 %vm181_vm0, %v4901_v34  ;;  %971 = vmatprep.mubr.bf16.mxu0 %v6489_v1  ;;  %v1099_v34 = vpack.c.bf16 %v5085_v25, %v699_v24 }
  0xdc   :  { %v5043_v58 = vadd.f32 %v533_v57, %v258_v56  ;;  %1357 = vmatprep.mubr.bf16.mxu1 %v6489_v1  ;;  %v260_v59 = vpop.f32.mrf.mxu0 }
  0xdd   :  { %v535_v60 = vpop.f32.mrf.mxu1 }
  0xde   :  { %v5047_v61 = vadd.f32 %v535_v60, %v260_v59  ;;  %v262_v62 = vpop.f32.mrf.mxu0 }
  0xdf   :  { %v537_v0 = vpop.f32.mrf.mxu1 }
  0xe0   :  { %v5049_v2 = vadd.f32 %v537_v0, %v262_v62  ;;  %v5051_v3 = vpop.f32.mrf.mxu0 }
  0xe1   :  { %6491 = vst [vmem:[#allocation4_spill] sm:$0xff] %v5051_v3  ;;  %v5053_v4 = vpop.f32.mrf.mxu1 }
  0xe2   :  { %6492 = vst [vmem:[#allocation5_spill] sm:$0xff] %v5053_v4  ;;  %v268_v5 = vpop.f32.mrf.mxu0  ;;  %3939 = vmatmul.mubr.msk.bf16.gmra.mxu0 %vm181_vm0, %v4919_v41 }
  0xe3   :  { %v543_v6 = vpop.f32.mrf.mxu1  ;;  %3977 = vmatmul.mubr.msk.bf16.gmra.mxu1 %vm181_vm0, %v4917_v40  ;;  %981 = vmatprep.mubr.bf16.mxu0 %v6489_v1 }
  0xe4   :  { %v5059_v8 = vadd.f32 %v543_v6, %v268_v5  ;;  %1367 = vmatprep.mubr.bf16.mxu1 %v6489_v1  ;;  %v270_v9 = vpop.f32.mrf.mxu0 }
  0xe5   :  { %v545_v10 = vpop.f32.mrf.mxu1 }
  0xe6   :  { %v5063_v12 = vadd.f32 %v545_v10, %v270_v9  ;;  %v272_v13 = vpop.f32.mrf.mxu0 }
  0xe7   :  { %v547_v14 = vpop.f32.mrf.mxu1 }
  0xe8   :  { %v5065_v16 = vadd.f32 %v547_v14, %v272_v13  ;;  %v5067_v17 = vpop.f32.mrf.mxu0 }
  0xe9   :  { %6493 = vst [vmem:[#allocation6_spill] sm:$0xff] %v5067_v17  ;;  %v5069_v18 = vpop.f32.mrf.mxu1 }
  0xea   :  { %6494 = vst [vmem:[#allocation7_spill] sm:$0xff] %v5069_v18  ;;  %v278_v20 = vpop.f32.mrf.mxu0  ;;  %3940 = vmatmul.mubr.msk.bf16.gmra.mxu0 %vm181_vm0, %v4938_v45 }
  0xeb   :  { %v553_v21 = vpop.f32.mrf.mxu1  ;;  %3978 = vmatmul.mubr.msk.bf16.gmra.mxu1 %vm181_vm0, %v4936_v44  ;;  %991 = vmatprep.mubr.bf16.mxu0 %v6489_v1 }
  0xec   :  { %v5075_v22 = vadd.f32 %v553_v21, %v278_v20  ;;  %1377 = vmatprep.mubr.bf16.mxu1 %v6489_v1  ;;  %v280_v26 = vpop.f32.mrf.mxu0 }
  0xed   :  { %v555_v28 = vpop.f32.mrf.mxu1 }
  0xee   :  { %v5087_v29 = vadd.f32 %v555_v28, %v280_v26  ;;  %v282_v30 = vpop.f32.mrf.mxu0 }
  0xef   :  { %v557_v32 = vpop.f32.mrf.mxu1 }
  0xf0   :  { %v5093_v36 = vadd.f32 %v557_v32, %v282_v30  ;;  %v5095_v39 = vpop.f32.mrf.mxu0 }
  0xf1   :  { %6495 = vst [vmem:[#allocation8_spill] sm:$0xff] %v5095_v39  ;;  %v5097_v40 = vpop.f32.mrf.mxu1 }
  0xf2   :  { %6496 = vst [vmem:[#allocation9_spill] sm:$0xff] %v5097_v40  ;;  %v288_v42 = vpop.f32.mrf.mxu0  ;;  %3941 = vmatmul.mubr.msk.bf16.gmra.mxu0 %vm181_vm0, %v5090_v33 }
  0xf3   :  { %v563_v44 = vpop.f32.mrf.mxu1  ;;  %3979 = vmatmul.mubr.msk.bf16.gmra.mxu1 %vm181_vm0, %v1099_v34  ;;  %1633 = vmatprep.mubr.bf16.mxu0 %v6489_v1 }
  0xf4   :  { %v5102_v46 = vadd.f32 %v563_v44, %v288_v42  ;;  %2328 = vmatprep.mubr.bf16.mxu1 %v6489_v1  ;;  %v290_v43 = vpop.f32.mrf.mxu0 }
  0xf5   :  { %v565_v47 = vpop.f32.mrf.mxu1 }
  0xf6   :  { %v5106_v48 = vadd.f32 %v565_v47, %v290_v43  ;;  %v292_v49 = vpop.f32.mrf.mxu0 }
  0xf7   :  { %v567_v38 = vpop.f32.mrf.mxu1 }
  0xf8   :  { %v5108_v37 = vadd.f32 %v567_v38, %v292_v49  ;;  %v5110_v52 = vpop.f32.mrf.mxu0 }
  0xf9   :  { %6497 = vst [vmem:[#allocation10_spill] sm:$0xff] %v5110_v52  ;;  %v5112_v53 = vpop.f32.mrf.mxu1 }
  0xfa   :  { %6498 = vst [vmem:[#allocation11_spill] sm:$0xff] %v5112_v53  ;;  %v298_v54 = vpop.f32.mrf.mxu0  ;;  %4004 = vmatmul.mubr.msk.bf16.vlgmr.msra.gmra.mxu0 %vm181_vm0, %v4726_v51 }
  0xfb   :  { %v573_v50 = vpop.f32.mrf.mxu1  ;;  %1643 = vmatprep.mubr.bf16.mxu0 %v6489_v1 }
  0xfc   :  { %v5116_v55 = vadd.f32 %v573_v50, %v298_v54  ;;  %v300_v56 = vpop.f32.mrf.mxu0 }
  0xfd   :  { %v575_v57 = vpop.f32.mrf.mxu1 }
  0xfe   :  { %v5119_v59 = vadd.f32 %v575_v57, %v300_v56  ;;  %v302_v60 = vpop.f32.mrf.mxu0 }
  0xff   :  { %v577_v62 = vpop.f32.mrf.mxu1 }
 0x100   :  { %v5121_v0 = vadd.f32 %v577_v62, %v302_v60  ;;  %v5123_v5 = vpop.f32.mrf.mxu0 }
 0x101   :  { %6499 = vst [vmem:[#allocation12_spill] sm:$0xff] %v5123_v5  ;;  %v5125_v6 = vpop.f32.mrf.mxu1 }
 0x102   :  { %6500 = vst [vmem:[#allocation13_spill] sm:$0xff] %v5125_v6  ;;  %v308_v9 = vpop.f32.mrf.mxu0  ;;  %4005 = vmatmul.mubr.msk.bf16.gmra.mxu0 %vm181_vm0, %v4766_v63 }
 0x103   :  { %v583_v10 = vpop.f32.mrf.mxu1  ;;  %1653 = vmatprep.mubr.bf16.mxu0 %v6489_v1 }
 0x104   :  { %v5129_v51 = vadd.f32 %v583_v10, %v308_v9  ;;  %v310_v13 = vpop.f32.mrf.mxu0 }
 0x105   :  { %v585_v14 = vpop.f32.mrf.mxu1 }
 0x106   :  { %v5132_v20 = vadd.f32 %v585_v14, %v310_v13  ;;  %v312_v21 = vpop.f32.mrf.mxu0 }
 0x107   :  { %v587_v24 = vpop.f32.mrf.mxu1 }
 0x108   :  { %v5134_v26 = vadd.f32 %v587_v24, %v312_v21  ;;  %v5136_v28 = vpop.f32.mrf.mxu0 }
 0x109   :  { %6501 = vst [vmem:[#allocation14_spill] sm:$0xff] %v5136_v28  ;;  %v5138_v30 = vpop.f32.mrf.mxu1 }
 0x10a   :  { %6502 = vst [vmem:[#allocation15_spill] sm:$0xff] %v5138_v30  ;;  %v318_v32 = vpop.f32.mrf.mxu0  ;;  %4006 = vmatmul.mubr.msk.bf16.gmra.mxu0 %vm181_vm0, %v4791_v7 }
 0x10b   :  { %v593_v34 = vpop.f32.mrf.mxu1  ;;  %1663 = vmatprep.mubr.bf16.mxu0 %v6489_v1 }
 0x10c   :  { %v5142_v63 = vadd.f32 %v593_v34, %v318_v32  ;;  %v320_v42 = vpop.f32.mrf.mxu0 }
 0x10d   :  { %v595_v44 = vpop.f32.mrf.mxu1 }
 0x10e   :  { %v5145_v43 = vadd.f32 %v595_v44, %v320_v42  ;;  %v322_v47 = vpop.f32.mrf.mxu0 }
 0x10f   :  { %v597_v49 = vpop.f32.mrf.mxu1 }
 0x110   :  { %v5147_v38 = vadd.f32 %v597_v49, %v322_v47  ;;  %v5149_v54 = vpop.f32.mrf.mxu0 }
 0x111   :  { %6503 = vst [vmem:[#allocation16_spill] sm:$0xff] %v5149_v54  ;;  %v5151_v50 = vpop.f32.mrf.mxu1 }
 0x112   :  { %6504 = vst [vmem:[#allocation17_spill] sm:$0xff] %v5151_v50  ;;  %v328_v56 = vpop.f32.mrf.mxu0  ;;  %4007 = vmatmul.mubr.msk.bf16.gmra.mxu0 %vm181_vm0, %v4807_v11 }
 0x113   :  { %v603_v57 = vpop.f32.mrf.mxu1  ;;  %1673 = vmatprep.mubr.bf16.mxu0 %v6489_v1 }
 0x114   :  { %v5155_v7 = vadd.f32 %v603_v57, %v328_v56  ;;  %v330_v60 = vpop.f32.mrf.mxu0 }
 0x115   :  { %v605_v62 = vpop.f32.mrf.mxu1 }
 0x116   :  { %v5158_v9 = vadd.f32 %v605_v62, %v330_v60  ;;  %v332_v10 = vpop.f32.mrf.mxu0 }
 0x117   :  { %v607_v13 = vpop.f32.mrf.mxu1 }
 0x118   :  { %v5160_v14 = vadd.f32 %v607_v13, %v332_v10  ;;  %v5162_v21 = vpop.f32.mrf.mxu0 }
 0x119   :  { %v5164_v24 = vpop.f32.mrf.mxu1 }
 0x11a   :  { %v338_v32 = vpop.f32.mrf.mxu0  ;;  %4008 = vmatmul.mubr.msk.bf16.gmra.mxu0 %vm181_vm0, %v4823_v15 }
 0x11b   :  { %v613_v34 = vpop.f32.mrf.mxu1  ;;  %1683 = vmatprep.mubr.bf16.mxu0 %v6489_v1 }
 0x11c   :  { %v5168_v11 = vadd.f32 %v613_v34, %v338_v32  ;;  %v340_v42 = vpop.f32.mrf.mxu0 }
 0x11d   :  { %v615_v44 = vpop.f32.mrf.mxu1 }
 0x11e   :  { %v5171_v47 = vadd.f32 %v615_v44, %v340_v42  ;;  %v342_v49 = vpop.f32.mrf.mxu0 }
 0x11f   :  { %v617_v56 = vpop.f32.mrf.mxu1 }
 0x120   :  { %v5173_v57 = vadd.f32 %v617_v56, %v342_v49  ;;  %v5175_v60 = vpop.f32.mrf.mxu0 }
 0x121   :  { %v5177_v62 = vpop.f32.mrf.mxu1 }
 0x122   :  { %v348_v10 = vpop.f32.mrf.mxu0  ;;  %4009 = vmatmul.mubr.msk.bf16.gmra.mxu0 %vm181_vm0, %v4839_v19 }
 0x123   :  { %v623_v13 = vpop.f32.mrf.mxu1  ;;  %1693 = vmatprep.mubr.bf16.mxu0 %v6489_v1 }
 0x124   :  { %v5181_v15 = vadd.f32 %v623_v13, %v348_v10  ;;  %v350_v32 = vpop.f32.mrf.mxu0 }
 0x125   :  { %v625_v34 = vpop.f32.mrf.mxu1 }
 0x126   :  { %v5184_v42 = vadd.f32 %v625_v34, %v350_v32  ;;  %v352_v44 = vpop.f32.mrf.mxu0 }
 0x127   :  { %v627_v49 = vpop.f32.mrf.mxu1 }
 0x128   :  { %v5186_v56 = vadd.f32 %v627_v49, %v352_v44  ;;  %v5188_v50 = vpop.f32.mrf.mxu0 }
 0x129   :  { %v5190_v54 = vpop.f32.mrf.mxu1 }
 0x12a   :  { %v358_v30 = vpop.f32.mrf.mxu0  ;;  %4010 = vmatmul.mubr.msk.bf16.gmra.mxu0 %vm181_vm0, %v4855_v23 }
 0x12b   :  { %v633_v28 = vpop.f32.mrf.mxu1  ;;  %1703 = vmatprep.mubr.bf16.mxu0 %v6489_v1 }
 0x12c   :  { %v5194_v19 = vadd.f32 %v633_v28, %v358_v30  ;;  %v360_v10 = vpop.f32.mrf.mxu0 }
 0x12d   :  { %v635_v13 = vpop.f32.mrf.mxu1 }
 0x12e   :  { %v5197_v32 = vadd.f32 %v635_v13, %v360_v10  ;;  %v362_v34 = vpop.f32.mrf.mxu0 }
 0x12f   :  { %v637_v44 = vpop.f32.mrf.mxu1 }
 0x130   :  { %v5199_v49 = vadd.f32 %v637_v44, %v362_v34  ;;  %v5201_v6 = vpop.f32.mrf.mxu0 }
 0x131   :  { %v5203_v5 = vpop.f32.mrf.mxu1 }
 0x132   :  { %v368_v53 = vpop.f32.mrf.mxu0  ;;  %4011 = vmatmul.mubr.msk.bf16.gmra.mxu0 %vm181_vm0, %v4871_v27 }
 0x133   :  { %v643_v52 = vpop.f32.mrf.mxu1  ;;  %1713 = vmatprep.mubr.bf16.mxu0 %v6489_v1 }
 0x134   :  { %v5207_v23 = vadd.f32 %v643_v52, %v368_v53  ;;  %v370_v28 = vpop.f32.mrf.mxu0 }
 0x135   :  { %v645_v30 = vpop.f32.mrf.mxu1 }
 0x136   :  { %v5210_v10 = vadd.f32 %v645_v30, %v370_v28  ;;  %v372_v13 = vpop.f32.mrf.mxu0 }
 0x137   :  { %v647_v34 = vpop.f32.mrf.mxu1 }
 0x138   :  { %v5212_v44 = vadd.f32 %v647_v34, %v372_v13  ;;  %v5214_v40 = vpop.f32.mrf.mxu0 }
 0x139   :  { %v5216_v39 = vpop.f32.mrf.mxu1 }
 0x13a   :  { %6505 = vst [vmem:[#allocation18_spill] sm:$0xff] %v5212_v44  ;;  %6506 = vst [vmem:[#allocation19_spill] sm:$0xff] %v5216_v39  ;;  %v378_v18 = vpop.f32.mrf.mxu0  ;;  %4012 = vmatmul.mubr.msk.bf16.gmra.mxu0 %vm181_vm0, %v4887_v31 }
 0x13b   :  { %v653_v17 = vpop.f32.mrf.mxu1  ;;  %1723 = vmatprep.mubr.bf16.mxu0 %v6489_v1 }
 0x13c   :  { %v5220_v27 = vadd.f32 %v653_v17, %v378_v18  ;;  %v380_v52 = vpop.f32.mrf.mxu0 }
 0x13d   :  { %v655_v53 = vpop.f32.mrf.mxu1 }
 0x13e   :  { %v5223_v28 = vadd.f32 %v655_v53, %v380_v52  ;;  %v382_v30 = vpop.f32.mrf.mxu0 }
 0x13f   :  { %v657_v13 = vpop.f32.mrf.mxu1 }
 0x140   :  { %v5225_v34 = vadd.f32 %v657_v13, %v382_v30  ;;  %v5227_v4 = vpop.f32.mrf.mxu0 }
 0x141   :  { %6508 = vst [vmem:[#allocation21_spill] sm:$0xff] %v5227_v4  ;;  %v5229_v3 = vpop.f32.mrf.mxu1 }
 0x142   :  { %6507 = vst [vmem:[#allocation20_spill] sm:$0xff] %v5225_v34  ;;  %6509 = vst [vmem:[#allocation22_spill] sm:$0xff] %v5229_v3  ;;  %v388_v44 = vpop.f32.mrf.mxu0  ;;  %4013 = vmatmul.mubr.msk.bf16.gmra.mxu0 %vm181_vm0, %v4903_v35 }
 0x143   :  { %v663_v39 = vpop.f32.mrf.mxu1  ;;  %1733 = vmatprep.mubr.bf16.mxu0 %v6489_v1 }
 0x144   :  { %v5233_v31 = vadd.f32 %v663_v39, %v388_v44  ;;  %v390_v17 = vpop.f32.mrf.mxu0 }
 0x145   :  { %v665_v18 = vpop.f32.mrf.mxu1 }
 0x146   :  { %6510 = vst [vmem:[#allocation23_spill] sm:$0xff] %v5233_v31  ;;  %v5236_v52 = vadd.f32 %v665_v18, %v390_v17  ;;  %v392_v53 = vpop.f32.mrf.mxu0 }
 0x147   :  { %v667_v30 = vpop.f32.mrf.mxu1 }
 0x148   :  { %6511 = vst [vmem:[#allocation24_spill] sm:$0xff] %v5236_v52  ;;  %v5238_v13 = vadd.f32 %v667_v30, %v392_v53  ;;  %v5240_v34 = vpop.f32.mrf.mxu0 }
 0x149   :  { %6513 = vst [vmem:[#allocation26_spill] sm:$0xff] %v5240_v34  ;;  %v5242_v3 = vpop.f32.mrf.mxu1 }
 0x14a   :  { %6512 = vst [vmem:[#allocation25_spill] sm:$0xff] %v5238_v13  ;;  %6514 = vst [vmem:[#allocation27_spill] sm:$0xff] %v5242_v3  ;;  %v863_v4 = vpop.f32.mrf.mxu0  ;;  %4014 = vmatmul.mubr.msk.bf16.gmra.mxu0 %vm181_vm0, %v4919_v41 }
 0x14b   :  { %v1249_v35 = vpop.f32.mrf.mxu1  ;;  %v1002_v39 = vadd.f32 %v863_v4, %v5043_v58  ;;  %1743 = vmatprep.mubr.bf16.mxu0 %v6489_v1 }
 0x14c   :  { %v865_v44 = vpop.f32.mrf.mxu0 }
 0x14d   :  { %v1251_v17 = vpop.f32.mrf.mxu1  ;;  %v1003_v18 = vadd.f32 %v865_v44, %v5047_v61  ;;  %v5249_v52 = vadd.f32 %v1249_v35, %v1002_v39 }
 0x14e   :  { %v867_v53 = vpop.f32.mrf.mxu0 }
 0x14f   :  { %v1253_v30 = vpop.f32.mrf.mxu1  ;;  %v1004_v13 = vadd.f32 %v867_v53, %v5049_v2  ;;  %v5252_v3 = vadd.f32 %v1251_v17, %v1003_v18 }
 0x150   :  { %v5254_v34 = vpop.f32.mrf.mxu0 }
 0x151   :  { %v5256_v41 = vadd.f32 %v1253_v30, %v1004_v13 }
 0x152   :  { %v873_v31 = vpop.f32.mrf.mxu0  ;;  %4015 = vmatmul.mubr.msk.bf16.gmra.mxu0 %vm181_vm0, %v4938_v45 }
 0x153   :  { %v5261_v58 = vadd.f32 %v873_v31, %v5059_v8  ;;  %1753 = vmatprep.mubr.bf16.mxu0 %v6489_v1  ;;  %v1471_v8 = vld [vmem:[%s6478_s0 + $0xf8] sm:$0xff] }
 0x154   :  { %v875_v61 = vpop.f32.mrf.mxu0  ;;  %v1485_v17 = vpack.c.bf16 %v1471_v8, %v5085_v25 }
 0x155   :  { %v5265_v4 = vadd.f32 %v875_v61, %v5063_v12 }
 0x156   :  { %v877_v2 = vpop.f32.mrf.mxu0 }
 0x157   :  { %v5268_v35 = vadd.f32 %v877_v2, %v5065_v16  ;;  %v5284_v16 = vpop.f32.mrf.mxu1 }
 0x158   :  { %v5270_v39 = vpop.f32.mrf.mxu0 }
 0x159   :  { %v5292_v18 = vpop.f32.mrf.mxu1 }
 0x15a   :  { %v883_v13 = vpop.f32.mrf.mxu0  ;;  %4016 = vmatmul.mubr.msk.bf16.gmra.mxu0 %vm181_vm0, %v5090_v33 }
 0x15b   :  { %v5275_v45 = vadd.f32 %v883_v13, %v5075_v22  ;;  %1763 = vmatprep.mubr.bf16.mxu0 %v6489_v1  ;;  %v5302_v25 = vpop.f32.mrf.mxu1 }
 0x15c   :  { %v885_v12 = vpop.f32.mrf.mxu0 }
 0x15d   :  { %v5282_v31 = vadd.f32 %v885_v12, %v5087_v29  ;;  %v5309_v8 = vpop.f32.mrf.mxu1 }
 0x15e   :  { %v887_v44 = vpop.f32.mrf.mxu0 }
 0x15f   :  { %v5288_v33 = vadd.f32 %v887_v44, %v5093_v36 }
 0x160   :  { %v5290_v22 = vpop.f32.mrf.mxu0 }
 0x162   :  { %v893_v53 = vpop.f32.mrf.mxu0  ;;  %4017 = vmatmul.mubr.msk.bf16.gmra.mxu0 %vm181_vm0, %v1485_v17 }
 0x163   :  { %v5296_v30 = vadd.f32 %v893_v53, %v5102_v46  ;;  %2879 = vmatprep.mubr.bf16.mxu0 %v6489_v1 }
 0x164   :  { %v895_v29 = vpop.f32.mrf.mxu0 }
 0x165   :  { %v5300_v61 = vadd.f32 %v895_v29, %v5106_v48  ;;  %v5317_v48 = vpop.f32.mrf.mxu1 }
 0x166   :  { %v897_v36 = vpop.f32.mrf.mxu0 }
 0x167   :  { %v5305_v2 = vadd.f32 %v897_v36, %v5108_v37  ;;  %v5324_v36 = vpop.f32.mrf.mxu1 }
 0x168   :  { %v5307_v13 = vpop.f32.mrf.mxu0 }
 0x169   :  { %6515 = vst [vmem:[#allocation28_spill] sm:$0xff] %v5305_v2 }
 0x16a   :  { %v903_v12 = vpop.f32.mrf.mxu0 }
 0x16b   :  { %v5312_v46 = vadd.f32 %v903_v12, %v5116_v55 }
 0x16c   :  { %v905_v44 = vpop.f32.mrf.mxu0 }
 0x16d   :  { %v5315_v17 = vadd.f32 %v905_v44, %v5119_v59  ;;  %v5332_v59 = vpop.f32.mrf.mxu1 }
 0x16e   :  { %v907_v53 = vpop.f32.mrf.mxu0 }
 0x16f   :  { %6516 = vst [vmem:[#allocation29_spill] sm:$0xff] %v5315_v17  ;;  %v5320_v29 = vadd.f32 %v907_v53, %v5121_v0  ;;  %v5339_v53 = vpop.f32.mrf.mxu1 }
 0x170   :  { %v5322_v37 = vpop.f32.mrf.mxu0 }
 0x171   :  { %6517 = vst [vmem:[#allocation30_spill] sm:$0xff] %v5320_v29  ;;  %6518 = vst [vmem:[#allocation31_spill] sm:$0xff] %v5322_v37 }
 0x172   :  { %v913_v1 = vpop.f32.mrf.mxu0 }
 0x173   :  { %v5327_v2 = vadd.f32 %v913_v1, %v5129_v51 }
 0x174   :  { %v915_v55 = vpop.f32.mrf.mxu0 }
 0x175   :  { %v5330_v12 = vadd.f32 %v915_v55, %v5132_v20  ;;  %v5347_v20 = vpop.f32.mrf.mxu1 }
 0x176   :  { %v917_v44 = vpop.f32.mrf.mxu0 }
 0x177   :  { %6519 = vst [vmem:[#allocation32_spill] sm:$0xff] %v5330_v12  ;;  %v5335_v17 = vadd.f32 %v917_v44, %v5134_v26  ;;  %v5354_v44 = vpop.f32.mrf.mxu1 }
 0x178   :  { %v5337_v0 = vpop.f32.mrf.mxu0 }
 0x179   :  { %6520 = vst [vmem:[#allocation33_spill] sm:$0xff] %v5335_v17  ;;  %6521 = vst [vmem:[#allocation34_spill] sm:$0xff] %v5337_v0 }
 0x17a   :  { %v923_v29 = vpop.f32.mrf.mxu0 }
 0x17b   :  { %v5342_v37 = vadd.f32 %v923_v29, %v5142_v63 }
 0x17c   :  { %v925_v1 = vpop.f32.mrf.mxu0 }
 0x17d   :  { %v5345_v51 = vadd.f32 %v925_v1, %v5145_v43  ;;  %v5362_v43 = vpop.f32.mrf.mxu1 }
 0x17e   :  { %v927_v55 = vpop.f32.mrf.mxu0 }
 0x17f   :  { %6522 = vst [vmem:[#allocation35_spill] sm:$0xff] %v5345_v51  ;;  %v5350_v12 = vadd.f32 %v927_v55, %v5147_v38  ;;  %v610_v51 = vadd.f32 %v5164_v24, %v5162_v21 }
 0x180   :  { %v5352_v26 = vpop.f32.mrf.mxu0 }
 0x181   :  { %6523 = vst [vmem:[#allocation36_spill] sm:$0xff] %v5350_v12  ;;  %6524 = vst [vmem:[#allocation37_spill] sm:$0xff] %v5352_v26  ;;  %v5371_v26 = vpop.f32.mrf.mxu1 }
 0x182   :  { %v933_v17 = vpop.f32.mrf.mxu0 }
 0x183   :  { %v5357_v0 = vadd.f32 %v933_v17, %v5155_v7 }
 0x184   :  { %v935_v63 = vpop.f32.mrf.mxu0 }
 0x185   :  { %v5360_v29 = vadd.f32 %v935_v63, %v5158_v9  ;;  %v4029_v63 = vld [vmem:[%s6479_s3 + $0xa8] sm:$0x33] }
 0x186   :  { %v937_v1 = vpop.f32.mrf.mxu0  ;;  %v4040_v24 = vcombine.low %v4029_v63, %v4029_v63 }
 0x187   :  { %v5367_v38 = vadd.f32 %v937_v1, %v5160_v14  ;;  %v4041_v14 = vcombine.high %v4029_v63, %v4029_v63  ;;  %v5382_v1 = vpop.f32.mrf.mxu1 }
 0x188   :  { %v939_v55 = vpop.f32.mrf.mxu0 }
 0x189   :  { %v5369_v12 = vadd.f32 %v939_v55, %v610_v51  ;;  %v620_v55 = vadd.f32 %v5177_v62, %v5175_v60  ;;  %4042 = vmatprep.subr.msk.bf16.mxu1 %vm2289_vm1, %v4041_v14  ;;  %v630_v14 = vadd.f32 %v5190_v54, %v5188_v50  ;;  %v640_v54 = vadd.f32 %v5203_v5, %v5201_v6 }
 0x18a   :  { %v943_v7 = vpop.f32.mrf.mxu0 }
 0x18b   :  { %6525 = vst [vmem:[#allocation38_spill] sm:$0xff] %v5369_v12  ;;  %v5374_v17 = vadd.f32 %v943_v7, %v5168_v11  ;;  %v2291_v7 = vsel %vm2289_vm1, %v4040_v24, 0 }
 0x18c   :  { %v945_v9 = vpop.f32.mrf.mxu0  ;;  %2301 = vmatpush1.bf16.msra.mxu1 %v2291_v7 }
 0x18d   :  { %6526 = vst [vmem:[#allocation39_spill] sm:$0xff] %v5374_v17  ;;  %v5380_v21 = vadd.f32 %v945_v9, %v5171_v47  ;;  %v5393_v47 = vpop.f32.mrf.mxu1 }
 0x18e   :  { %v947_v51 = vpop.f32.mrf.mxu0 }
 0x18f   :  { %6527 = vst [vmem:[#allocation40_spill] sm:$0xff] %v5380_v21  ;;  %v5387_v11 = vadd.f32 %v947_v51, %v5173_v57  ;;  %v5401_v57 = vpop.f32.mrf.mxu1 }
 0x190   :  { %v949_v17 = vpop.f32.mrf.mxu0 }
 0x191   :  { %v5391_v12 = vadd.f32 %v949_v17, %v620_v55  ;;  %v5410_v55 = vpop.f32.mrf.mxu1 }
 0x192   :  { %v953_v9 = vpop.f32.mrf.mxu0 }
 0x193   :  { %v5396_v63 = vadd.f32 %v953_v9, %v5181_v15  ;;  %v5418_v9 = vpop.f32.mrf.mxu1 }
 0x194   :  { %v955_v21 = vpop.f32.mrf.mxu0 }
 0x195   :  { %v5399_v60 = vadd.f32 %v955_v21, %v5184_v42 }
 0x196   :  { %v957_v62 = vpop.f32.mrf.mxu0 }
 0x197   :  { %6528 = vst [vmem:[#allocation41_spill] sm:$0xff] %v5399_v60  ;;  %v5406_v24 = vadd.f32 %v957_v62, %v5186_v56  ;;  %v4380_v56 = vld [vmem:[%s6479_s3 + $0x98] ss:$8 sps:$4 sm:$0xff]  }
 0x198   :  { %v959_v17 = vpop.f32.mrf.mxu0 }
 0x199   :  { %6529 = vst [vmem:[#allocation42_spill] sm:$0xff] %v5406_v24  ;;  %v5408_v51 = vadd.f32 %v959_v17, %v630_v14  ;;  %v5433_v14 = vpop.f32.mrf.mxu1 }
 0x19a   :  { %v963_v15 = vpop.f32.mrf.mxu0 }
 0x19b   :  { %6530 = vst [vmem:[#allocation43_spill] sm:$0xff] %v5408_v51  ;;  %v5413_v7 = vadd.f32 %v963_v15, %v5194_v19  ;;  %v4382_v19 = vld [vmem:[%s6479_s3 + $0x9c] ss:$8 sps:$4 sm:$0xff]  }
 0x19c   :  { %v965_v42 = vpop.f32.mrf.mxu0  ;;  %2302 = vmatprep.subr.bf16.mxu1 %v4382_v19 }
 0x19d   :  { %6531 = vst [vmem:[#allocation44_spill] sm:$0xff] %v5413_v7  ;;  %v5416_v21 = vadd.f32 %v965_v42, %v5197_v32  ;;  %2303 = vmatpush1.bf16.msra.mxu1 %v4380_v56  ;;  %v6537_v42 = vld [vmem:[#allocation19_spill] sm:$0xff] }
 0x19e   :  { %v967_v60 = vpop.f32.mrf.mxu0 }
 0x19f   :  { %6532 = vst [vmem:[#allocation45_spill] sm:$0xff] %v5416_v21  ;;  %v5423_v50 = vadd.f32 %v967_v60, %v5199_v49  ;;  %v5441_v60 = vpop.f32.mrf.mxu1  ;;  %v6549_v21 = vld [vmem:[#allocation24_spill] sm:$0xff] }
 0x1a0   :  { %v969_v62 = vpop.f32.mrf.mxu0 }
 0x1a1   :  { %6533 = vst [vmem:[#allocation46_spill] sm:$0xff] %v5423_v50  ;;  %v5431_v32 = vadd.f32 %v969_v62, %v640_v54  ;;  %v650_v50 = vadd.f32 %v6537_v42, %v5214_v40  ;;  %v6538_v54 = vld [vmem:[#allocation18_spill] sm:$0xff]  ;;  %v5450_v56 = vpop.f32.mrf.mxu1  ;;  %v4383_v40 = vld [vmem:[%s6479_s3 + $0x88] ss:$8 sps:$4 sm:$0xff]  }
 0x1a2   :  { %v973_v17 = vpop.f32.mrf.mxu0 }
 0x1a3   :  { %6534 = vst [vmem:[#allocation47_spill] sm:$0xff] %v5431_v32  ;;  %v5436_v5 = vadd.f32 %v973_v17, %v5207_v23 }
 0x1a4   :  { %v975_v6 = vpop.f32.mrf.mxu0 }
 0x1a5   :  { %6535 = vst [vmem:[#allocation48_spill] sm:$0xff] %v5436_v5  ;;  %v5439_v49 = vadd.f32 %v975_v6, %v5210_v10 }
 0x1a6   :  { %v977_v15 = vpop.f32.mrf.mxu0 }
 0x1a7   :  { %6536 = vst [vmem:[#allocation49_spill] sm:$0xff] %v5439_v49  ;;  %v5446_v62 = vadd.f32 %v977_v15, %v6538_v54  ;;  %v4385_v15 = vld [vmem:[%s6479_s3 + $0x8c] ss:$8 sps:$4 sm:$0xff]   ;;  %v6543_v54 = vld [vmem:[#allocation21_spill] sm:$0xff] }
 0x1a8   :  { %v979_v19 = vpop.f32.mrf.mxu0  ;;  %2304 = vmatprep.subr.bf16.mxu1 %v4385_v15 }
 0x1a9   :  { %6539 = vst [vmem:[#allocation19_spill] sm:$0xff] %v5446_v62  ;;  %v5448_v32 = vadd.f32 %v979_v19, %v650_v50  ;;  %v5464_v50 = vpop.f32.mrf.mxu1  ;;  %v6544_v19 = vld [vmem:[#allocation22_spill] sm:$0xff]  ;;  %2305 = vmatpush1.bf16.msra.mxu1 %v4383_v40  ;;  %v6548_v62 = vld [vmem:[#allocation23_spill] sm:$0xff] }
 0x1aa   :  { %v983_v23 = vpop.f32.mrf.mxu0 }
 0x1ab   :  { %6540 = vst [vmem:[#allocation18_spill] sm:$0xff] %v5448_v32  ;;  %v5453_v17 = vadd.f32 %v983_v23, %v5220_v27  ;;  %v660_v32 = vadd.f32 %v6544_v19, %v6543_v54  ;;  %v6545_v27 = vld [vmem:[#allocation20_spill] sm:$0xff]  ;;  %v6552_v19 = vld [vmem:[#allocation27_spill] sm:$0xff] }
 0x1ac   :  { %v985_v10 = vpop.f32.mrf.mxu0 }
 0x1ad   :  { %6541 = vst [vmem:[#allocation50_spill] sm:$0xff] %v5453_v17  ;;  %v5456_v6 = vadd.f32 %v985_v10, %v5223_v28 }
 0x1ae   :  { %v987_v42 = vpop.f32.mrf.mxu0 }
 0x1af   :  { %6542 = vst [vmem:[#allocation51_spill] sm:$0xff] %v5456_v6  ;;  %v5469_v23 = vadd.f32 %v987_v42, %v6545_v27  ;;  %v5473_v6 = vpop.f32.mrf.mxu1  ;;  %v6551_v42 = vld [vmem:[#allocation26_spill] sm:$0xff]  ;;  %v6553_v27 = vld [vmem:[#allocation25_spill] sm:$0xff] }
 0x1b0   :  { %v989_v28 = vpop.f32.mrf.mxu0  ;;  %v670_v15 = vadd.f32 %v6552_v19, %v6551_v42 }
 0x1b1   :  { %6546 = vst [vmem:[#allocation21_spill] sm:$0xff] %v5469_v23  ;;  %v5471_v10 = vadd.f32 %v989_v28, %v660_v32  ;;  %v5481_v51 = vpop.f32.mrf.mxu1  ;;  %v6554_v28 = vld [vmem:[#allocation4_spill] sm:$0xff] }
 0x1b2   :  { %v993_v17 = vpop.f32.mrf.mxu0 }
 0x1b3   :  { %6547 = vst [vmem:[#allocation22_spill] sm:$0xff] %v5471_v10  ;;  %v5476_v49 = vadd.f32 %v993_v17, %v6548_v62  ;;  %v6555_v10 = vld [vmem:[#allocation5_spill] sm:$0xff]  ;;  %v5492_v62 = vpop.f32.mrf.mxu1 }
 0x1b4   :  { %v995_v5 = vpop.f32.mrf.mxu0  ;;  %v540_v23 = vadd.f32 %v6555_v10, %v6554_v28  ;;  %v6557_v28 = vld [vmem:[#allocation6_spill] sm:$0xff] }
 0x1b5   :  { %v5479_v7 = vadd.f32 %v995_v5, %v6549_v21 }
 0x1b6   :  { %v997_v54 = vpop.f32.mrf.mxu0  ;;  %v1005_v21 = vadd.f32 %v5254_v34, %v540_v23 }
 0x1b7   :  { %6550 = vst [vmem:[#allocation20_spill] sm:$0xff] %v5479_v7  ;;  %v5486_v40 = vadd.f32 %v997_v54, %v6553_v27  ;;  %v5501_v54 = vpop.f32.mrf.mxu1 }
 0x1b8   :  { %v999_v32 = vpop.f32.mrf.mxu0  ;;  %v1391_v27 = vadd.f32 %v5284_v16, %v1005_v21  ;;  %v1393_v16 = vadd.f32 %v5302_v25, %v5265_v4  ;;  %v1394_v21 = vadd.f32 %v5309_v8, %v5268_v35  ;;  %v1396_v4 = vadd.f32 %v5324_v36, %v5275_v45  ;;  %v4386_v35 = vld [vmem:[%s6479_s3 + $0x78] ss:$8 sps:$4 sm:$0xff]   ;;  %v6559_v25 = vld [vmem:[#allocation8_spill] sm:$0xff] }
 0x1b9   :  { %v5490_v24 = vadd.f32 %v999_v32, %v670_v15  ;;  %v1392_v32 = vadd.f32 %v5292_v18, %v5261_v58  ;;  %v6560_v8 = vld [vmem:[#allocation9_spill] sm:$0xff] }
 0x1ba   :  { %v1635_v17 = vpop.f32.mrf.mxu0 }
 0x1bb   :  { %6556 = vst [vmem:[#allocation23_spill] sm:$0xff] %v5490_v24  ;;  %v5496_v5 = vadd.f32 %v1635_v17, %v5249_v52  ;;  %v5511_v52 = vpop.f32.mrf.mxu1 }
 0x1bc   :  { %v1637_v7 = vpop.f32.mrf.mxu0 }
 0x1bd   :  { %v5499_v42 = vadd.f32 %v1637_v7, %v5252_v3  ;;  %v6558_v3 = vld [vmem:[#allocation7_spill] sm:$0xff]  ;;  %v5524_v58 = vpop.f32.mrf.mxu1 }
 0x1be   :  { %v1639_v19 = vpop.f32.mrf.mxu0  ;;  %v550_v7 = vadd.f32 %v6558_v3, %v6557_v28 }
 0x1bf   :  { %v5505_v10 = vadd.f32 %v1639_v19, %v5256_v41 }
 0x1c0   :  { %v1641_v15 = vpop.f32.mrf.mxu0  ;;  %v1009_v41 = vadd.f32 %v5270_v39, %v550_v7  ;;  %v4388_v39 = vld [vmem:[%s6479_s3 + $0x7c] ss:$8 sps:$4 sm:$0xff]   ;;  %v1397_v7 = vadd.f32 %v5332_v59, %v5282_v31  ;;  %v4391_v59 = vld [vmem:[%s6479_s3 + $0x6c] ss:$8 sps:$4 sm:$0xff]  }
 0x1c1   :  { %v5509_v34 = vadd.f32 %v1641_v15, %v1391_v27  ;;  %2306 = vmatprep.subr.bf16.mxu1 %v4388_v39  ;;  %v4105_v31 = vld [vmem:[%s6479_s3 + $0x158] sm:$0x33]  ;;  %v6561_v39 = vld [vmem:[#allocation10_spill] sm:$0xff] }
 0x1c2   :  { %v1645_v23 = vpop.f32.mrf.mxu0  ;;  %2307 = vmatpush1.bf16.msra.mxu1 %v4386_v35  ;;  %v4389_v35 = vld [vmem:[%s6479_s3 + $0x68] ss:$8 sps:$4 sm:$0xff]  }
 0x1c3   :  { %v5515_v17 = vadd.f32 %v1645_v23, %v1392_v32  ;;  %v1395_v32 = vadd.f32 %v5317_v48, %v1009_v41  ;;  %v5542_v48 = vpop.f32.mrf.mxu1  ;;  %2308 = vmatprep.subr.bf16.mxu1 %v4391_v59  ;;  %v4402_v59 = vld [vmem:[%s6479_s3 + $0x13c] ss:$8 sps:$4 sm:$0xff]  }
 0x1c4   :  { %v1647_v24 = vpop.f32.mrf.mxu0 }
 0x1c5   :  { %1894 = vrot.lane.b32.xlu0 %v5515_v17, %s4505_s19  ;;  %v1779_v19 = vadd.f32 %v1647_v24, %v1393_v16  ;;  %v560_v24 = vadd.f32 %v6560_v8, %v6559_v25  ;;  %v1398_v16 = vadd.f32 %v5339_v53, %v5288_v33  ;;  %v5554_v41 = vpop.f32.mrf.mxu1  ;;  %v1400_v33 = vadd.f32 %v5354_v44, %v5296_v30  ;;  %v6562_v30 = vld [vmem:[#allocation11_spill] sm:$0xff] }
 0x1c6   :  { %v1649_v18 = vpop.f32.mrf.mxu0  ;;  %v4117_v53 = vcombine.high %v4105_v31, %v4105_v31  ;;  %v570_v44 = vadd.f32 %v6562_v30, %v6561_v39  ;;  %2309 = vmatpush1.bf16.msra.mxu1 %v4389_v35  ;;  %v6565_v35 = vld [vmem:[#allocation13_spill] sm:$0xff] }
 0x1c7   :  { %v5526_v27 = vadd.f32 %v1649_v18, %v1394_v21  ;;  %v1013_v28 = vadd.f32 %v5290_v22, %v560_v24 }
 0x1c8   :  { %v1651_v15 = vpop.f32.mrf.mxu0  ;;  %4118 = vmatprep.subr.msk.bf16.mxu0 %vm2289_vm1, %v4117_v53 }
 0x1c9   :  { %1898 = vrot.lane.b32.xlu1 %v5526_v27, %s4505_s19  ;;  %1896 = vrot.lane.b32.xlu0 %v1779_v19, %s4505_s19  ;;  %v1781_v45 = vadd.f32 %v1651_v15, %v1395_v32  ;;  %v1399_v22 = vadd.f32 %v5347_v20, %v1013_v28  ;;  %v4116_v32 = vcombine.low %v4105_v31, %v4105_v31  ;;  %v5570_v20 = vpop.f32.mrf.mxu1 }
 0x1ca   :  { %v1655_v23 = vpop.f32.mrf.mxu0  ;;  %v1017_v28 = vadd.f32 %v5307_v13, %v570_v44  ;;  %v4394_v13 = vld [vmem:[%s6479_s3 + $0x58] ss:$8 sps:$4 sm:$0xff]  }
 0x1cb   :  { %v5544_v36 = vadd.f32 %v1655_v23, %v1396_v4  ;;  %v2842_v24 = vsel %vm2289_vm1, %v4116_v32, 0  ;;  %v6566_v44 = vld [vmem:[#allocation29_spill] sm:$0xff] }
 0x1cc   :  { %v1657_v3 = vpop.f32.mrf.mxu0  ;;  %2852 = vmatpush1.bf16.msra.mxu0 %v2842_v24  ;;  %v1403_v31 = vadd.f32 %v5382_v1, %v1017_v28  ;;  %v6564_v1 = vld [vmem:[#allocation12_spill] sm:$0xff]  ;;  %v6567_v24 = vld [vmem:[#allocation31_spill] sm:$0xff] }
 0x1cd   :  { %1900 = vrot.lane.b32.xlu1 %v1781_v45, %s4505_s19  ;;  %1902 = vrot.lane.b32.xlu0 %v5544_v36, %s4505_s19  ;;  %v1783_v18 = vadd.f32 %v1657_v3, %v1397_v7  ;;  %v1401_v45 = vadd.f32 %v5362_v43, %v5300_v61  ;;  %v6563_v3 = vld [vmem:[#allocation28_spill] sm:$0xff]  ;;  %v580_v39 = vadd.f32 %v6565_v35, %v6564_v1 }
 0x1ce   :  { %v1659_v21 = vpop.f32.mrf.mxu0  ;;  %v1402_v7 = vadd.f32 %v5371_v26, %v6563_v3  ;;  %v4397_v26 = vld [vmem:[%s6479_s3 + $0x148] ss:$8 sps:$4 sm:$0xff]   ;;  %v4405_v3 = vld [vmem:[%s6479_s3 + $0x12c] ss:$8 sps:$4 sm:$0xff]  }
 0x1cf   :  { %v5556_v19 = vadd.f32 %v1659_v21, %v1398_v16  ;;  %v4396_v16 = vld [vmem:[%s6479_s3 + $0x5c] ss:$8 sps:$4 sm:$0xff]   ;;  %v4399_v21 = vld [vmem:[%s6479_s3 + $0x14c] ss:$8 sps:$4 sm:$0xff]  }
 0x1d0   :  { %v1661_v15 = vpop.f32.mrf.mxu0  ;;  %2310 = vmatprep.subr.bf16.mxu1 %v4396_v16  ;;  %2853 = vmatprep.subr.bf16.mxu0 %v4399_v21  ;;  %v6571_v1 = vld [vmem:[#allocation32_spill] sm:$0xff] }
 0x1d1   :  { %1904 = vrot.lane.b32.xlu1 %v1783_v18, %s4505_s19  ;;  %1906 = vrot.lane.b32.xlu0 %v5556_v19, %s4505_s19  ;;  %v1785_v25 = vadd.f32 %v1661_v15, %v1399_v22  ;;  %v5595_v18 = vpop.f32.mrf.mxu1  ;;  %v1409_v35 = vadd.f32 %v5441_v60, %v6571_v1  ;;  %v4409_v60 = vld [vmem:[%s6479_s3 + $0x108] ss:$8 sps:$4 sm:$0xff]  }
 0x1d2   :  { %v1665_v4 = vpop.f32.mrf.mxu0  ;;  %2311 = vmatpush1.bf16.msra.mxu1 %v4394_v13  ;;  %2854 = vmatpush1.bf16.msra.mxu0 %v4397_v26  ;;  %v1408_v26 = vadd.f32 %v5433_v14, %v5327_v2 }
 0x1d3   :  { %v5577_v8 = vadd.f32 %v1665_v4, %v1400_v33  ;;  %v1404_v33 = vadd.f32 %v5393_v47, %v5312_v46  ;;  %v5614_v53 = vpop.f32.mrf.mxu1  ;;  %v4400_v4 = vld [vmem:[%s6479_s3 + $0x138] ss:$8 sps:$4 sm:$0xff]   ;;  %2855 = vmatprep.subr.bf16.mxu0 %v4402_v59  ;;  %v6570_v59 = vld [vmem:[#allocation15_spill] sm:$0xff] }
 0x1d4   :  { %v1667_v23 = vpop.f32.mrf.mxu0 }
 0x1d5   :  { %1908 = vrot.lane.b32.xlu1 %v1785_v25, %s4505_s19  ;;  %1910 = vrot.lane.b32.xlu0 %v5577_v8, %s4505_s19  ;;  %v1787_v43 = vadd.f32 %v1667_v23, %v1401_v45  ;;  %v1405_v25 = vadd.f32 %v5401_v57, %v6566_v44  ;;  %v1021_v23 = vadd.f32 %v6567_v24, %v580_v39  ;;  %v6568_v45 = vld [vmem:[#allocation30_spill] sm:$0xff]  ;;  %v4403_v57 = vld [vmem:[%s6479_s3 + $0x128] ss:$8 sps:$4 sm:$0xff]  }
 0x1d6   :  { %v1669_v61 = vpop.f32.mrf.mxu0  ;;  %2856 = vmatpush1.bf16.msra.mxu0 %v4400_v4  ;;  %v1406_v28 = vadd.f32 %v5410_v55, %v6568_v45  ;;  %v6572_v39 = vld [vmem:[#allocation34_spill] sm:$0xff] }
 0x1d7   :  { %v5603_v22 = vadd.f32 %v1669_v61, %v1402_v7  ;;  %v5634_v7 = vpop.f32.mrf.mxu1  ;;  %2857 = vmatprep.subr.bf16.mxu0 %v4405_v3  ;;  %v1407_v13 = vadd.f32 %v5418_v9, %v1021_v23  ;;  %v6569_v9 = vld [vmem:[#allocation14_spill] sm:$0xff] }
 0x1d8   :  { %v1671_v15 = vpop.f32.mrf.mxu0 }
 0x1d9   :  { %1912 = vrot.lane.b32.xlu1 %v1787_v43, %s4505_s19  ;;  %1914 = vrot.lane.b32.xlu0 %v5603_v22, %s4505_s19  ;;  %v1789_v46 = vadd.f32 %v1671_v15, %v1403_v31  ;;  %v4408_v43 = vld [vmem:[%s6479_s3 + $0x11c] ss:$8 sps:$4 sm:$0xff]   ;;  %v5650_v15 = vpop.f32.mrf.mxu1 }
 0x1da   :  { %v1675_v32 = vpop.f32.mrf.mxu0  ;;  %2858 = vmatpush1.bf16.msra.mxu0 %v4403_v57 }
 0x1db   :  { %v5621_v47 = vadd.f32 %v1675_v32, %v1404_v33  ;;  %v4406_v33 = vld [vmem:[%s6479_s3 + $0x118] ss:$8 sps:$4 sm:$0xff]   ;;  %v590_v32 = vadd.f32 %v6570_v59, %v6569_v9  ;;  %2859 = vmatprep.subr.bf16.mxu0 %v4408_v43  ;;  %v5670_v24 = vpop.f32.mrf.mxu1  ;;  %v6576_v9 = vld [vmem:[#allocation35_spill] sm:$0xff] }
 0x1dc   :  { %v1677_v30 = vpop.f32.mrf.mxu0  ;;  %v6577_v59 = vld [vmem:[#allocation37_spill] sm:$0xff] }
 0x1dd   :  { %1916 = vrot.lane.b32.xlu1 %v1789_v46, %s4505_s19  ;;  %1918 = vrot.lane.b32.xlu0 %v5621_v47, %s4505_s19  ;;  %v1791_v21 = vadd.f32 %v1677_v30, %v1405_v25  ;;  %v1025_v46 = vadd.f32 %v6572_v39, %v590_v32  ;;  %v6573_v30 = vld [vmem:[#allocation33_spill] sm:$0xff]  ;;  %v4411_v25 = vld [vmem:[%s6479_s3 + $0x10c] ss:$8 sps:$4 sm:$0xff]   ;;  %v5683_v57 = vpop.f32.mrf.mxu1 }
 0x1de   :  { %v1679_v16 = vpop.f32.mrf.mxu0  ;;  %2860 = vmatpush1.bf16.msra.mxu0 %v4406_v33  ;;  %v1410_v44 = vadd.f32 %v5450_v56, %v6573_v30 }
 0x1df   :  { %v5639_v61 = vadd.f32 %v1679_v16, %v1406_v28  ;;  %2861 = vmatprep.subr.bf16.mxu0 %v4411_v25  ;;  %v1411_v3 = vadd.f32 %v5464_v50, %v1025_v46  ;;  %v1412_v16 = vadd.f32 %v5473_v6, %v5342_v37  ;;  %v1413_v50 = vadd.f32 %v5481_v51, %v6576_v9  ;;  %v6578_v6 = vld [vmem:[#allocation36_spill] sm:$0xff] }
 0x1e0   :  { %v1681_v55 = vpop.f32.mrf.mxu0  ;;  %v1414_v32 = vadd.f32 %v5492_v62, %v6578_v6  ;;  %v1416_v51 = vadd.f32 %v5511_v52, %v5357_v0  ;;  %v1423_v6 = vadd.f32 %v5634_v7, %v5391_v12 }
 0x1e1   :  { %1920 = vrot.lane.b32.xlu1 %v1791_v21, %s4505_s19  ;;  %1922 = vrot.lane.b32.xlu0 %v5639_v61, %s4505_s19  ;;  %v1793_v2 = vadd.f32 %v1681_v55, %v1407_v13  ;;  %v6574_v55 = vld [vmem:[#allocation16_spill] sm:$0xff]  ;;  %v6575_v13 = vld [vmem:[#allocation17_spill] sm:$0xff] }
 0x1e2   :  { %v1685_v31 = vpop.f32.mrf.mxu0  ;;  %2862 = vmatpush1.bf16.msra.mxu0 %v4409_v60  ;;  %v1417_v60 = vadd.f32 %v5524_v58, %v5360_v29 }
 0x1e3   :  { %v5657_v14 = vadd.f32 %v1685_v31, %v1408_v26  ;;  %v600_v26 = vadd.f32 %v6575_v13, %v6574_v55  ;;  %v6580_v55 = vld [vmem:[#allocation39_spill] sm:$0xff] }
 0x1e4   :  { %v1687_v4 = vpop.f32.mrf.mxu0  ;;  %v1420_v29 = vadd.f32 %v5570_v20, %v6580_v55 }
 0x1e5   :  { %1924 = vrot.lane.b32.xlu1 %v1793_v2, %s4505_s19  ;;  %1926 = vrot.lane.b32.xlu0 %v5657_v14, %s4505_s19  ;;  %v1795_v45 = vadd.f32 %v1687_v4, %v1409_v35  ;;  %v1029_v37 = vadd.f32 %v6577_v59, %v600_v26  ;;  %v1345_v2 = vpop.f32.mrf.mxu1 }
 0x1e6   :  { %v1689_v23 = vpop.f32.mrf.mxu0 }
 0x1e7   :  { %v5675_v28 = vadd.f32 %v1689_v23, %v1410_v44  ;;  %v1415_v46 = vadd.f32 %v5501_v54, %v1029_v37  ;;  %v1349_v62 = vpop.f32.mrf.mxu1  ;;  %v1418_v54 = vadd.f32 %v5542_v48, %v5367_v38 }
 0x1e8   :  { %v1691_v56 = vpop.f32.mrf.mxu0 }
 0x1e9   :  { %1928 = vrot.lane.b32.xlu1 %v1795_v45, %s4505_s19  ;;  %1930 = vrot.lane.b32.xlu0 %v5675_v28, %s4505_s19  ;;  %v1797_v43 = vadd.f32 %v1691_v56, %v1411_v3  ;;  %v1351_v0 = vpop.f32.mrf.mxu1 }
 0x1ea   :  { %v1695_v21 = vpop.f32.mrf.mxu0 }
 0x1eb   :  { %v5687_v31 = vadd.f32 %v1695_v21, %v1412_v16  ;;  %v6579_v16 = vld [vmem:[#allocation38_spill] sm:$0xff]  ;;  %v1353_v38 = vpop.f32.mrf.mxu1 }
 0x1ec   :  { %v1697_v33 = vpop.f32.mrf.mxu0  ;;  %v1419_v21 = vadd.f32 %v5554_v41, %v6579_v16  ;;  %v1422_v41 = vadd.f32 %v5614_v53, %v5387_v11  ;;  %v5744_v11 = vld [vmem:[%s6479_s3 + $0x50] sm:$0x33] }
 0x1ed   :  { %1932 = vrot.lane.b32.xlu1 %v1797_v43, %s4505_s19  ;;  %1934 = vrot.lane.b32.xlu0 %v5687_v31, %s4505_s19  ;;  %v1799_v1 = vadd.f32 %v1697_v33, %v1413_v50  ;;  %v6581_v43 = vld [vmem:[#allocation40_spill] sm:$0xff]  ;;  %v1355_v20 = vpop.f32.mrf.mxu1 }
 0x1ee   :  { %v1699_v4 = vpop.f32.mrf.mxu0  ;;  %v1421_v33 = vadd.f32 %v5595_v18, %v6581_v43  ;;  %v1424_v18 = vadd.f32 %v5650_v15, %v5396_v63  ;;  %v6582_v63 = vld [vmem:[#allocation41_spill] sm:$0xff] }
 0x1ef   :  { %v5697_v35 = vadd.f32 %v1699_v4, %v1414_v32  ;;  %v1359_v53 = vpop.f32.mrf.mxu1  ;;  %v4059_v4 = vcombine.high %v5744_v11, %v5744_v11  ;;  %v1425_v15 = vadd.f32 %v5670_v24, %v6582_v63 }
 0x1f0   :  { %v1701_v39 = vpop.f32.mrf.mxu0 }
 0x1f1   :  { %1936 = vrot.lane.b32.xlu1 %v1799_v1, %s4505_s19  ;;  %1938 = vrot.lane.b32.xlu0 %v5697_v35, %s4505_s19  ;;  %v1801_v44 = vadd.f32 %v1701_v39, %v1415_v46  ;;  %v6583_v39 = vld [vmem:[#allocation42_spill] sm:$0xff] }
 0x1f2   :  { %v1705_v30 = vpop.f32.mrf.mxu0  ;;  %4060 = vmatprep.subr.msk.bf16.mxu1 %vm2289_vm1, %v4059_v4  ;;  %v1426_v46 = vadd.f32 %v5683_v57, %v6583_v39 }
 0x1f3   :  { %v5705_v25 = vadd.f32 %v1705_v30, %v1416_v51  ;;  %v1361_v51 = vpop.f32.mrf.mxu1 }
 0x1f4   :  { %v1707_v23 = vpop.f32.mrf.mxu0 }
 0x1f5   :  { %1940 = vrot.lane.b32.xlu1 %v1801_v44, %s4505_s19  ;;  %1942 = vrot.lane.b32.xlu0 %v5705_v25, %s4505_s19  ;;  %v1803_v45 = vadd.f32 %v1707_v23, %v1417_v60  ;;  %v1363_v24 = vpop.f32.mrf.mxu1 }
 0x1f6   :  { %v1709_v52 = vpop.f32.mrf.mxu0 }
 0x1f7   :  { %v5714_v56 = vadd.f32 %v1709_v52, %v1418_v54  ;;  %v6584_v54 = vld [vmem:[#allocation43_spill] sm:$0xff] }
 0x1f8   :  { %v1711_v3 = vpop.f32.mrf.mxu0  ;;  %v1427_v52 = vadd.f32 %v1345_v2, %v6584_v54  ;;  %v1365_v2 = vpop.f32.mrf.mxu1 }
 0x1f9   :  { %1944 = vrot.lane.b32.xlu1 %v1803_v45, %s4505_s19  ;;  %1946 = vrot.lane.b32.xlu0 %v5714_v56, %s4505_s19  ;;  %v1805_v48 = vadd.f32 %v1711_v3, %v1419_v21  ;;  %v6585_v45 = vld [vmem:[#allocation44_spill] sm:$0xff] }
 0x1fa   :  { %v1715_v58 = vpop.f32.mrf.mxu0  ;;  %v1428_v3 = vadd.f32 %v1349_v62, %v6585_v45 }
 0x1fb   :  { %v5723_v13 = vadd.f32 %v1715_v58, %v1420_v29  ;;  %v6586_v29 = vld [vmem:[#allocation45_spill] sm:$0xff] }
 0x1fc   :  { %v1717_v26 = vpop.f32.mrf.mxu0  ;;  %v1429_v58 = vadd.f32 %v1351_v0, %v6586_v29  ;;  %v1369_v0 = vpop.f32.mrf.mxu1 }
 0x1fd   :  { %1948 = vrot.lane.b32.xlu1 %v1805_v48, %s4505_s19  ;;  %1950 = vrot.lane.b32.xlu0 %v5723_v13, %s4505_s19  ;;  %v1807_v50 = vadd.f32 %v1717_v26, %v1421_v33  ;;  %v6587_v48 = vld [vmem:[#allocation46_spill] sm:$0xff] }
 0x1fe   :  { %v1719_v9 = vpop.f32.mrf.mxu0  ;;  %v1430_v26 = vadd.f32 %v1353_v38, %v6587_v48 }
 0x1ff   :  { %v5732_v59 = vadd.f32 %v1719_v9, %v1422_v41  ;;  %v6588_v9 = vld [vmem:[#allocation47_spill] sm:$0xff] }
 0x200   :  { %v1721_v37 = vpop.f32.mrf.mxu0 }
 0x201   :  { %1952 = vrot.lane.b32.xlu1 %v1807_v50, %s4505_s19  ;;  %1954 = vrot.lane.b32.xlu0 %v5732_v59, %s4505_s19  ;;  %v1809_v1 = vadd.f32 %v1721_v37, %v1423_v6  ;;  %v1431_v50 = vadd.f32 %v1355_v20, %v6588_v9 }
 0x202   :  { %v1725_v32 = vpop.f32.mrf.mxu0 }
 0x203   :  { %v5748_v12 = vadd.f32 %v1725_v32, %v1424_v18  ;;  %v1371_v18 = vpop.f32.mrf.mxu1 }
 0x204   :  { %v1727_v7 = vpop.f32.mrf.mxu0 }
 0x205   :  { %1956 = vrot.lane.b32.xlu1 %v1809_v1, %s4505_s19  ;;  %1958 = vrot.lane.b32.xlu0 %v5748_v12, %s4505_s19  ;;  %v1811_v44 = vadd.f32 %v1727_v7, %v1425_v15  ;;  %v6589_v1 = vld [vmem:[#allocation48_spill] sm:$0xff]  ;;  %v1373_v20 = vpop.f32.mrf.mxu1 }
 0x206   :  { %v1729_v30 = vpop.f32.mrf.mxu0  ;;  %v1432_v7 = vadd.f32 %v1359_v53, %v6589_v1 }
 0x207   :  { %v5758_v23 = vadd.f32 %v1729_v30, %v1426_v46  ;;  %v6590_v46 = vld [vmem:[#allocation49_spill] sm:$0xff]  ;;  %v1375_v53 = vpop.f32.mrf.mxu1 }
 0x208   :  { %v1731_v60 = vpop.f32.mrf.mxu0  ;;  %v1433_v30 = vadd.f32 %v1361_v51, %v6590_v46  ;;  %v6598_v46 = vld [vmem:[#allocation23_spill] sm:$0xff] }
 0x209   :  { %1960 = vrot.lane.b32.xlu1 %v1811_v44, %s4505_s19  ;;  %1962 = vrot.lane.b32.xlu0 %v5758_v23, %s4505_s19  ;;  %v1813_v16 = vadd.f32 %v1731_v60, %v1427_v52  ;;  %v6591_v44 = vld [vmem:[#allocation19_spill] sm:$0xff]  ;;  %v1379_v51 = vpop.f32.mrf.mxu1 }
 0x20a   :  { %v1735_v57 = vpop.f32.mrf.mxu0  ;;  %v1434_v60 = vadd.f32 %v1363_v24, %v6591_v44 }
 0x20b   :  { %v5765_v21 = vadd.f32 %v1735_v57, %v1428_v3  ;;  %v6592_v3 = vld [vmem:[#allocation18_spill] sm:$0xff] }
 0x20c   :  { %v1737_v55 = vpop.f32.mrf.mxu0  ;;  %v1435_v57 = vadd.f32 %v1365_v2, %v6592_v3  ;;  %v1381_v2 = vpop.f32.mrf.mxu1 }
 0x20d   :  { %1964 = vrot.lane.b32.xlu1 %v1813_v16, %s4505_s19  ;;  %1966 = vrot.lane.b32.xlu0 %v5765_v21, %s4505_s19  ;;  %v1815_v43 = vadd.f32 %v1737_v55, %v1429_v58  ;;  %v6593_v16 = vld [vmem:[#allocation50_spill] sm:$0xff]  ;;  %v6594_v58 = vld [vmem:[#allocation51_spill] sm:$0xff] }
 0x20e   :  { %v1739_v62 = vpop.f32.mrf.mxu0  ;;  %v1436_v55 = vadd.f32 %v1369_v0, %v6593_v16  ;;  %v1437_v48 = vadd.f32 %v1371_v18, %v6594_v58 }
 0x20f   :  { %v5772_v33 = vadd.f32 %v1739_v62, %v1430_v26  ;;  %v6595_v26 = vld [vmem:[#allocation21_spill] sm:$0xff] }
 0x210   :  { %v1741_v41 = vpop.f32.mrf.mxu0  ;;  %v1438_v62 = vadd.f32 %v1373_v20, %v6595_v26 }
 0x211   :  { %1968 = vrot.lane.b32.xlu1 %v1815_v43, %s4505_s19  ;;  %1970 = vrot.lane.b32.xlu0 %v5772_v33, %s4505_s19  ;;  %v1817_v37 = vadd.f32 %v1741_v41, %v1431_v50  ;;  %v6596_v50 = vld [vmem:[#allocation22_spill] sm:$0xff] }
 0x212   :  { %v1745_v38 = vpop.f32.mrf.mxu0  ;;  %v1439_v0 = vadd.f32 %v1375_v53, %v6596_v50 }
 0x213   :  { %v5786_v15 = vadd.f32 %v1745_v38, %v1432_v7  ;;  %v1440_v38 = vadd.f32 %v1379_v51, %v5476_v49 }
 0x214   :  { %v1747_v6 = vpop.f32.mrf.mxu0 }
 0x215   :  { %1972 = vrot.lane.b32.xlu1 %v1817_v37, %s4505_s19  ;;  %1886 = vrot.lane.b32.xlu0 %v5496_v5, %s4505_s19  ;;  %v1819_v54 = vadd.f32 %v1747_v6, %v1433_v30  ;;  %v1383_v37 = vpop.f32.mrf.mxu1 }
 0x216   :  { %v1749_v32 = vpop.f32.mrf.mxu0  ;;  %v1442_v7 = vadd.f32 %v1383_v37, %v5486_v40 }
 0x217   :  { %v5794_v52 = vadd.f32 %v1749_v32, %v1434_v60  ;;  %v1385_v49 = vpop.f32.mrf.mxu1 }
 0x218   :  { %v1751_v4 = vpop.f32.mrf.mxu0  ;;  %v1443_v30 = vadd.f32 %v1385_v49, %v6598_v46 }
 0x219   :  { %1888 = vrot.lane.b32.xlu1 %v5499_v42, %s4505_s19  ;;  %1890 = vrot.lane.b32.xlu0 %v5505_v10, %s4505_s19 }
 0x21a   :  { %v1755_v63 = vpop.f32.mrf.mxu0 }
 0x21b   :  { %v5801_v24 = vadd.f32 %v1755_v63, %v1436_v55 }
 0x21c   :  { %v1757_v39 = vpop.f32.mrf.mxu0 }
 0x21d   :  { %1892 = vrot.lane.b32.xlu1 %v5509_v34, %s4505_s19  ;;  %1974 = vrot.lane.b32.xlu0 %v5786_v15, %s4505_s19  ;;  %v1821_v34 = vadd.f32 %v1751_v4, %v1435_v57  ;;  %v1823_v43 = vadd.f32 %v1757_v39, %v1437_v48  ;;  %v6597_v4 = vld [vmem:[#allocation20_spill] sm:$0xff] }
 0x21e   :  { %v1759_v42 = vpop.f32.mrf.mxu0  ;;  %v1441_v1 = vadd.f32 %v1381_v2, %v6597_v4 }
 0x21f   :  { %v5808_v41 = vadd.f32 %v1759_v42, %v1438_v62 }
 0x220   :  { %v1761_v45 = vpop.f32.mrf.mxu0 }
 0x221   :  { %1976 = vrot.lane.b32.xlu1 %v1819_v54, %s4505_s19  ;;  %1978 = vrot.lane.b32.xlu0 %v5794_v52, %s4505_s19  ;;  %v1825_v6 = vadd.f32 %v1761_v45, %v1439_v0  ;;  %v5834_v45 = vld [vmem:[%s6480_s2] ss:$0 sm:$0xff] }
 0x222   :  { %v1765_v29 = vpop.f32.mrf.mxu0 }
 0x223   :  { %v5815_v18 = vadd.f32 %v1765_v29, %v1440_v38 }
 0x224   :  { %v1767_v9 = vpop.f32.mrf.mxu0 }
 0x225   :  { %1980 = vrot.lane.b32.xlu1 %v1821_v34, %s4505_s19  ;;  %1982 = vrot.lane.b32.xlu0 %v5801_v24, %s4505_s19  ;;  %v1827_v20 = vadd.f32 %v1767_v9, %v1441_v1 }
 0x226   :  { %v1769_v32 = vpop.f32.mrf.mxu0 }
 0x227   :  { %v5822_v63 = vadd.f32 %v1769_v32, %v1442_v7 }
 0x228   :  { %v1771_v39 = vpop.f32.mrf.mxu0 }
 0x229   :  { %1984 = vrot.lane.b32.xlu1 %v1823_v43, %s4505_s19  ;;  %1986 = vrot.lane.b32.xlu0 %v5808_v41, %s4505_s19  ;;  %v1829_v44 = vadd.f32 %v1771_v39, %v1443_v30 }
 0x22d   :  { %1988 = vrot.lane.b32.xlu1 %v1825_v6, %s4505_s19  ;;  %1990 = vrot.lane.b32.xlu0 %v5815_v18, %s4505_s19 }
 0x231   :  { %1992 = vrot.lane.b32.xlu1 %v1827_v20, %s4505_s19  ;;  %1994 = vrot.lane.b32.xlu0 %v5822_v63, %s4505_s19 }
 0x235   :  { %1996 = vrot.lane.b32.xlu1 %v1829_v44, %s4505_s19 }
 0x237   :  { %v1895_v40 = vpop.permute.xlu0 %1894 }
 0x23b   :  { %v1899_v60 = vpop.permute.xlu1 %1898  ;;  %v1897_v53 = vpop.permute.xlu0 %1896 }
 0x23c   :  { %v2001_v42 = vsel %vm1998_vm2, %v1895_v40, %v1897_v53 }
 0x23d   :  { %v2057_v54 = vmax.f32 %v5515_v17, %v2001_v42 }
 0x23f   :  { %v1901_v3 = vpop.permute.xlu1 %1900  ;;  %v1903_v57 = vpop.permute.xlu0 %1902  ;;  %v2092_v55 = vadd.f32 %v5834_v45, %v2057_v54  ;;  %v4058_v54 = vcombine.low %v5744_v11, %v5744_v11  ;;  %v4416_v11 = vld [vmem:[%s6479_s3 + $0x44] ss:$8 sps:$4 sm:$0xff]  }
 0x240   :  { %v2002_v16 = vsel %vm1998_vm2, %v1899_v60, %v1901_v3 }
 0x241   :  { %v2058_v51 = vmax.f32 %v5526_v27, %v2002_v16  ;;  %v2120_v17 = vmax.f32 %v2092_v55, 0.0 }
 0x243   :  { %v2093_v34 = vadd.f32 %v5834_v45, %v2058_v51  ;;  %v1905_v29 = vpop.permute.xlu1 %1904  ;;  %v1907_v58 = vpop.permute.xlu0 %1906 }
 0x244   :  { %v2003_v48 = vsel %vm1998_vm2, %v1903_v57, %v1905_v29 }
 0x245   :  { %v2121_v26 = vmax.f32 %v2093_v34, 0.0  ;;  %v2059_v62 = vmax.f32 %v5544_v36, %v2003_v48 }
 0x247   :  { %v2149_v2 = vmax.f32 %v2120_v17, %v2121_v26  ;;  %v1909_v43 = vpop.permute.xlu1 %1908  ;;  %v1911_v9 = vpop.permute.xlu0 %1910  ;;  %v2094_v27 = vadd.f32 %v5834_v45, %v2059_v62 }
 0x248   :  { %v2004_v50 = vsel %vm1998_vm2, %v1907_v58, %v1909_v43 }
 0x249   :  { %2150 = vst.msk [vmem:[#allocation2 + $0x8] sm:$0xff] %vm2147_vm3, %v2149_v2  ;;  %v2060_v0 = vmax.f32 %v5556_v19, %v2004_v50  ;;  %v2122_v4 = vmax.f32 %v2094_v27, 0.0  ;;  %v6599_v2 = vmov 0   ;;  %v4419_v27 = vld [vmem:[%s6479_s3 + $0x34] ss:$8 sps:$4 sm:$0xff]  }
 0x24b   :  { %v2095_v38 = vadd.f32 %v5834_v45, %v2060_v0  ;;  %v1913_v37 = vpop.permute.xlu1 %1912  ;;  %v1915_v6 = vpop.permute.xlu0 %1914 }
 0x24c   :  { %v2005_v32 = vsel %vm1998_vm2, %v1911_v9, %v1913_v37 }
 0x24d   :  { %v2123_v36 = vmax.f32 %v2095_v38, 0.0  ;;  %v2061_v1 = vmax.f32 %v5577_v8, %v2005_v32 }
 0x24f   :  { %v2151_v7 = vmax.f32 %v2122_v4, %v2123_v36  ;;  %v1917_v49 = vpop.permute.xlu1 %1916  ;;  %v1919_v20 = vpop.permute.xlu0 %1918  ;;  %v2096_v46 = vadd.f32 %v5834_v45, %v2061_v1  ;;  %v4417_v4 = vld [vmem:[%s6479_s3 + $0x30] ss:$8 sps:$4 sm:$0xff]   ;;  %v4422_v1 = vld [vmem:[%s6479_s3 + $0x24] ss:$8 sps:$4 sm:$0xff]  }
 0x250   :  { %v2006_v39 = vsel %vm1998_vm2, %v1915_v6, %v1917_v49  ;;  %v5859_v51 = vld [vmem:[#allocation2 + $0x8] sm:$0xff] }
 0x251   :  { %2152 = vst.msk [vmem:[#allocation2 + $0x10] sm:$0xff] %vm2147_vm3, %v2151_v7  ;;  %v2062_v19 = vmax.f32 %v5603_v22, %v2006_v39  ;;  %v2124_v53 = vmax.f32 %v2096_v46, 0.0 }
 0x253   :  { %v2097_v30 = vadd.f32 %v5834_v45, %v2062_v19  ;;  %v1921_v44 = vpop.permute.xlu1 %1920  ;;  %v1923_v40 = vpop.permute.xlu0 %1922  ;;  %v4420_v19 = vld [vmem:[%s6479_s3 + $0x20] ss:$8 sps:$4 sm:$0xff]  }
 0x254   :  { %v2007_v60 = vsel %vm1998_vm2, %v1919_v20, %v1921_v44 }
 0x255   :  { %v2125_v42 = vmax.f32 %v2097_v30, 0.0  ;;  %v2063_v8 = vmax.f32 %v5621_v47, %v2007_v60  ;;  %v2450_v47 = vsel %vm2289_vm1, %v4058_v54, 0 }
 0x257   :  { %v2153_v3 = vmax.f32 %v2124_v53, %v2125_v42  ;;  %v1925_v57 = vpop.permute.xlu1 %1924  ;;  %v1927_v16 = vpop.permute.xlu0 %1926  ;;  %v2098_v34 = vadd.f32 %v5834_v45, %v2063_v8 }
 0x258   :  { %v2008_v55 = vsel %vm1998_vm2, %v1923_v40, %v1925_v57  ;;  %v2177_v22 = vld [vmem:[#allocation2 + $0x10] sm:$0xff] }
 0x259   :  { %2154 = vst.msk [vmem:[#allocation2 + $0x18] sm:$0xff] %vm2147_vm3, %v2153_v3  ;;  %v2064_v29 = vmax.f32 %v5639_v61, %v2008_v55  ;;  %v2202_v58 = vpack.c.bf16 %v2177_v22, %v5859_v51  ;;  %v4414_v61 = vld [vmem:[%s6479_s3 + $0x40] ss:$8 sps:$4 sm:$0xff]   ;;  %v2126_v43 = vmax.f32 %v2098_v34, 0.0  ;;  %v4425_v40 = vld [vmem:[%s6479_s3 + $0x14] ss:$8 sps:$4 sm:$0xff]  }
 0x25a   :  { %v4428_v55 = vld [vmem:[%s6479_s3 + $0x4] ss:$8 sps:$4 sm:$0xff]  }
 0x25b   :  { %v2099_v48 = vadd.f32 %v5834_v45, %v2064_v29  ;;  %v1929_v17 = vpop.permute.xlu1 %1928  ;;  %4043 = vmatmul.mubr.msk.bf16.vlgmr.msra.gmra.mxu1 %vm2147_vm3, %v2202_v58  ;;  %v1931_v26 = vpop.permute.xlu0 %1930 }
 0x25c   :  { %v2009_v62 = vsel %vm1998_vm2, %v1927_v16, %v1929_v17  ;;  %2338 = vmatprep.mubr.bf16.mxu1 %v6599_v2  ;;  %2460 = vmatpush1.bf16.msra.mxu1 %v2450_v47  ;;  %v4423_v16 = vld [vmem:[%s6479_s3 + $0x10] ss:$8 sps:$4 sm:$0xff]   ;;  %v4426_v17 = vld [vmem:[%s6479_s3] ss:$8 sps:$4 sm:$0xff]  }
 0x25d   :  { %v2127_v9 = vmax.f32 %v2099_v48, 0.0  ;;  %v2065_v50 = vmax.f32 %v5657_v14, %v2009_v62  ;;  %2461 = vmatprep.subr.bf16.mxu1 %v4416_v11 }
 0x25f   :  { %v2155_v0 = vmax.f32 %v2126_v43, %v2127_v9  ;;  %v1933_v38 = vpop.permute.xlu1 %1932  ;;  %v1935_v37 = vpop.permute.xlu0 %1934  ;;  %v2100_v14 = vadd.f32 %v5834_v45, %v2065_v50 }
 0x260   :  { %v2010_v6 = vsel %vm1998_vm2, %v1931_v26, %v1933_v38  ;;  %v2178_v32 = vld [vmem:[#allocation2 + $0x18] sm:$0xff]  ;;  %2462 = vmatpush1.bf16.msra.mxu1 %v4414_v61 }
 0x261   :  { %2156 = vst.msk [vmem:[#allocation2 + $0x20] sm:$0xff] %vm2147_vm3, %v2155_v0  ;;  %v2066_v36 = vmax.f32 %v5675_v28, %v2010_v6  ;;  %2463 = vmatprep.subr.bf16.mxu1 %v4419_v27  ;;  %v5890_v7 = vpack.c.bf16 %v2178_v32, %v2177_v22  ;;  %v2128_v30 = vmax.f32 %v2100_v14, 0.0 }
 0x263   :  { %v2101_v49 = vadd.f32 %v5834_v45, %v2066_v36  ;;  %v1937_v20 = vpop.permute.xlu1 %1936  ;;  %v1939_v39 = vpop.permute.xlu0 %1938 }
 0x264   :  { %v2011_v46 = vsel %vm1998_vm2, %v1935_v37, %v1937_v20  ;;  %2464 = vmatpush1.bf16.msra.mxu1 %v4417_v4 }
 0x265   :  { %v2129_v28 = vmax.f32 %v2101_v49, 0.0  ;;  %v2067_v44 = vmax.f32 %v5687_v31, %v2011_v46  ;;  %2465 = vmatprep.subr.bf16.mxu1 %v4422_v1 }
 0x267   :  { %v2157_v60 = vmax.f32 %v2128_v30, %v2129_v28  ;;  %v1941_v53 = vpop.permute.xlu1 %1940  ;;  %v1943_v42 = vpop.permute.xlu0 %1942  ;;  %v2102_v3 = vadd.f32 %v5834_v45, %v2067_v44 }
 0x268   :  { %v2012_v8 = vsel %vm1998_vm2, %v1939_v39, %v1941_v53  ;;  %v5902_v54 = vld [vmem:[#allocation2 + $0x20] sm:$0xff]  ;;  %2466 = vmatpush1.bf16.msra.mxu1 %v4420_v19 }
 0x269   :  { %2158 = vst.msk [vmem:[#allocation2 + $0x28] sm:$0xff] %vm2147_vm3, %v2157_v60  ;;  %v2068_v57 = vmax.f32 %v5697_v35, %v2012_v8  ;;  %v2203_v31 = vpack.c.bf16 %v5902_v54, %v2178_v32  ;;  %2467 = vmatprep.subr.bf16.mxu1 %v4425_v40  ;;  %v5920_v35 = vld [vmem:[%s6479_s3 + $0x100] sm:$0x33]  ;;  %v2130_v47 = vmax.f32 %v2102_v3, 0.0 }
 0x26a   :  { %v4088_v26 = vcombine.high %v5920_v35, %v5920_v35 }
 0x26b   :  { %v2103_v22 = vadd.f32 %v5834_v45, %v2068_v57  ;;  %v1945_v34 = vpop.permute.xlu1 %1944  ;;  %4044 = vmatmul.mubr.msk.bf16.gmra.mxu1 %vm2147_vm3, %v2203_v31  ;;  %4119 = vmatmul.mubr.msk.bf16.vlgmr.msra.gmra.mxu0 %vm2147_vm3, %v2203_v31  ;;  %v1947_v29 = vpop.permute.xlu0 %1946 }
 0x26c   :  { %v2013_v58 = vsel %vm1998_vm2, %v1943_v42, %v1945_v34  ;;  %2348 = vmatprep.mubr.bf16.mxu1 %v6599_v2  ;;  %2889 = vmatprep.mubr.bf16.mxu0 %v6599_v2 }
 0x26d   :  { %v2131_v11 = vmax.f32 %v2103_v22, 0.0  ;;  %v2069_v48 = vmax.f32 %v5705_v25, %v2013_v58  ;;  %2468 = vmatpush1.bf16.msra.mxu1 %v4423_v16 }
 0x26e   :  { %2469 = vmatprep.subr.bf16.mxu1 %v4428_v55 }
 0x26f   :  { %v2159_v62 = vmax.f32 %v2130_v47, %v2131_v11  ;;  %v1949_v61 = vpop.permute.xlu1 %1948  ;;  %v1951_v43 = vpop.permute.xlu0 %1950  ;;  %v2104_v50 = vadd.f32 %v5834_v45, %v2069_v48 }
 0x270   :  { %v2014_v9 = vsel %vm1998_vm2, %v1947_v29, %v1949_v61  ;;  %v5940_v20 = vld [vmem:[#allocation2 + $0x28] sm:$0xff] }
 0x271   :  { %2160 = vst.msk [vmem:[#allocation2 + $0x30] sm:$0xff] %vm2147_vm3, %v2159_v62  ;;  %v2070_v25 = vmax.f32 %v5714_v56, %v2014_v9  ;;  %2470 = vmatpush1.bf16.msra.mxu1 %v4426_v17  ;;  %v2132_v6 = vmax.f32 %v2104_v50, 0.0 }
 0x272   :  { %4089 = vmatprep.subr.msk.bf16.mxu1 %vm2289_vm1, %v4088_v26 }
 0x273   :  { %v2105_v27 = vadd.f32 %v5834_v45, %v2070_v25  ;;  %v1953_v0 = vpop.permute.xlu1 %1952  ;;  %v1955_v38 = vpop.permute.xlu0 %1954 }
 0x274   :  { %v2015_v37 = vsel %vm1998_vm2, %v1951_v43, %v1953_v0 }
 0x275   :  { %v2133_v32 = vmax.f32 %v2105_v27, 0.0  ;;  %v2071_v4 = vmax.f32 %v5723_v13, %v2015_v37 }
 0x277   :  { %v2161_v14 = vmax.f32 %v2132_v6, %v2133_v32  ;;  %v1957_v36 = vpop.permute.xlu1 %1956  ;;  %v1959_v1 = vpop.permute.xlu0 %1958  ;;  %v2106_v39 = vadd.f32 %v5834_v45, %v2071_v4 }
 0x278   :  { %v2016_v49 = vsel %vm1998_vm2, %v1955_v38, %v1957_v36  ;;  %v5942_v56 = vld [vmem:[#allocation2 + $0x30] sm:$0xff] }
 0x279   :  { %2162 = vst.msk [vmem:[#allocation2 + $0x38] sm:$0xff] %vm2147_vm3, %v2161_v14  ;;  %v2072_v46 = vmax.f32 %v5732_v59, %v2016_v49  ;;  %v2204_v19 = vpack.c.bf16 %v5942_v56, %v5940_v20  ;;  %v2134_v40 = vmax.f32 %v2106_v39, 0.0 }
 0x27b   :  { %v2107_v13 = vadd.f32 %v5834_v45, %v2072_v46  ;;  %v1961_v30 = vpop.permute.xlu1 %1960  ;;  %4045 = vmatmul.mubr.msk.bf16.gmra.mxu1 %vm2147_vm3, %v2204_v19  ;;  %4120 = vmatmul.mubr.msk.bf16.gmra.mxu0 %vm2147_vm3, %v2204_v19  ;;  %v1963_v28 = vpop.permute.xlu0 %1962 }
 0x27c   :  { %v2017_v44 = vsel %vm1998_vm2, %v1959_v1, %v1961_v30  ;;  %2358 = vmatprep.mubr.bf16.mxu1 %v6599_v2  ;;  %2899 = vmatprep.mubr.bf16.mxu0 %v6599_v2 }
 0x27d   :  { %v2135_v60 = vmax.f32 %v2107_v13, 0.0  ;;  %v2073_v59 = vmax.f32 %v5748_v12, %v2017_v44 }
 0x27f   :  { %v2163_v53 = vmax.f32 %v2134_v40, %v2135_v60  ;;  %v1965_v42 = vpop.permute.xlu1 %1964  ;;  %v1967_v8 = vpop.permute.xlu0 %1966  ;;  %v2108_v57 = vadd.f32 %v5834_v45, %v2073_v59 }
 0x280   :  { %v2018_v3 = vsel %vm1998_vm2, %v1963_v28, %v1965_v42  ;;  %v5964_v26 = vld [vmem:[#allocation2 + $0x38] sm:$0xff] }
 0x281   :  { %2164 = vst.msk [vmem:[#allocation2 + $0x40] sm:$0xff] %vm2147_vm3, %v2163_v53  ;;  %v2074_v31 = vmax.f32 %v5758_v23, %v2018_v3  ;;  %v2136_v29 = vmax.f32 %v2108_v57, 0.0 }
 0x283   :  { %v2109_v16 = vadd.f32 %v5834_v45, %v2074_v31  ;;  %v1969_v55 = vpop.permute.xlu1 %1968  ;;  %v1971_v22 = vpop.permute.xlu0 %1970 }
 0x284   :  { %v2019_v34 = vsel %vm1998_vm2, %v1967_v8, %v1969_v55 }
 0x285   :  { %v2137_v58 = vmax.f32 %v2109_v16, 0.0  ;;  %v2075_v12 = vmax.f32 %v5765_v21, %v2019_v34  ;;  %v4087_v16 = vcombine.low %v5920_v35, %v5920_v35 }
 0x287   :  { %v2165_v47 = vmax.f32 %v2136_v29, %v2137_v58  ;;  %v1973_v11 = vpop.permute.xlu1 %1972  ;;  %v1887_v48 = vpop.permute.xlu0 %1886  ;;  %v2110_v23 = vadd.f32 %v5834_v45, %v2075_v12 }
 0x288   :  { %v2020_v17 = vsel %vm1998_vm2, %v1971_v22, %v1973_v11  ;;  %v5966_v62 = vld [vmem:[#allocation2 + $0x40] sm:$0xff] }
 0x289   :  { %2166 = vst.msk [vmem:[#allocation2 + $0x48] sm:$0xff] %vm2147_vm3, %v2165_v47  ;;  %v2076_v61 = vmax.f32 %v5772_v33, %v2020_v17  ;;  %v2205_v43 = vpack.c.bf16 %v5966_v62, %v5964_v26  ;;  %v2138_v27 = vmax.f32 %v2110_v23, 0.0 }
 0x28b   :  { %v2111_v21 = vadd.f32 %v5834_v45, %v2076_v61  ;;  %4046 = vmatmul.mubr.msk.bf16.gmra.mxu1 %vm2147_vm3, %v2205_v43  ;;  %4121 = vmatmul.mubr.msk.bf16.gmra.mxu0 %vm2147_vm3, %v2205_v43  ;;  %v1889_v9 = vpop.permute.xlu1 %1888  ;;  %v1891_v50 = vpop.permute.xlu0 %1890 }
 0x28c   :  { %v1999_v25 = vsel %vm1998_vm2, %v1887_v48, %v1889_v9  ;;  %2368 = vmatprep.mubr.bf16.mxu1 %v6599_v2  ;;  %2909 = vmatprep.mubr.bf16.mxu0 %v6599_v2  ;;  %v2636_v48 = vsel %vm2289_vm1, %v4087_v16, 0 }
 0x28d   :  { %v2139_v0 = vmax.f32 %v2111_v21, 0.0  ;;  %v2055_v33 = vmax.f32 %v5496_v5, %v1999_v25  ;;  %v4436_v21 = vld [vmem:[%s6479_s3 + $0xe4] ss:$8 sps:$4 sm:$0xff]  }
 0x28f   :  { %v2167_v38 = vmax.f32 %v2138_v27, %v2139_v0  ;;  %v1893_v37 = vpop.permute.xlu1 %1892  ;;  %v1975_v6 = vpop.permute.xlu0 %1974  ;;  %v2090_v4 = vadd.f32 %v5834_v45, %v2055_v33  ;;  %v4434_v0 = vld [vmem:[%s6479_s3 + $0xe0] ss:$8 sps:$4 sm:$0xff]  }
 0x290   :  { %v2000_v32 = vsel %vm1998_vm2, %v1891_v50, %v1893_v37  ;;  %v5988_v40 = vld [vmem:[#allocation2 + $0x48] sm:$0xff] }
 0x291   :  { %2168 = vst.msk [vmem:[#allocation2 + $0x50] sm:$0xff] %vm2147_vm3, %v2167_v38  ;;  %v2056_v14 = vmax.f32 %v5505_v10, %v2000_v32  ;;  %v2118_v46 = vmax.f32 %v2090_v4, 0.0  ;;  %v4439_v38 = vld [vmem:[%s6479_s3 + $0xd4] ss:$8 sps:$4 sm:$0xff]  }
 0x293   :  { %v2091_v36 = vadd.f32 %v5834_v45, %v2056_v14  ;;  %v1977_v1 = vpop.permute.xlu1 %1976  ;;  %v1979_v49 = vpop.permute.xlu0 %1978 }
 0x294   :  { %v2021_v39 = vsel %vm1998_vm2, %v1975_v6, %v1977_v1  ;;  %v4437_v6 = vld [vmem:[%s6479_s3 + $0xd0] ss:$8 sps:$4 sm:$0xff]   ;;  %v4440_v1 = vld [vmem:[%s6479_s3 + $0xc0] ss:$8 sps:$4 sm:$0xff]  }
 0x295   :  { %v2119_v19 = vmax.f32 %v2091_v36, 0.0  ;;  %v2077_v5 = vmax.f32 %v5786_v15, %v2021_v39 }
 0x297   :  { %v2146_v13 = vmax.f32 %v2118_v46, %v2119_v19  ;;  %v1981_v30 = vpop.permute.xlu1 %1980  ;;  %v1983_v28 = vpop.permute.xlu0 %1982  ;;  %v2112_v10 = vadd.f32 %v5834_v45, %v2077_v5  ;;  %v4445_v46 = vld [vmem:[%s6479_s3 + $0xb4] ss:$8 sps:$4 sm:$0xff]   ;;  %v2188_v5 = vpack.c.bf16 %v5964_v26, %v5942_v56  ;;  %v4450_v56 = vld [vmem:[%s6479_s3 + $0x1a4] ss:$8 sps:$4 sm:$0xff]   ;;  %v4448_v26 = vld [vmem:[%s6479_s3 + $0x1a0] ss:$8 sps:$4 sm:$0xff]  }
 0x298   :  { %v2022_v44 = vsel %vm1998_vm2, %v1979_v49, %v1981_v30  ;;  %v5990_v60 = vld [vmem:[#allocation2 + $0x50] sm:$0xff]  ;;  %v2187_v49 = vpack.c.bf16 %v5940_v20, %v5902_v54 }
 0x299   :  { %2148 = vst.msk [vmem:[#allocation2] sm:$0xff] %vm2147_vm3, %v2146_v13  ;;  %v2078_v59 = vmax.f32 %v5794_v52, %v2022_v44  ;;  %v2206_v53 = vpack.c.bf16 %v5990_v60, %v5988_v40  ;;  %v2140_v57 = vmax.f32 %v2112_v10, 0.0  ;;  %v4134_v19 = vld [vmem:[%s6479_s3 + $0x1b0] sm:$0x33]  ;;  %v2189_v13 = vpack.c.bf16 %v5988_v40, %v5966_v62  ;;  %v4454_v40 = vld [vmem:[%s6479_s3 + $0x180] ss:$8 sps:$4 sm:$0xff]  }
 0x29a   :  { %v4443_v54 = vld [vmem:[%s6479_s3 + $0xb0] ss:$8 sps:$4 sm:$0xff]   ;;  %v4146_v20 = vcombine.high %v4134_v19, %v4134_v19  ;;  %v4145_v30 = vcombine.low %v4134_v19, %v4134_v19  ;;  %v4453_v62 = vld [vmem:[%s6479_s3 + $0x194] ss:$8 sps:$4 sm:$0xff]  }
 0x29b   :  { %v2113_v15 = vadd.f32 %v5834_v45, %v2078_v59  ;;  %4047 = vmatmul.mubr.msk.bf16.gmra.mxu1 %vm2147_vm3, %v2206_v53  ;;  %4122 = vmatmul.mubr.msk.bf16.gmra.mxu0 %vm2147_vm3, %v2206_v53  ;;  %v1985_v42 = vpop.permute.xlu1 %1984  ;;  %v1987_v8 = vpop.permute.xlu0 %1986  ;;  %v4451_v44 = vld [vmem:[%s6479_s3 + $0x190] ss:$8 sps:$4 sm:$0xff]   ;;  %v4459_v10 = vld [vmem:[%s6479_s3 + $0x174] ss:$8 sps:$4 sm:$0xff]   ;;  %v4462_v53 = vld [vmem:[%s6479_s3 + $0x164] ss:$8 sps:$4 sm:$0xff]  }
 0x29c   :  { %v2023_v3 = vsel %vm1998_vm2, %v1983_v28, %v1985_v42  ;;  %2487 = vmatprep.mubr.bf16.mxu1 %v6599_v2  ;;  %2919 = vmatprep.mubr.bf16.mxu0 %v6599_v2  ;;  %v3048_v28 = vsel %vm2289_vm1, %v4145_v30, 0  ;;  %v4457_v59 = vld [vmem:[%s6479_s3 + $0x170] ss:$8 sps:$4 sm:$0xff]  }
 0x29d   :  { %v2141_v31 = vmax.f32 %v2113_v15, 0.0  ;;  %v2079_v52 = vmax.f32 %v5801_v24, %v2023_v3  ;;  %v4433_v24 = vld [vmem:[%s6479_s3 + $0xf4] ss:$8 sps:$4 sm:$0xff]   ;;  %v4460_v15 = vld [vmem:[%s6479_s3 + $0x160] ss:$8 sps:$4 sm:$0xff]  }
 0x29f   :  { %v2169_v55 = vmax.f32 %v2140_v57, %v2141_v31  ;;  %v1989_v22 = vpop.permute.xlu1 %1988  ;;  %v2114_v58 = vadd.f32 %v5834_v45, %v2079_v52  ;;  %v1991_v47 = vpop.permute.xlu0 %1990 }
 0x2a0   :  { %v2024_v34 = vsel %vm1998_vm2, %v1987_v8, %v1989_v22  ;;  %v2175_v29 = vld [vmem:[#allocation2] sm:$0xff] }
 0x2a1   :  { %2170 = vst.msk [vmem:[#allocation2 + $0x58] sm:$0xff] %vm2147_vm3, %v2169_v55  ;;  %v2080_v12 = vmax.f32 %v5808_v41, %v2024_v34  ;;  %v2185_v11 = vpack.c.bf16 %v5859_v51, %v2175_v29  ;;  %v4431_v41 = vld [vmem:[%s6479_s3 + $0xf0] ss:$8 sps:$4 sm:$0xff]   ;;  %v2142_v51 = vmax.f32 %v2114_v58, 0.0 }
 0x2a3   :  { %v2115_v35 = vadd.f32 %v5834_v45, %v2080_v12  ;;  %v1993_v17 = vpop.permute.xlu1 %1992  ;;  %4061 = vmatmul.mubr.msk.bf16.vlgmr.msra.gmra.mxu1 %vm2147_vm3, %v2185_v11  ;;  %v1995_v50 = vpop.permute.xlu0 %1994 }
 0x2a4   :  { %v2025_v23 = vsel %vm1998_vm2, %v1991_v47, %v1993_v17  ;;  %2646 = vmatpush1.bf16.msra.mxu1 %v2636_v48  ;;  %2497 = vmatprep.mubr.bf16.mxu1 %v6599_v2 }
 0x2a5   :  { %v2143_v61 = vmax.f32 %v2115_v35, 0.0  ;;  %v2081_v43 = vmax.f32 %v5815_v18, %v2025_v23  ;;  %2647 = vmatprep.subr.bf16.mxu1 %v4433_v24 }
 0x2a7   :  { %v2171_v9 = vmax.f32 %v2142_v51, %v2143_v61  ;;  %v1997_v25 = vpop.permute.xlu1 %1996  ;;  %v2116_v33 = vadd.f32 %v5834_v45, %v2081_v43 }
 0x2a8   :  { %v2026_v27 = vsel %vm1998_vm2, %v1995_v50, %v1997_v25  ;;  %2648 = vmatpush1.bf16.msra.mxu1 %v4431_v41  ;;  %v2752_v36 = vld [vmem:[#allocation2 + $0x58] sm:$0xff] }
 0x2a9   :  { %2172 = vst.msk [vmem:[#allocation2 + $0x60] sm:$0xff] %vm2147_vm3, %v2171_v9  ;;  %v2082_v18 = vmax.f32 %v5822_v63, %v2026_v27  ;;  %2649 = vmatprep.subr.bf16.mxu1 %v4436_v21  ;;  %v2144_v32 = vmax.f32 %v2116_v33, 0.0  ;;  %v4442_v63 = vld [vmem:[%s6479_s3 + $0xc4] ss:$8 sps:$4 sm:$0xff]   ;;  %v2552_v42 = vpack.c.bf16 %v2752_v36, %v5990_v60 }
 0x2ab   :  { %v2117_v37 = vadd.f32 %v5834_v45, %v2082_v18  ;;  %4062 = vmatmul.mubr.msk.bf16.gmra.mxu1 %vm2147_vm3, %v5890_v7 }
 0x2ac   :  { %2507 = vmatprep.mubr.bf16.mxu1 %v6599_v2  ;;  %2650 = vmatpush1.bf16.msra.mxu1 %v4434_v0 }
 0x2ad   :  { %v2145_v4 = vmax.f32 %v2117_v37, 0.0  ;;  %2651 = vmatprep.subr.bf16.mxu1 %v4439_v38 }
 0x2af   :  { %v2173_v14 = vmax.f32 %v2144_v32, %v2145_v4 }
 0x2b0   :  { %v6046_v45 = vld [vmem:[#allocation2 + $0x60] sm:$0xff]  ;;  %2652 = vmatpush1.bf16.msra.mxu1 %v4437_v6 }
 0x2b1   :  { %2174 = vst.msk [vmem:[#allocation2 + $0x68] sm:$0xff] %vm2147_vm3, %v2173_v14  ;;  %v2758_v39 = vpack.c.bf16 %v6046_v45, %v2752_v36  ;;  %2653 = vmatprep.subr.bf16.mxu1 %v4442_v63 }
 0x2b3   :  { %4063 = vmatmul.mubr.msk.bf16.gmra.mxu1 %vm2147_vm3, %v2187_v49  ;;  %4123 = vmatmul.mubr.msk.bf16.gmra.mxu0 %vm2147_vm3, %v2758_v39 }
 0x2b4   :  { %2517 = vmatprep.mubr.bf16.mxu1 %v6599_v2  ;;  %2654 = vmatpush1.bf16.msra.mxu1 %v4440_v1 }
 0x2b5   :  { %2655 = vmatprep.subr.bf16.mxu1 %v4445_v46 }
 0x2b8   :  { %2656 = vmatpush1.bf16.msra.mxu1 %v4443_v54  ;;  %v2959_v60 = vld [vmem:[#allocation2 + $0x68] sm:$0xff] }
 0x2b9   :  { %4147 = vmatprep.subr.msk.bf16.mxu1 %vm2289_vm1, %v4146_v20  ;;  %v2964_v8 = vpack.c.bf16 %v2959_v60, %v6046_v45 }
 0x2bb   :  { %4064 = vmatmul.mubr.msk.bf16.gmra.mxu1 %vm2147_vm3, %v2188_v5 }
 0x2bc   :  { %2527 = vmatprep.mubr.bf16.mxu1 %v6599_v2 }
 0x2c3   :  { %4065 = vmatmul.mubr.msk.bf16.gmra.mxu1 %vm2147_vm3, %v2189_v13 }
 0x2c4   :  { %2673 = vmatprep.mubr.bf16.mxu1 %v6599_v2 }
 0x2cb   :  { %4090 = vmatmul.mubr.msk.bf16.vlgmr.msra.gmra.mxu1 %vm2147_vm3, %v5890_v7  ;;  %v4456_v7 = vld [vmem:[%s6479_s3 + $0x184] ss:$8 sps:$4 sm:$0xff]   ;;  %s4506_s3 = smov 48  }
 0x2cc   :  { %3058 = vmatpush1.bf16.msra.mxu1 %v3048_v28  ;;  %2683 = vmatprep.mubr.bf16.mxu1 %v6599_v2 }
 0x2cd   :  { %3059 = vmatprep.subr.bf16.mxu1 %v4450_v56 }
 0x2d0   :  { %3060 = vmatpush1.bf16.msra.mxu1 %v4448_v26 }
 0x2d1   :  { %3061 = vmatprep.subr.bf16.mxu1 %v4453_v62 }
 0x2d3   :  { %4091 = vmatmul.mubr.msk.bf16.gmra.mxu1 %vm2147_vm3, %v2187_v49 }
 0x2d4   :  { %2693 = vmatprep.mubr.bf16.mxu1 %v6599_v2  ;;  %3062 = vmatpush1.bf16.msra.mxu1 %v4451_v44 }
 0x2d5   :  { %3063 = vmatprep.subr.bf16.mxu1 %v4456_v7 }
 0x2d8   :  { %3064 = vmatpush1.bf16.msra.mxu1 %v4454_v40 }
 0x2d9   :  { %3065 = vmatprep.subr.bf16.mxu1 %v4459_v10 }
 0x2db   :  { %4092 = vmatmul.mubr.msk.bf16.gmra.mxu1 %vm2147_vm3, %v2188_v5 }
 0x2dc   :  { %2703 = vmatprep.mubr.bf16.mxu1 %v6599_v2  ;;  %3066 = vmatpush1.bf16.msra.mxu1 %v4457_v59 }
 0x2dd   :  { %3067 = vmatprep.subr.bf16.mxu1 %v4462_v53 }
 0x2e0   :  { %3068 = vmatpush1.bf16.msra.mxu1 %v4460_v15 }
 0x2e1   :  { %3569 = vmatprep.subr.bf16.mxu1 %v6599_v2 }
 0x2e3   :  { %4093 = vmatmul.mubr.msk.bf16.gmra.mxu1 %vm2147_vm3, %v2189_v13 }
 0x2e4   :  { %2713 = vmatprep.mubr.bf16.mxu1 %v6599_v2 }
 0x2eb   :  { %4094 = vmatmul.mubr.msk.bf16.gmra.mxu1 %vm2147_vm3, %v2552_v42 }
 0x2ec   :  { %3085 = vmatprep.mubr.bf16.mxu1 %v6599_v2 }
 0x2f3   :  { %4148 = vmatmul.mubr.msk.bf16.vlgmr.msra.gmra.mxu1 %vm2147_vm3, %v2187_v49 }
 0x2f4   :  { %3095 = vmatprep.mubr.bf16.mxu1 %v6599_v2 }
 0x2fb   :  { %4149 = vmatmul.mubr.msk.bf16.gmra.mxu1 %vm2147_vm3, %v2188_v5 }
 0x2fc   :  { %3105 = vmatprep.mubr.bf16.mxu1 %v6599_v2 }
 0x303   :  { %4150 = vmatmul.mubr.msk.bf16.gmra.mxu1 %vm2147_vm3, %v2189_v13 }
 0x304   :  { %3115 = vmatprep.mubr.bf16.mxu1 %v6599_v2 }
 0x30b   :  { %4151 = vmatmul.mubr.msk.bf16.gmra.mxu1 %vm2147_vm3, %v2552_v42 }
 0x30c   :  { %3125 = vmatprep.mubr.bf16.mxu1 %v6599_v2 }
 0x313   :  { %4152 = vmatmul.mubr.msk.bf16.gmra.mxu1 %vm2147_vm3, %v2964_v8 }
 0x31b   :  { %v2330_v3 = vpop.f32.mrf.mxu1 }
 0x31d   :  { %v2332_v57 = vpop.f32.mrf.mxu1 }
 0x31f   :  { %v2334_v31 = vpop.f32.mrf.mxu1 }
 0x321   :  { %v2336_v52 = vpop.f32.mrf.mxu1 }
 0x32b   :  { %v2340_v16 = vpop.f32.mrf.mxu1 }
 0x32d   :  { %v2342_v55 = vpop.f32.mrf.mxu1 }
 0x32f   :  { %v2344_v22 = vpop.f32.mrf.mxu1 }
 0x331   :  { %v2346_v34 = vpop.f32.mrf.mxu1 }
 0x33b   :  { %v2350_v29 = vpop.f32.mrf.mxu1 }
 0x33d   :  { %v2352_v58 = vpop.f32.mrf.mxu1 }
 0x33f   :  { %v2354_v12 = vpop.f32.mrf.mxu1 }
 0x341   :  { %v2356_v47 = vpop.f32.mrf.mxu1 }
 0x34b   :  { %v2360_v11 = vpop.f32.mrf.mxu1 }
 0x34d   :  { %v2362_v48 = vpop.f32.mrf.mxu1 }
 0x34f   :  { %v2364_v24 = vpop.f32.mrf.mxu1 }
 0x351   :  { %v2366_v35 = vpop.f32.mrf.mxu1 }
 0x35b   :  { %v2370_v17 = vpop.f32.mrf.mxu1 }
 0x35d   :  { %v2372_v23 = vpop.f32.mrf.mxu1 }
 0x35f   :  { %v2374_v41 = vpop.f32.mrf.mxu1 }
 0x361   :  { %v2376_v51 = vpop.f32.mrf.mxu1 }
 0x363   :  { %v2489_v61 = vpop.f32.mrf.mxu1 }
 0x364   :  { %v2490_v10 = vadd.f32 %v2489_v61, %v2330_v3 }
 0x365   :  { %v2491_v43 = vpop.f32.mrf.mxu1 }
 0x366   :  { %v2492_v15 = vadd.f32 %v2491_v43, %v2332_v57 }
 0x367   :  { %v2493_v21 = vpop.f32.mrf.mxu1 }
 0x368   :  { %v2494_v8 = vadd.f32 %v2493_v21, %v2334_v31 }
 0x369   :  { %v2495_v9 = vpop.f32.mrf.mxu1 }
 0x36a   :  { %v2496_v50 = vadd.f32 %v2495_v9, %v2336_v52 }
 0x36b   :  { %v2499_v25 = vpop.f32.mrf.mxu1 }
 0x36c   :  { %v6130_v27 = vadd.f32 %v2499_v25, %v2340_v16 }
 0x36d   :  { %v2501_v0 = vpop.f32.mrf.mxu1 }
 0x36e   :  { %v6132_v33 = vadd.f32 %v2501_v0, %v2342_v55 }
 0x36f   :  { %v2503_v18 = vpop.f32.mrf.mxu1 }
 0x370   :  { %v6134_v38 = vadd.f32 %v2503_v18, %v2344_v22 }
 0x371   :  { %v2505_v37 = vpop.f32.mrf.mxu1 }
 0x372   :  { %v6136_v6 = vadd.f32 %v2505_v37, %v2346_v34 }
 0x373   :  { %v2509_v32 = vpop.f32.mrf.mxu1 }
 0x374   :  { %v6138_v4 = vadd.f32 %v2509_v32, %v2350_v29  ;;  %v6170_v29 = vpop.f32.mrf.mxu0 }
 0x375   :  { %v2511_v63 = vpop.f32.mrf.mxu1 }
 0x376   :  { %v6140_v14 = vadd.f32 %v2511_v63, %v2352_v58 }
 0x377   :  { %v2513_v36 = vpop.f32.mrf.mxu1 }
 0x378   :  { %v6142_v45 = vadd.f32 %v2513_v36, %v2354_v12  ;;  %v6172_v12 = vpop.f32.mrf.mxu0 }
 0x379   :  { %v2515_v1 = vpop.f32.mrf.mxu1 }
 0x37a   :  { %v6144_v49 = vadd.f32 %v2515_v1, %v2356_v47 }
 0x37b   :  { %v2519_v39 = vpop.f32.mrf.mxu1 }
 0x37c   :  { %v6146_v46 = vadd.f32 %v2519_v39, %v2360_v11  ;;  %v6174_v11 = vpop.f32.mrf.mxu0 }
 0x37d   :  { %v2521_v19 = vpop.f32.mrf.mxu1 }
 0x37e   :  { %v6148_v54 = vadd.f32 %v2521_v19, %v2362_v48 }
 0x37f   :  { %v2523_v20 = vpop.f32.mrf.mxu1 }
 0x380   :  { %v6150_v5 = vadd.f32 %v2523_v20, %v2364_v24  ;;  %v6176_v24 = vpop.f32.mrf.mxu0 }
 0x381   :  { %v2525_v13 = vpop.f32.mrf.mxu1 }
 0x382   :  { %v6152_v30 = vadd.f32 %v2525_v13, %v2366_v35 }
 0x383   :  { %v2529_v28 = vpop.f32.mrf.mxu1 }
 0x384   :  { %v6154_v56 = vadd.f32 %v2529_v28, %v2370_v17  ;;  %v2891_v17 = vpop.f32.mrf.mxu0 }
 0x385   :  { %v2531_v26 = vpop.f32.mrf.mxu1 }
 0x386   :  { %v6156_v62 = vadd.f32 %v2531_v26, %v2372_v23 }
 0x387   :  { %v2533_v44 = vpop.f32.mrf.mxu1 }
 0x388   :  { %v6158_v7 = vadd.f32 %v2533_v44, %v2374_v41 }
 0x389   :  { %v2535_v40 = vpop.f32.mrf.mxu1 }
 0x38a   :  { %v6160_v59 = vadd.f32 %v2535_v40, %v2376_v51  ;;  %v2893_v51 = vpop.f32.mrf.mxu0 }
 0x38b   :  { %v2675_v53 = vpop.f32.mrf.mxu1 }
 0x38c   :  { %v6162_v42 = vadd.f32 %v2675_v53, %v2490_v10  ;;  %v2895_v21 = vpop.f32.mrf.mxu0 }
 0x38d   :  { %v2677_v60 = vpop.f32.mrf.mxu1 }
 0x38e   :  { %v6164_v52 = vadd.f32 %v2677_v60, %v2492_v15  ;;  %v2897_v25 = vpop.f32.mrf.mxu0 }
 0x38f   :  { %v2679_v16 = vpop.f32.mrf.mxu1 }
 0x390   :  { %v6166_v55 = vadd.f32 %v2679_v16, %v2494_v8  ;;  %v2901_v18 = vpop.f32.mrf.mxu0 }
 0x391   :  { %v2681_v22 = vpop.f32.mrf.mxu1 }
 0x392   :  { %v6168_v34 = vadd.f32 %v2681_v22, %v2496_v50  ;;  %v2903_v63 = vpop.f32.mrf.mxu0 }
 0x393   :  { %v2685_v58 = vpop.f32.mrf.mxu1 }
 0x394   :  { %v2728_v39 = vadd.f32 %v2685_v58, %v6130_v27  ;;  %v2905_v19 = vpop.f32.mrf.mxu0 }
 0x395   :  { %v2687_v3 = vpop.f32.mrf.mxu1 }
 0x396   :  { %v2729_v13 = vadd.f32 %v2687_v3, %v6132_v33  ;;  %v2934_v44 = vadd.f32 %v2891_v17, %v2728_v39  ;;  %v2907_v40 = vpop.f32.mrf.mxu0 }
 0x397   :  { %v2689_v47 = vpop.f32.mrf.mxu1 }
 0x398   :  { %v2730_v26 = vadd.f32 %v2689_v47, %v6134_v38  ;;  %v2935_v60 = vadd.f32 %v2893_v51, %v2729_v13  ;;  %v2911_v8 = vpop.f32.mrf.mxu0 }
 0x399   :  { %v2691_v57 = vpop.f32.mrf.mxu1 }
 0x39a   :  { %v2731_v53 = vadd.f32 %v2691_v57, %v6136_v6  ;;  %v2936_v33 = vadd.f32 %v2895_v21, %v2730_v26  ;;  %v2913_v47 = vpop.f32.mrf.mxu0 }
 0x39b   :  { %v2695_v48 = vpop.f32.mrf.mxu1 }
 0x39c   :  { %v2732_v27 = vadd.f32 %v2695_v48, %v6138_v4  ;;  %v2937_v6 = vadd.f32 %v2897_v25, %v2731_v53 }
 0x39d   :  { %v2697_v31 = vpop.f32.mrf.mxu1 }
 0x39e   :  { %v2733_v38 = vadd.f32 %v2697_v31, %v6140_v14  ;;  %v2938_v4 = vadd.f32 %v2901_v18, %v2732_v27  ;;  %v2915_v31 = vpop.f32.mrf.mxu0 }
 0x39f   :  { %v2699_v35 = vpop.f32.mrf.mxu1 }
 0x3a0   :  { %v2734_v17 = vadd.f32 %v2699_v35, %v6142_v45  ;;  %v2939_v14 = vadd.f32 %v2903_v63, %v2733_v38 }
 0x3a1   :  { %v2701_v23 = vpop.f32.mrf.mxu1 }
 0x3a2   :  { %v2735_v21 = vadd.f32 %v2701_v23, %v6144_v49  ;;  %v2940_v45 = vadd.f32 %v2905_v19, %v2734_v17  ;;  %v2917_v23 = vpop.f32.mrf.mxu0 }
 0x3a3   :  { %v2705_v41 = vpop.f32.mrf.mxu1 }
 0x3a4   :  { %v2736_v25 = vadd.f32 %v2705_v41, %v6146_v46  ;;  %v2941_v49 = vadd.f32 %v2907_v40, %v2735_v21  ;;  %v2921_v41 = vpop.f32.mrf.mxu0 }
 0x3a5   :  { %v2707_v61 = vpop.f32.mrf.mxu1 }
 0x3a6   :  { %v2737_v18 = vadd.f32 %v2707_v61, %v6148_v54  ;;  %v2942_v46 = vadd.f32 %v2911_v8, %v2736_v25  ;;  %v2923_v8 = vpop.f32.mrf.mxu0 }
 0x3a7   :  { %v2709_v43 = vpop.f32.mrf.mxu1 }
 0x3a8   :  { %v2738_v63 = vadd.f32 %v2709_v43, %v6150_v5  ;;  %v2943_v61 = vadd.f32 %v2913_v47, %v2737_v18  ;;  %v2925_v38 = vpop.f32.mrf.mxu0 }
 0x3a9   :  { %v6178_v9 = vpop.f32.mrf.mxu1 }
 0x3aa   :  { %v2739_v19 = vadd.f32 %v6178_v9, %v6152_v30  ;;  %v2944_v43 = vadd.f32 %v2915_v31, %v2738_v63  ;;  %v2931_v31 = vadd.f32 %v6172_v12, %v6164_v52  ;;  %v4465_v52 = vld [vmem:[%s6481_s5 + $0x70] sm:$0xff]   ;;  %v4473_v63 = vld [vmem:[%s6481_s5 + $0xa8] sm:$0xff]  }
 0x3ab   :  { %v6180_v50 = vpop.f32.mrf.mxu1 }
 0x3ac   :  { %v2945_v9 = vadd.f32 %v2917_v23, %v2739_v19  ;;  %v6312_v23 = vld [vmem:[%s6482_s4] ss:$0 sm:$0xff] }
 0x3ad   :  { %v6182_v0 = vpop.f32.mrf.mxu1 }
 0x3af   :  { %v6184_v37 = vpop.f32.mrf.mxu1 }
 0x3b1   :  { %v6186_v32 = vpop.f32.mrf.mxu1 }
 0x3b2   :  { %v2743_v47 = vadd.f32 %v6186_v32, %v6160_v59  ;;  %v2930_v59 = vadd.f32 %v6170_v29, %v6162_v42  ;;  %v2932_v42 = vadd.f32 %v6174_v11, %v6166_v55  ;;  %v4464_v29 = vld [vmem:[%s6481_s5 + $0x38] sm:$0xff]   ;;  %v4466_v55 = vld [vmem:[%s6481_s5 + $0x30] sm:$0xff]  }
 0x3b3   :  { %v6188_v36 = vpop.f32.mrf.mxu1  ;;  %v4467_v11 = vld [vmem:[%s6481_s5 + $0xb8] sm:$0xff]  }
 0x3b4   :  { %3570 = vmatpush1.bf16.msra.mxu1 %v4467_v11 }
 0x3b5   :  { %v6190_v1 = vpop.f32.mrf.mxu1  ;;  %3571 = vmatprep.subr.bf16.mxu1 %v6599_v2 }
 0x3b6   :  { %v3137_v25 = vadd.f32 %v6190_v1, %v2931_v31  ;;  %v4484_v31 = vld [vmem:[%s6481_s5 + $0x88] sm:$0xff]  }
 0x3b7   :  { %v6193_v20 = vpop.f32.mrf.mxu1 }
 0x3b8   :  { %v6279_v12 = vadd.f32 %v6193_v20, %v2932_v42 }
 0x3b9   :  { %v6196_v28 = vpop.f32.mrf.mxu1 }
 0x3bb   :  { %v3097_v10 = vpop.f32.mrf.mxu1 }
 0x3bc   :  { %v6200_v15 = vadd.f32 %v3097_v10, %v2934_v44 }
 0x3bd   :  { %v3099_v16 = vpop.f32.mrf.mxu1 }
 0x3be   :  { %v3141_v22 = vadd.f32 %v3099_v16, %v2935_v60  ;;  %3184 = vrot.lane.b32.xlu0 %v6200_v15, %s4506_s3  ;;  %v2740_v16 = vadd.f32 %v6180_v50, %v6154_v56 }
 0x3bf   :  { %v3101_v58 = vpop.f32.mrf.mxu1 }
 0x3c0   :  { %v6206_v3 = vadd.f32 %v3101_v58, %v2936_v33  ;;  %3186 = vrot.lane.b32.xlu1 %v3141_v22, %s4506_s3  ;;  %v2741_v22 = vadd.f32 %v6182_v0, %v6156_v62  ;;  %v2742_v58 = vadd.f32 %v6184_v37, %v6158_v7  ;;  %v2946_v50 = vadd.f32 %v2921_v41, %v2740_v16  ;;  %v2927_v37 = vpop.f32.mrf.mxu0  ;;  %v4474_v16 = vld [vmem:[%s6481_s5 + $0x58] sm:$0xff]  }
 0x3c1   :  { %v3103_v57 = vpop.f32.mrf.mxu1 }
 0x3c2   :  { %v3143_v51 = vadd.f32 %v3103_v57, %v2937_v6  ;;  %3188 = vrot.lane.b32.xlu0 %v6206_v3, %s4506_s3  ;;  %v2947_v0 = vadd.f32 %v2923_v8, %v2741_v22  ;;  %v2948_v7 = vadd.f32 %v2925_v38, %v2742_v58 }
 0x3c3   :  { %v3107_v48 = vpop.f32.mrf.mxu1 }
 0x3c4   :  { %v6213_v39 = vadd.f32 %v3107_v48, %v2938_v4  ;;  %3190 = vrot.lane.b32.xlu1 %v3143_v51, %s4506_s3  ;;  %v2949_v48 = vadd.f32 %v2927_v37, %v2743_v47  ;;  %v4482_v37 = vld [vmem:[%s6481_s5 + $0x8] sm:$0xff]  }
 0x3c5   :  { %v3109_v13 = vpop.f32.mrf.mxu1 }
 0x3c6   :  { %v3145_v26 = vadd.f32 %v3109_v13, %v2939_v14  ;;  %3192 = vrot.lane.b32.xlu0 %v6213_v39, %s4506_s3  ;;  %v6259_v14 = vadd.f32 %v6188_v36, %v2930_v59  ;;  %v4463_v13 = vld [vmem:[%s6481_s5 + $0x78] sm:$0xff]   ;;  %v2933_v36 = vadd.f32 %v6176_v24, %v6168_v34  ;;  %v4468_v34 = vld [vmem:[%s6481_s5 + $0x68] sm:$0xff]  }
 0x3c7   :  { %v3111_v35 = vpop.f32.mrf.mxu1  ;;  %4199 = vmatprep.subr.bf16.mxu0 %v4463_v13 }
 0x3c8   :  { %v6220_v44 = vadd.f32 %v3111_v35, %v2940_v45  ;;  %3194 = vrot.lane.b32.xlu1 %v3145_v26, %s4506_s3  ;;  %4200 = vmatpush3.bf16.msra.mxu0 %v4464_v29  ;;  %v3139_v1 = vadd.f32 %v6196_v28, %v2933_v36  ;;  %v4469_v28 = vld [vmem:[%s6481_s5 + $0x28] sm:$0xff]   ;;  %v4470_v45 = vld [vmem:[%s6481_s5 + $0xb0] sm:$0xff]   ;;  %v4471_v35 = vld [vmem:[%s6481_s5 + $0x60] sm:$0xff]  }
 0x3c9   :  { %v3113_v10 = vpop.f32.mrf.mxu1  ;;  %4201 = vmatprep.subr.bf16.mxu0 %v4465_v52  ;;  %3572 = vmatpush1.bf16.msra.mxu1 %v4470_v45  ;;  %v4485_v36 = vld [vmem:[%s6481_s5] sm:$0xff]  }
 0x3ca   :  { %v3147_v53 = vadd.f32 %v3113_v10, %v2941_v49  ;;  %3196 = vrot.lane.b32.xlu0 %v6220_v44, %s4506_s3  ;;  %v4472_v10 = vld [vmem:[%s6481_s5 + $0x20] sm:$0xff]   ;;  %3573 = vmatprep.subr.bf16.mxu1 %v6599_v2 }
 0x3cb   :  { %v3117_v60 = vpop.f32.mrf.mxu1 }
 0x3cc   :  { %v6228_v54 = vadd.f32 %v3117_v60, %v2942_v46  ;;  %3198 = vrot.lane.b32.xlu1 %v3147_v53, %s4506_s3  ;;  %4202 = vmatpush3.bf16.msra.mxu0 %v4466_v55 }
 0x3cd   :  { %v3119_v40 = vpop.f32.mrf.mxu1  ;;  %4203 = vmatprep.subr.bf16.mxu0 %v4468_v34  ;;  %3574 = vmatpush1.bf16.msra.mxu1 %v4473_v63 }
 0x3ce   :  { %v3149_v5 = vadd.f32 %v3119_v40, %v2943_v61  ;;  %3200 = vrot.lane.b32.xlu0 %v6228_v54, %s4506_s3  ;;  %3575 = vmatprep.subr.bf16.mxu1 %v6599_v2 }
 0x3cf   :  { %v3121_v27 = vpop.f32.mrf.mxu1 }
 0x3d0   :  { %v6237_v30 = vadd.f32 %v3121_v27, %v2944_v43  ;;  %3202 = vrot.lane.b32.xlu1 %v3149_v5, %s4506_s3  ;;  %4204 = vmatpush3.bf16.msra.mxu0 %v4469_v28  ;;  %v4475_v5 = vld [vmem:[%s6481_s5 + $0x18] sm:$0xff]  }
 0x3d1   :  { %v3123_v33 = vpop.f32.mrf.mxu1  ;;  %4205 = vmatprep.subr.bf16.mxu0 %v4471_v35 }
 0x3d2   :  { %v3151_v56 = vadd.f32 %v3123_v33, %v2945_v9  ;;  %3204 = vrot.lane.b32.xlu0 %v6237_v30, %s4506_s3  ;;  %v4477_v9 = vld [vmem:[%s6481_s5 + $0x50] sm:$0xff]   ;;  %v4478_v33 = vld [vmem:[%s6481_s5 + $0x98] sm:$0xff]  }
 0x3d3   :  { %v3127_v6 = vpop.f32.mrf.mxu1 }
 0x3d4   :  { %v6246_v62 = vadd.f32 %v3127_v6, %v2946_v50  ;;  %3206 = vrot.lane.b32.xlu1 %v3151_v56, %s4506_s3  ;;  %4206 = vmatpush3.bf16.msra.mxu0 %v4472_v10 }
 0x3d5   :  { %v3129_v57 = vpop.f32.mrf.mxu1  ;;  %4207 = vmatprep.subr.bf16.mxu0 %v4474_v16  ;;  %v4510_v16 = vmov 0.0  }
 0x3d6   :  { %v3153_v17 = vadd.f32 %v3129_v57, %v2947_v0  ;;  %3208 = vrot.lane.b32.xlu0 %v6246_v62, %s4506_s3 }
 0x3d7   :  { %v3131_v51 = vpop.f32.mrf.mxu1 }
 0x3d8   :  { %v6251_v4 = vadd.f32 %v3131_v51, %v2948_v7  ;;  %3210 = vrot.lane.b32.xlu1 %v3153_v17, %s4506_s3  ;;  %4208 = vmatpush3.bf16.msra.mxu0 %v4475_v5  ;;  %v4480_v7 = vld [vmem:[%s6481_s5 + $0x48] sm:$0xff]  }
 0x3d9   :  { %v3133_v21 = vpop.f32.mrf.mxu1  ;;  %4209 = vmatprep.subr.bf16.mxu0 %v4477_v9 }
 0x3da   :  { %v3155_v32 = vadd.f32 %v3133_v21, %v2949_v48  ;;  %3212 = vrot.lane.b32.xlu0 %v6251_v4, %s4506_s3 }
 0x3dc   :  { %3214 = vrot.lane.b32.xlu1 %v3155_v32, %s4506_s3  ;;  %v4483_v32 = vld [vmem:[%s6481_s5 + $0x40] sm:$0xff]  }
 0x3de   :  { %3176 = vrot.lane.b32.xlu0 %v6259_v14, %s4506_s3 }
 0x3e0   :  { %3178 = vrot.lane.b32.xlu1 %v3137_v25, %s4506_s3 }
 0x3e2   :  { %3180 = vrot.lane.b32.xlu0 %v6279_v12, %s4506_s3 }
 0x3e4   :  { %3182 = vrot.lane.b32.xlu1 %v3139_v1, %s4506_s3 }
 0x430   :  { %v3185_v24 = vpop.permute.xlu0 %3184 }
 0x432   :  { %v3187_v20 = vpop.permute.xlu1 %3186 }
 0x433   :  { %v3219_v26 = vsel %vm3216_vm4, %v3185_v24, %v3187_v20 }
 0x434   :  { %v3239_v18 = vmax.f32 %v6200_v15, %v3219_v26  ;;  %v3189_v49 = vpop.permute.xlu0 %3188  ;;  %v4486_v26 = vld [vmem:[%s6481_s5 + $0x80] sm:$0xff]  }
 0x436   :  { %v3191_v53 = vpop.permute.xlu1 %3190  ;;  %v3256_v46 = vadd.f32 %v6312_v23, %v3239_v18  ;;  %v4487_v18 = vld [vmem:[%s6481_s5 + $0xc0] sm:$0xff]  }
 0x437   :  { %v3220_v15 = vsel %vm3216_vm4, %v3189_v49, %v3191_v53 }
 0x438   :  { %v3240_v41 = vmax.f32 %v6206_v3, %v3220_v15  ;;  %v3193_v60 = vpop.permute.xlu0 %3192  ;;  %v4476_v3 = vld [vmem:[%s6481_s5 + $0xa0] sm:$0xff]   ;;  %v3266_v43 = vmax.f32 %v3256_v46, 0.0 }
 0x439   :  { %3576 = vmatpush1.bf16.msra.mxu1 %v4476_v3 }
 0x43a   :  { %v3257_v19 = vadd.f32 %v6312_v23, %v3240_v41  ;;  %v3195_v61 = vpop.permute.xlu1 %3194  ;;  %3577 = vmatprep.subr.bf16.mxu1 %v6599_v2 }
 0x43b   :  { %v3221_v40 = vsel %vm3216_vm4, %v3193_v60, %v3195_v61 }
 0x43c   :  { %v3267_v8 = vmax.f32 %v3257_v19, 0.0  ;;  %v3241_v27 = vmax.f32 %v6213_v39, %v3221_v40  ;;  %v3197_v22 = vpop.permute.xlu0 %3196  ;;  %v4479_v39 = vld [vmem:[%s6481_s5 + $0x10] sm:$0xff]  }
 0x43d   :  { %3578 = vmatpush1.bf16.msra.mxu1 %v4478_v33  ;;  %4210 = vmatpush3.bf16.msra.mxu0 %v4479_v39 }
 0x43e   :  { %v3199_v58 = vpop.permute.xlu1 %3198  ;;  %v3277_v56 = vmax.f32 %v3266_v43, %v3267_v8  ;;  %v3258_v38 = vadd.f32 %v6312_v23, %v3241_v27  ;;  %3579 = vmatprep.subr.bf16.mxu1 %v6599_v2  ;;  %4211 = vmatprep.subr.bf16.mxu0 %v4480_v7  ;;  %v4492_v7 = vld [vmem:[%s6483_s7 + $0x18] sm:$0xff]  }
 0x43f   :  { %v3222_v50 = vsel %vm3216_vm4, %v3197_v22, %v3199_v58 }
 0x440   :  { %v3242_v6 = vmax.f32 %v6220_v44, %v3222_v50  ;;  %3279 = vrot.lane.b32.xlu0 %v3277_v56, %s4507_s25  ;;  %v3201_v47 = vpop.permute.xlu0 %3200  ;;  %v4481_v44 = vld [vmem:[%s6481_s5 + $0x90] sm:$0xff]   ;;  %v3268_v51 = vmax.f32 %v3258_v38, 0.0  ;;  %s4511_s5 = smov 64   ;;  %v4488_v56 = vld [vmem:[%s6483_s7 + $0x38] sm:$0xff]  }
 0x441   :  { %3580 = vmatpush1.bf16.msra.mxu1 %v4481_v44  ;;  %4212 = vmatpush3.bf16.msra.mxu0 %v4482_v37  ;;  %v4489_v50 = vld [vmem:[%s6483_s7 + $0x30] sm:$0xff]   ;;  %v4494_v37 = vld [vmem:[%s6483_s7 + $0x8] sm:$0xff]  }
 0x442   :  { %v3259_v0 = vadd.f32 %v6312_v23, %v3242_v6  ;;  %v3203_v57 = vpop.permute.xlu1 %3202  ;;  %3581 = vmatprep.subr.bf16.mxu1 %v6599_v2  ;;  %4213 = vmatprep.subr.bf16.mxu0 %v4483_v32  ;;  %v4493_v44 = vld [vmem:[%s6483_s7 + $0x10] sm:$0xff]   ;;  %v4499_v32 = vld [vmem:[%s6484_s9 + $0x20] sm:$0xff]  }
 0x443   :  { %v3223_v17 = vsel %vm3216_vm4, %v3201_v47, %v3203_v57  ;;  %v4490_v57 = vld [vmem:[%s6483_s7 + $0x28] sm:$0xff]  }
 0x444   :  { %v3269_v48 = vmax.f32 %v3259_v0, 0.0  ;;  %v3243_v21 = vmax.f32 %v6228_v54, %v3223_v17  ;;  %v3205_v59 = vpop.permute.xlu0 %3204  ;;  %v4491_v17 = vld [vmem:[%s6483_s7 + $0x20] sm:$0xff]  }
 0x445   :  { %3582 = vmatpush1.bf16.msra.mxu1 %v4484_v31  ;;  %4214 = vmatpush3.bf16.msra.mxu0 %v4485_v36  ;;  %v4500_v31 = vld [vmem:[%s6484_s9 + $0x18] sm:$0xff]  }
 0x446   :  { %v3207_v13 = vpop.permute.xlu1 %3206  ;;  %v3286_v25 = vmax.f32 %v3268_v51, %v3269_v48  ;;  %v3260_v54 = vadd.f32 %v6312_v23, %v3243_v21  ;;  %3583 = vmatprep.subr.bf16.mxu1 %v6599_v2  ;;  %4239 = vmatprep.subr.bf16.mxu0 %v4510_v16  ;;  %v4495_v51 = vld [vmem:[%s6483_s7] sm:$0xff]   ;;  %v4496_v48 = vld [vmem:[%s6484_s9 + $0x38] sm:$0xff]   ;;  %v4497_v21 = vld [vmem:[%s6484_s9 + $0x30] sm:$0xff]  }
 0x447   :  { %v3224_v42 = vsel %vm3216_vm4, %v3205_v59, %v3207_v13  ;;  %v4498_v59 = vld [vmem:[%s6484_s9 + $0x28] sm:$0xff]   ;;  %v4501_v13 = vld [vmem:[%s6484_s9 + $0x10] sm:$0xff]  }
 0x448   :  { %v3244_v29 = vmax.f32 %v6237_v30, %v3224_v42  ;;  %3288 = vrot.lane.b32.xlu1 %v3286_v25, %s4508_s15  ;;  %v3209_v52 = vpop.permute.xlu0 %3208  ;;  %v3270_v34 = vmax.f32 %v3260_v54, 0.0 }
 0x449   :  { %3584 = vmatpush1.bf16.msra.mxu1 %v4486_v26 }
 0x44a   :  { %v3261_v55 = vadd.f32 %v6312_v23, %v3244_v29  ;;  %v3211_v11 = vpop.permute.xlu1 %3210  ;;  %3599 = vmatprep.subr.bf16.mxu1 %v6599_v2 }
 0x44b   :  { %v3225_v1 = vsel %vm3216_vm4, %v3209_v52, %v3211_v11  ;;  %v4154_v52 = vld [vmem:[%s6485_s6] ss:$0 sm:$0xff] }
 0x44c   :  { %v3271_v24 = vmax.f32 %v3261_v55, 0.0  ;;  %v3245_v30 = vmax.f32 %v6246_v62, %v3225_v1  ;;  %v3213_v20 = vpop.permute.xlu0 %3212 }
 0x44d   :  { %3600 = vmatpush2.bf16.msra.mxu1 %v4487_v18 }
 0x44e   :  { %v3215_v28 = vpop.permute.xlu1 %3214  ;;  %v3293_v45 = vmax.f32 %v3270_v34, %v3271_v24  ;;  %v3262_v49 = vadd.f32 %v6312_v23, %v3245_v30  ;;  %4259 = vmatprep.subr.bf16.mxu1 %v4510_v16 }
 0x44f   :  { %v3226_v35 = vsel %vm3216_vm4, %v3213_v20, %v3215_v28  ;;  %v4502_v28 = vld [vmem:[%s6484_s9 + $0x8] sm:$0xff]  }
 0x450   :  { %v3246_v10 = vmax.f32 %v6251_v4, %v3226_v35  ;;  %3295 = vrot.lane.b32.xlu0 %v3293_v45, %s4509_s20  ;;  %v3177_v62 = vpop.permute.xlu0 %3176  ;;  %v3272_v46 = vmax.f32 %v3262_v49, 0.0  ;;  %v4503_v45 = vld [vmem:[%s6484_s9] sm:$0xff]  }
 0x451   :  { %v4181_v35 = vld [vmem:[%s6486_s8] ss:$0 sm:$0xff] }
 0x452   :  { %v3263_v63 = vadd.f32 %v6312_v23, %v3246_v10  ;;  %v3179_v53 = vpop.permute.xlu1 %3178 }
 0x453   :  { %v3217_v15 = vsel %vm3216_vm4, %v3177_v62, %v3179_v53 }
 0x454   :  { %v3273_v41 = vmax.f32 %v3263_v63, 0.0  ;;  %v3237_v60 = vmax.f32 %v6259_v14, %v3217_v15  ;;  %v3181_v19 = vpop.permute.xlu0 %3180 }
 0x456   :  { %v3183_v61 = vpop.permute.xlu1 %3182  ;;  %v3302_v40 = vmax.f32 %v3272_v46, %v3273_v41  ;;  %v3254_v2 = vadd.f32 %v6312_v23, %v3237_v60  ;;  %v4190_v46 = vld [vmem:[%s6487_s10] ss:$0 sm:$0xff] }
 0x457   :  { %v3218_v4 = vsel %vm3216_vm4, %v3181_v19, %v3183_v61 }
 0x458   :  { %v3238_v5 = vmax.f32 %v6279_v12, %v3218_v4  ;;  %3304 = vrot.lane.b32.xlu1 %v3302_v40, %s4511_s5  ;;  %v3264_v14 = vmax.f32 %v3254_v2, 0.0 }
 0x45a   :  { %v3255_v3 = vadd.f32 %v6312_v23, %v3238_v5 }
 0x45c   :  { %v3265_v43 = vmax.f32 %v3255_v3, 0.0 }
 0x45e   :  { %v3274_v8 = vmax.f32 %v3264_v14, %v3265_v43 }
 0x460   :  { %3276 = vst.msk [vmem:[#allocation3] sm:$0xff] %vm3275_vm5, %v3274_v8 }
 0x4b2   :  { %v3280_v27 = vpop.permute.xlu0 %3279 }
 0x4b3   :  { %3283 = vst.msk [vmem:[#allocation3] sm:$0xff] %vm3282_vm6, %v3280_v27 }
 0x4b4   :  { %3285 = vst.msk [vmem:[#allocation3 + $0x8] sm:$0xff] %vm3284_vm7, %v3280_v27 }
 0x4ba   :  { %v3289_v22 = vpop.permute.xlu1 %3288  ;;  %v3311_v23 = vld [vmem:[#allocation3] sm:$0xff] }
 0x4bb   :  { %3292 = vst.msk [vmem:[#allocation3 + $0x8] sm:$0xff] %vm3291_vm8, %v3289_v22  ;;  %v3315_v39 = vpack.c.bf16 %v3311_v23, %v3311_v23 }
 0x4c2   :  { %v3296_v12 = vpop.permute.xlu0 %3295 }
 0x4c3   :  { %3299 = vst.msk [vmem:[#allocation3 + $0x8] sm:$0xff] %vm3298_vm9, %v3296_v12 }
 0x4c4   :  { %3301 = vst.msk [vmem:[#allocation3 + $0x10] sm:$0xff] %vm3300_vm10, %v3296_v12 }
 0x4ca   :  { %v3305_v9 = vpop.permute.xlu1 %3304  ;;  %v3312_v33 = vld [vmem:[#allocation3 + $0x8] sm:$0xff] }
 0x4cb   :  { %3308 = vst.msk [vmem:[#allocation3 + $0x10] sm:$0xff] %vm3307_vm11, %v3305_v9  ;;  %v3316_v58 = vpack.c.bf16 %v3312_v33, %v3312_v33 }
 0x4cc   :  { %3310 = vst.msk [vmem:[#allocation3 + $0x18] sm:$0xff] %vm3309_vm12, %v3305_v9 }
 0x4cd   :  { %3561 = vmatprep.mubr.bf16.mxu0 %v3316_v58 }
 0x4ce   :  { %3562 = vmatmul.mubr.bf16.vlgmr.msra.gmra.mxu0 %v3315_v39 }
 0x4cf   :  { %4240 = vmatpush3.bf16.msra.mxu0 %v4488_v56  ;;  %4255 = vmatprep.mubr.msk.bf16.mxu0 %vm4512_vm13, %v4510_v16 }
 0x4d0   :  { %4241 = vmatprep.subr.bf16.mxu0 %v4510_v16 }
 0x4d2   :  { %v3313_v6 = vld [vmem:[#allocation3 + $0x10] sm:$0xff] }
 0x4d3   :  { %v3314_v38 = vld [vmem:[#allocation3 + $0x18] sm:$0xff]  ;;  %v3317_v0 = vpack.c.bf16 %v3313_v6, %v3313_v6  ;;  %4242 = vmatpush3.bf16.msra.mxu0 %v4489_v50 }
 0x4d4   :  { %v3318_v47 = vpack.c.bf16 %v3314_v38, %v3314_v38  ;;  %4243 = vmatprep.subr.bf16.mxu0 %v4510_v16 }
 0x4d6   :  { %4180 = vmatprep.mubr.msk.bf16.mxu1 %vm3309_vm12, %v3318_v47 }
 0x4d7   :  { %3602 = vmatmul.mubr.bf16.vlgmr.msra.gmra.mxu1 %v3317_v0  ;;  %4244 = vmatpush3.bf16.msra.mxu0 %v4490_v57 }
 0x4d8   :  { %4245 = vmatprep.subr.bf16.mxu0 %v4510_v16  ;;  %4275 = vmatprep.mubr.msk.bf16.mxu1 %vm4512_vm13, %v4510_v16 }
 0x4d9   :  { %4260 = vmatpush3.bf16.msra.mxu1 %v4496_v48 }
 0x4da   :  { %4261 = vmatprep.subr.bf16.mxu1 %v4510_v16 }
 0x4db   :  { %4246 = vmatpush3.bf16.msra.mxu0 %v4491_v17 }
 0x4dc   :  { %4247 = vmatprep.subr.bf16.mxu0 %v4510_v16 }
 0x4dd   :  { %4262 = vmatpush3.bf16.msra.mxu1 %v4497_v21 }
 0x4de   :  { %4263 = vmatprep.subr.bf16.mxu1 %v4510_v16 }
 0x4df   :  { %4248 = vmatpush3.bf16.msra.mxu0 %v4492_v7 }
 0x4e0   :  { %4249 = vmatprep.subr.bf16.mxu0 %v4510_v16 }
 0x4e1   :  { %4264 = vmatpush3.bf16.msra.mxu1 %v4498_v59 }
 0x4e2   :  { %4265 = vmatprep.subr.bf16.mxu1 %v4510_v16 }
 0x4e3   :  { %4250 = vmatpush3.bf16.msra.mxu0 %v4493_v44 }
 0x4e4   :  { %4251 = vmatprep.subr.bf16.mxu0 %v4510_v16 }
 0x4e5   :  { %4266 = vmatpush3.bf16.msra.mxu1 %v4499_v32 }
 0x4e6   :  { %4267 = vmatprep.subr.bf16.mxu1 %v4510_v16 }
 0x4e7   :  { %4252 = vmatpush3.bf16.msra.mxu0 %v4494_v37 }
 0x4e8   :  { %4253 = vmatprep.subr.bf16.mxu0 %v4510_v16 }
 0x4e9   :  { %4268 = vmatpush3.bf16.msra.mxu1 %v4500_v31 }
 0x4ea   :  { %4269 = vmatprep.subr.bf16.mxu1 %v4510_v16 }
 0x4eb   :  { %4254 = vmatpush3.bf16.msra.mxu0 %v4495_v51 }
 0x4ed   :  { %4270 = vmatpush3.bf16.msra.mxu1 %v4501_v13 }
 0x4ee   :  { %4271 = vmatprep.subr.bf16.mxu1 %v4510_v16 }
 0x4f1   :  { %4272 = vmatpush3.bf16.msra.mxu1 %v4502_v28 }
 0x4f2   :  { %4273 = vmatprep.subr.bf16.mxu1 %v4510_v16 }
 0x4f5   :  { %4274 = vmatpush3.bf16.msra.mxu1 %v4503_v45 }
 0x58e   :  { %v4215_v25 = vpop.f32.mrf.mxu0 }
 0x590   :  { %v4216_v42 = vpop.f32.mrf.mxu0 }
 0x591   :  { %v4217_v54 = vadd.f32 %v4216_v42, %v4215_v25 }
 0x592   :  { %v4218_v29 = vpop.f32.mrf.mxu0 }
 0x593   :  { %v3564_v55 = vadd.f32 %v4217_v54, %v4154_v52 }
 0x594   :  { %v4219_v36 = vpop.f32.mrf.mxu0 }
 0x597   :  { %v3603_v11 = vpop.f32.mrf.mxu1 }
 0x598   :  { %v3604_v1 = vadd.f32 %v3603_v11, %v3564_v55 }
 0x599   :  { %v3605_v34 = vpop.f32.mrf.mxu1 }
 0x59a   :  { %v3609_v24 = vmax.f32 %v3604_v1, 0.0 }
 0x59b   :  { %v3606_v30 = vpop.f32.mrf.mxu1 }
 0x59c   :  { %v3610_v20 = vpack.c.bf16 %v3609_v24, %v3609_v24 }
 0x59d   :  { %v3607_v26 = vpop.f32.mrf.mxu1 }
 0x59e   :  { %4256 = vmatmul.mubr.bf16.vlgmr.msra.gmra.mxu0 %v3610_v20 }
 0x65e   :  { %v3716_v18 = vpop.f32.mrf.mxu0 }
 0x65f   :  { %v3717_v49 = vadd.f32 %v4181_v35, %v3716_v18 }
 0x660   :  { %v4257_v10 = vpop.f32.mrf.mxu0 }
 0x661   :  { %v3722_v62 = vmax.f32 %v3717_v49, 0.0 }
 0x662   :  { %v3719_v63 = vpop.f32.mrf.mxu0 }
 0x663   :  { %v3723_v53 = vpack.c.bf16 %v3722_v62, %v3722_v62 }
 0x664   :  { %v4258_v15 = vpop.f32.mrf.mxu0 }
 0x665   :  { %4276 = vmatmul.mubr.bf16.vlgmr.msra.gmra.mxu1 %v3723_v53 }
 0x725   :  { %v3829_v41 = vpop.f32.mrf.mxu1 }
 0x726   :  { %v3830_v60 = vadd.f32 %v4190_v46, %v3829_v41 }
 0x727   :  { %v4277_v19 = vpop.f32.mrf.mxu1 }
 0x728   :  { %3835 = vst [vmem:[%s6488_s11] sm:$0xff] %v3830_v60 }
 0x729   :  { %v3832_v61 = vpop.f32.mrf.mxu1 }
 0x72b   :  { %v4278_v40 = vpop.f32.mrf.mxu1 }

</bundles_post_ra>
